<compile_context>
chip_gen: v6e
topology: v6e:2x2x1
jax: 0.10.0
libtpu: 0.0.40
codegen_flags: <defaults>
</compile_context>

<pallas_src>
import functools

import jax
import jax.numpy as jnp
from jax.experimental import pallas as pl
from jax.experimental.pallas import tpu as pltpu

VMEM_LIMIT_BYTES = 32 * 1024 * 1024   # safe on v5e (128M phys), v6e (128M), v7x (64M)


# ----------------------------------------------------------------------------
# Pallas kernels
# ----------------------------------------------------------------------------
def _shifted_conv_kernel(x_ref, w_ref, b_ref, o_ref, *, iw, span, kh, kw, relu_out):
    """Stride-1 conv as kh*kw shifted matmuls over a flattened (rows, Cin) image.

    x_ref : (IH*IW, Cin)        bf16, spatially pre-padded, row-major flattened
    w_ref : (kh*kw, Cin, Cout)  bf16
    b_ref : (1, Cout)           f32
    o_ref : (span, Cout)        "wide band": row g = y*IW + x  (x < OW valid)
    """
    cout = o_ref.shape[-1]
    acc = jnp.zeros((span, cout), jnp.float32)
    for di in range(kh):
        for dj in range(kw):
            base = di * iw + dj
            acc = acc + jnp.dot(x_ref[base:base + span, :],
                                w_ref[di * kw + dj],
                                preferred_element_type=jnp.float32)
    acc = acc + b_ref[...]
    if relu_out:
        acc = jnp.maximum(acc, 0.0)
    o_ref[...] = acc.astype(o_ref.dtype)


def _conv3_res_stack_kernel(x_ref, w3_ref, b3_ref, w1_ref, w2_ref, mask_ref,
                            o_ref, r_pad,
                            *, wp, span, band_off, num_layers):
    """Fused conv3 (3x3, p1, +bias) + residual stack + final ReLU (one image).

    x_ref   : (Hp*Wp, C)     bf16  conv2 output, zero-padded spatially, flattened
    w3_ref  : (9, C, C)      bf16
    b3_ref  : (1, C)         f32
    w1_ref  : (L, 9, C, Ch)  bf16  residual 3x3 weights (no bias)
    w2_ref  : (L, Ch, C)     bf16  residual 1x1 weights (no bias)
    mask_ref: (Hp*Wp, 1)     f32   1.0 on interior pixels, 0.0 on the pad ring
    o_ref   : (span, C)      f32   wide band of the final activation
    r_pad   : (Hp*Wp, C)     f32   scratch: residual stream on the padded grid
    """
    c = o_ref.shape[-1]
    ch = w1_ref.shape[-1]

    # --- conv3: 9 shifted dots (input already zero-padded) + bias -----------
    acc = jnp.zeros((span, c), jnp.float32)
    for di in range(3):
        for dj in range(3):
            base = di * wp + dj
            acc = acc + jnp.dot(x_ref[base:base + span, :],
                                w3_ref[di * 3 + dj],
                                preferred_element_type=jnp.float32)
    acc = acc + b3_ref[...]

    # Scatter the wide band back onto the zero-padded grid; the mask re-zeros
    # the pad ring (where the band's garbage columns land) so subsequent 3x3
    # convs see correct zero padding.
    r_pad[...] = jnp.zeros_like(r_pad)
    r_pad[band_off:band_off + span, :] = acc
    r_pad[...] = r_pad[...] * mask_ref[...]

    # --- residual layers: x += conv1x1( relu( conv3x3( relu(x) ) ) ) --------
    for l in range(num_layers):
        h = jnp.zeros((span, ch), jnp.float32)
        for di in range(3):
            for dj in range(3):
                base = di * wp + dj
                a = jnp.maximum(r_pad[base:base + span, :], 0.0)   # pre-act ReLU
                h = h + jnp.dot(a.astype(jnp.bfloat16),
                                w1_ref[l, di * 3 + dj],
                                preferred_element_type=jnp.float32)
        h = jnp.maximum(h, 0.0).astype(jnp.bfloat16)
        y = jnp.dot(h, w2_ref[l], preferred_element_type=jnp.float32)
        r_pad[band_off:band_off + span, :] = (
            r_pad[band_off:band_off + span, :] + y)
        r_pad[...] = r_pad[...] * mask_ref[...]

    # Final ReLU of the residual stack; only the band is written to HBM.
    o_ref[...] = jnp.maximum(r_pad[band_off:band_off + span, :], 0.0)


# ----------------------------------------------------------------------------
# Wrapper-side layout helpers (all on raw activations — no amplification)
# ----------------------------------------------------------------------------
def _pad_hw(x, p):
    return jnp.pad(x, ((0, 0), (p, p), (p, p), (0, 0)))


def _space_to_depth2(x):
    n, h, w, c = x.shape
    x = x.reshape(n, h // 2, 2, w // 2, 2, c).transpose(0, 1, 3, 2, 4, 5)
    return x.reshape(n, h // 2, w // 2, 4 * c)


def _s2d_weight_4x4(w_hwio):
    # (4,4,Cin,Cout) stride-2 weights -> (2*2, 4*Cin, Cout) stride-1 weights,
    # tap k = i*2 + j; packed channel index = (dr*2 + dc)*Cin + c.
    cin, cout = w_hwio.shape[2], w_hwio.shape[3]
    w = w_hwio.reshape(2, 2, 2, 2, cin, cout).transpose(0, 2, 1, 3, 4, 5)
    return w.reshape(4, 4 * cin, cout)


def _unwiden(wide, oh, ow, iw):
    # (N, span, C) wide band with row g = y*iw + x  ->  (N, oh, ow, C)
    n, span, c = wide.shape
    wide = jnp.pad(wide, ((0, 0), (0, oh * iw - span), (0, 0)))
    return wide.reshape(n, oh, iw, c)[:, :, :ow, :]


# ----------------------------------------------------------------------------
# pallas_call wrappers
# ----------------------------------------------------------------------------
def conv4x4_s2_relu(x_nhwc, w_hwio, bias, relu_out=True):
    """4x4 / stride-2 / pad-1 conv (+bias, +optional ReLU) via space-to-depth."""
    n, h, w, cin = x_nhwc.shape
    assert h % 2 == 0 and w % 2 == 0, "stride-2 path assumes even H, W"
    cout = w_hwio.shape[-1]
    xs = _space_to_depth2(_pad_hw(x_nhwc.astype(jnp.bfloat16), 1))  # (n, ih, iw, 4cin)
    _, ih, iw, cin4 = xs.shape
    oh, ow = h // 2, w // 2
    span = (oh - 1) * iw + ow
    xf = xs.reshape(n, ih * iw, cin4)
    wk = _s2d_weight_4x4(w_hwio).astype(jnp.bfloat16)               # (4, 4cin, cout)
    b2 = bias.reshape(1, cout).astype(jnp.float32)

    cost = pl.CostEstimate(
        flops=2 * n * span * 4 * cin4 * cout,
        transcendentals=0,
        bytes_accessed=(n * ih * iw * cin4 * 2 + 4 * cin4 * cout * 2
                        + cout * 4 + n * span * cout * 2),
    )
    wide = pl.pallas_call(
        functools.partial(_shifted_conv_kernel, iw=iw, span=span, kh=2, kw=2,
                          relu_out=relu_out),
        grid=(n,),
        in_specs=[
            pl.BlockSpec((None, ih * iw, cin4), lambda b: (b, 0, 0)),
            pl.BlockSpec((4, cin4, cout), lambda b: (0, 0, 0)),     # VMEM-resident
            pl.BlockSpec((1, cout), lambda b: (0, 0)),
        ],
        out_specs=pl.BlockSpec((None, span, cout), lambda b: (b, 0, 0)),
        out_shape=jax.ShapeDtypeStruct((n, span, cout), jnp.bfloat16),
        compiler_params=pltpu.CompilerParams(
            dimension_semantics=("parallel",),
            vmem_limit_bytes=VMEM_LIMIT_BYTES),
        cost_estimate=cost,
    )(xf, wk, b2)
    return _unwiden(wide, oh, ow, iw)        # (n, oh, ow, cout) bf16


def conv3_residual_stack(x_nhwc, params):
    """conv3 (3x3 s1 p1 + bias) + full residual stack + final ReLU, one fused call."""
    n, h, w, c = x_nhwc.shape
    hp, wp = h + 2, w + 2
    p_rows = hp * wp
    span = (h - 1) * wp + w
    band_off = wp + 1

    xf = _pad_hw(x_nhwc.astype(jnp.bfloat16), 1).reshape(n, p_rows, c)
    w3 = params["conv3_w"].reshape(9, c, c).astype(jnp.bfloat16)
    b3 = params["conv3_b"].reshape(1, c).astype(jnp.float32)

    res = params["res"]
    if res:
        ch = res[0]["w1"].shape[-1]
        w1 = jnp.stack([lp["w1"].reshape(9, c, ch) for lp in res]).astype(jnp.bfloat16)
        w2 = jnp.stack([lp["w2"].reshape(ch, c) for lp in res]).astype(jnp.bfloat16)
        nl = len(res)
    else:
        # A zero-weight residual layer is the identity -> one code path for L=0.
        ch, nl = 1, 1
        w1 = jnp.zeros((1, 9, c, 1), jnp.bfloat16)
        w2 = jnp.zeros((1, 1, c), jnp.bfloat16)

    mask = jnp.zeros((hp, wp), jnp.float32).at[1:h + 1, 1:w + 1].set(1.0)
    mask = mask.reshape(p_rows, 1)

    cost = pl.CostEstimate(
        flops=2 * n * span * (9 * c * c + nl * (9 * c * ch + ch * c)),
        transcendentals=0,
        bytes_accessed=(n * p_rows * c * 2 + 9 * c * c * 2 + c * 4
                        + nl * (9 * c * ch + ch * c) * 2 + p_rows * 4
                        + n * span * c * 4),
    )
    wide = pl.pallas_call(
        functools.partial(_conv3_res_stack_kernel, wp=wp, span=span,
                          band_off=band_off, num_layers=nl),
        grid=(n,),
        in_specs=[
            pl.BlockSpec((None, p_rows, c), lambda b: (b, 0, 0)),
            pl.BlockSpec((9, c, c), lambda b: (0, 0, 0)),
            pl.BlockSpec((1, c), lambda b: (0, 0)),
            pl.BlockSpec(w1.shape, lambda b: (0, 0, 0, 0)),
            pl.BlockSpec(w2.shape, lambda b: (0, 0, 0)),
            pl.BlockSpec((p_rows, 1), lambda b: (0, 0)),
        ],
        out_specs=pl.BlockSpec((None, span, c), lambda b: (b, 0, 0)),
        out_shape=jax.ShapeDtypeStruct((n, span, c), jnp.float32),
        scratch_shapes=[pltpu.VMEM((p_rows, c), jnp.float32)],
        compiler_params=pltpu.CompilerParams(
            dimension_semantics=("parallel",),
            vmem_limit_bytes=VMEM_LIMIT_BYTES),
        cost_estimate=cost,
    )(xf, w3, b3, w1, w2, mask)
    return _unwiden(wide, h, w, wp)          # (n, h, w, c) f32


# ----------------------------------------------------------------------------
# Encoder parameters + forward
# ----------------------------------------------------------------------------
def init_encoder_params(key, in_channels, num_hiddens, num_residual_layers,
                        num_residual_hiddens):
    def w_init(k, shape):
        fan_in = shape[0] * shape[1] * shape[2]
        return jax.random.normal(k, shape, jnp.float32) / jnp.sqrt(fan_in)

    ks = jax.random.split(key, 6 + 2 * max(num_residual_layers, 1))
    params = {
        "conv1_w": w_init(ks[0], (4, 4, in_channels, num_hiddens // 2)),
        "conv1_b": jax.random.normal(ks[1], (num_hiddens // 2,), jnp.float32) * 0.01,
        "conv2_w": w_init(ks[2], (4, 4, num_hiddens // 2, num_hiddens)),
        "conv2_b": jax.random.normal(ks[3], (num_hiddens,), jnp.float32) * 0.01,
        "conv3_w": w_init(ks[4], (3, 3, num_hiddens, num_hiddens)),
        "conv3_b": jax.random.normal(ks[5], (num_hiddens,), jnp.float32) * 0.01,
        "res": [],
    }
    for i in range(num_residual_layers):
        params["res"].append({
            "w1": w_init(ks[6 + 2 * i], (3, 3, num_hiddens, num_residual_hiddens)),
            "w2": w_init(ks[7 + 2 * i], (1, 1, num_residual_hiddens, num_hiddens)),
        })
    return params


def encoder_forward(params, x_nchw):
    # NCHW (PyTorch) -> NHWC (kernel layout)
    x = jnp.transpose(x_nchw, (0, 2, 3, 1)).astype(jnp.float32)
    x = conv4x4_s2_relu(x, params["conv1_w"], params["conv1_b"])   # ReLU fused
    x = conv4x4_s2_relu(x, params["conv2_w"], params["conv2_b"])   # ReLU fused
    x = conv3_residual_stack(x, params)                            # conv3 + stack fused
    return jnp.transpose(x, (0, 3, 1, 2))                          # back to NCHW


# ----------------------------------------------------------------------------
# Pure-JAX f32 reference (correctness check)
# ----------------------------------------------------------------------------
def _ref_conv(x, w, b, stride, pad):
    out = jax.lax.conv_general_dilated(
        x, w, (stride, stride), [(pad, pad), (pad, pad)],
        dimension_numbers=("NHWC", "HWIO", "NHWC"))
    if b is not None:
        out = out + b
    return out


def encoder_reference(params, x_nchw):
    x = jnp.transpose(x_nchw, (0, 2, 3, 1)).astype(jnp.float32)
    x = jax.nn.relu(_ref_conv(x, params["conv1_w"], params["conv1_b"], 2, 1))
    x = jax.nn.relu(_ref_conv(x, params["conv2_w"], params["conv2_b"], 2, 1))
    x = _ref_conv(x, params["conv3_w"], params["conv3_b"], 1, 1)
    for lp in params["res"]:
        h = _ref_conv(jax.nn.relu(x), lp["w1"], None, 1, 1)
        h = _ref_conv(jax.nn.relu(h), lp["w2"], None, 1, 0)
        x = x + h
    x = jax.nn.relu(x)
    return jnp.transpose(x, (0, 3, 1, 2))


# ----------------------------------------------------------------------------
if __name__ == "__main__":
    in_channels = 4
    num_hiddens = 32
    num_residual_layers = 2
    num_residual_hiddens = 8
    N, H, W = 2, 16, 16

    key = jax.random.PRNGKey(0)
    k_x, k_p = jax.random.split(key)
    x = jax.random.normal(k_x, (N, in_channels, H, W), jnp.float32)   # NCHW input
    params = init_encoder_params(k_p, in_channels, num_hiddens,
                                 num_residual_layers, num_residual_hiddens)

    fwd = jax.jit(encoder_forward)
    out = jax.block_until_ready(fwd(params, x))
    assert out.shape == (N, num_hiddens, H // 4, W // 4), out.shape

    ref = jax.block_until_ready(jax.jit(encoder_reference)(params, x))
    max_err = float(jnp.max(jnp.abs(out - ref)))
    mean_err = float(jnp.mean(jnp.abs(out - ref)))
    # bf16 MXU operands vs. pure-f32 reference -> loosened but meaningful bound.
    assert max_err < 1e-1 and mean_err < 2e-2, (max_err, mean_err)

    print("KERNEL_OK")
</pallas_src>

<mosaic_0001>
module attributes {stable_mosaic.version = 11 : i64} {
  func.func @_shifted_conv_kernel(%arg0: i32, %arg1: memref<1x81x16xbf16, #tpu.memory_space<vmem>>, %arg2: memref<4x16x16xbf16, #tpu.memory_space<vmem>>, %arg3: memref<1x16xf32, #tpu.memory_space<vmem>>, %arg4: memref<1x71x16xbf16, #tpu.memory_space<vmem>>) attributes {dimension_semantics = [#tpu.dimension_semantics<parallel>], iteration_bounds = array<i64: 2>, scalar_prefetch = 0 : i64, scratch_operands = 0 : i64, tpu.core_type = #tpu.core_type<tc>, window_params = [{transform_indices = @transform_0, window_bounds = array<i64: 1, 81, 16>}, {pipeline_mode = #tpu.pipeline_mode<synchronous>, transform_indices = @transform_1, window_bounds = array<i64: 4, 16, 16>}, {pipeline_mode = #tpu.pipeline_mode<synchronous>, transform_indices = @transform_2, window_bounds = array<i64: 1, 16>}, {transform_indices = @transform_3, window_bounds = array<i64: 1, 71, 16>}]} {
    %cst = arith.constant 0.000000e+00 : f32
    %0 = vector.broadcast %cst : f32 to vector<71x16xf32>
    %c0 = arith.constant 0 : index
    %c0_0 = arith.constant 0 : index
    %c0_1 = arith.constant 0 : index
    %1 = vector.load %arg1[%c0, %c0_0, %c0_1] : memref<1x81x16xbf16, #tpu.memory_space<vmem>>, vector<1x71x16xbf16>
    %2 = vector.shape_cast %1 : vector<1x71x16xbf16> to vector<71x16xbf16>
    %c0_2 = arith.constant 0 : index
    %c0_3 = arith.constant 0 : index
    %c0_4 = arith.constant 0 : index
    %3 = vector.load %arg2[%c0_2, %c0_3, %c0_4] : memref<4x16x16xbf16, #tpu.memory_space<vmem>>, vector<1x16x16xbf16>
    %4 = vector.shape_cast %3 : vector<1x16x16xbf16> to vector<16x16xbf16>
    %cst_5 = arith.constant dense<0.000000e+00> : vector<71x16xf32>
    %5 = tpu.matmul %2, %4, %cst_5 {dimension_numbers = #tpu.dot_dimension_numbers<[1], [0], [0], [1], [0, 0, 1, 1], [], []>} : vector<71x16xbf16>, vector<16x16xbf16>, vector<71x16xf32> -> vector<71x16xf32>
    %6 = arith.addf %0, %5 : vector<71x16xf32>
    %c0_6 = arith.constant 0 : index
    %c1 = arith.constant 1 : index
    %c0_7 = arith.constant 0 : index
    %7 = vector.load %arg1[%c0_6, %c1, %c0_7] : memref<1x81x16xbf16, #tpu.memory_space<vmem>>, vector<1x71x16xbf16>
    %8 = vector.shape_cast %7 : vector<1x71x16xbf16> to vector<71x16xbf16>
    %c1_8 = arith.constant 1 : index
    %c0_9 = arith.constant 0 : index
    %c0_10 = arith.constant 0 : index
    %9 = vector.load %arg2[%c1_8, %c0_9, %c0_10] : memref<4x16x16xbf16, #tpu.memory_space<vmem>>, vector<1x16x16xbf16>
    %10 = vector.shape_cast %9 : vector<1x16x16xbf16> to vector<16x16xbf16>
    %cst_11 = arith.constant dense<0.000000e+00> : vector<71x16xf32>
    %11 = tpu.matmul %8, %10, %cst_11 {dimension_numbers = #tpu.dot_dimension_numbers<[1], [0], [0], [1], [0, 0, 1, 1], [], []>} : vector<71x16xbf16>, vector<16x16xbf16>, vector<71x16xf32> -> vector<71x16xf32>
    %12 = arith.addf %6, %11 : vector<71x16xf32>
    %c0_12 = arith.constant 0 : index
    %c9 = arith.constant 9 : index
    %c0_13 = arith.constant 0 : index
    %13 = vector.load %arg1[%c0_12, %c9, %c0_13] : memref<1x81x16xbf16, #tpu.memory_space<vmem>>, vector<1x71x16xbf16>
    %14 = vector.shape_cast %13 : vector<1x71x16xbf16> to vector<71x16xbf16>
    %c2 = arith.constant 2 : index
    %c0_14 = arith.constant 0 : index
    %c0_15 = arith.constant 0 : index
    %15 = vector.load %arg2[%c2, %c0_14, %c0_15] : memref<4x16x16xbf16, #tpu.memory_space<vmem>>, vector<1x16x16xbf16>
    %16 = vector.shape_cast %15 : vector<1x16x16xbf16> to vector<16x16xbf16>
    %cst_16 = arith.constant dense<0.000000e+00> : vector<71x16xf32>
    %17 = tpu.matmul %14, %16, %cst_16 {dimension_numbers = #tpu.dot_dimension_numbers<[1], [0], [0], [1], [0, 0, 1, 1], [], []>} : vector<71x16xbf16>, vector<16x16xbf16>, vector<71x16xf32> -> vector<71x16xf32>
    %18 = arith.addf %12, %17 : vector<71x16xf32>
    %c0_17 = arith.constant 0 : index
    %c10 = arith.constant 10 : index
    %c0_18 = arith.constant 0 : index
    %19 = vector.load %arg1[%c0_17, %c10, %c0_18] : memref<1x81x16xbf16, #tpu.memory_space<vmem>>, vector<1x71x16xbf16>
    %20 = vector.shape_cast %19 : vector<1x71x16xbf16> to vector<71x16xbf16>
    %c3 = arith.constant 3 : index
    %c0_19 = arith.constant 0 : index
    %c0_20 = arith.constant 0 : index
    %21 = vector.load %arg2[%c3, %c0_19, %c0_20] : memref<4x16x16xbf16, #tpu.memory_space<vmem>>, vector<1x16x16xbf16>
    %22 = vector.shape_cast %21 : vector<1x16x16xbf16> to vector<16x16xbf16>
    %cst_21 = arith.constant dense<0.000000e+00> : vector<71x16xf32>
    %23 = tpu.matmul %20, %22, %cst_21 {dimension_numbers = #tpu.dot_dimension_numbers<[1], [0], [0], [1], [0, 0, 1, 1], [], []>} : vector<71x16xbf16>, vector<16x16xbf16>, vector<71x16xf32> -> vector<71x16xf32>
    %24 = arith.addf %18, %23 : vector<71x16xf32>
    %c0_22 = arith.constant 0 : index
    %c0_23 = arith.constant 0 : index
    %25 = vector.load %arg3[%c0_22, %c0_23] : memref<1x16xf32, #tpu.memory_space<vmem>>, vector<1x16xf32>
    %26 = vector.broadcast %25 : vector<1x16xf32> to vector<71x16xf32>
    %27 = arith.addf %24, %26 : vector<71x16xf32>
    %cst_24 = arith.constant 0.000000e+00 : f32
    %28 = vector.broadcast %cst_24 : f32 to vector<71x16xf32>
    %29 = arith.maximumf %27, %28 : vector<71x16xf32>
    %30 = arith.truncf %29 : vector<71x16xf32> to vector<71x16xbf16>
    %c0_25 = arith.constant 0 : index
    %c0_26 = arith.constant 0 : index
    %c0_27 = arith.constant 0 : index
    %31 = vector.load %arg4[%c0_25, %c0_26, %c0_27] : memref<1x71x16xbf16, #tpu.memory_space<vmem>>, vector<1x71x16xbf16>
    %32 = vector.shape_cast %31 : vector<1x71x16xbf16> to vector<71x16xbf16>
    %33 = vector.shape_cast %30 : vector<71x16xbf16> to vector<1x71x16xbf16>
    tpu.vector_store %arg4[%c0_25, %c0_26, %c0_27], %33 {strides = array<i32>} : memref<1x71x16xbf16, #tpu.memory_space<vmem>>, vector<1x71x16xbf16>,
    return
  }
  func.func @transform_0(%arg0: i32) -> (i32, i32, i32) {
    %c0_i32 = arith.constant 0 : i32
    %c0_i32_0 = arith.constant 0 : i32
    %c0_i32_1 = arith.constant 0 : i32
    return %arg0, %c0_i32, %c0_i32_0 : i32, i32, i32
  }
  func.func @transform_1(%arg0: i32) -> (i32, i32, i32) {
    %c0_i32 = arith.constant 0 : i32
    %c0_i32_0 = arith.constant 0 : i32
    %c0_i32_1 = arith.constant 0 : i32
    %c0_i32_2 = arith.constant 0 : i32
    return %c0_i32, %c0_i32_0, %c0_i32_1 : i32, i32, i32
  }
  func.func @transform_2(%arg0: i32) -> (i32, i32) {
    %c0_i32 = arith.constant 0 : i32
    %c0_i32_0 = arith.constant 0 : i32
    %c0_i32_1 = arith.constant 0 : i32
    return %c0_i32, %c0_i32_0 : i32, i32
  }
  func.func @transform_3(%arg0: i32) -> (i32, i32, i32) {
    %c0_i32 = arith.constant 0 : i32
    %c0_i32_0 = arith.constant 0 : i32
    %c0_i32_1 = arith.constant 0 : i32
    return %arg0, %c0_i32, %c0_i32_0 : i32, i32, i32
  }
}

module attributes {stable_mosaic.version = 11 : i64} {
  func.func @_shifted_conv_kernel(%arg0: i32, %arg1: memref<1x25x64xbf16, #tpu.memory_space<vmem>>, %arg2: memref<4x64x32xbf16, #tpu.memory_space<vmem>>, %arg3: memref<1x32xf32, #tpu.memory_space<vmem>>, %arg4: memref<1x19x32xbf16, #tpu.memory_space<vmem>>) attributes {dimension_semantics = [#tpu.dimension_semantics<parallel>], iteration_bounds = array<i64: 2>, scalar_prefetch = 0 : i64, scratch_operands = 0 : i64, tpu.core_type = #tpu.core_type<tc>, window_params = [{transform_indices = @transform_0, window_bounds = array<i64: 1, 25, 64>}, {pipeline_mode = #tpu.pipeline_mode<synchronous>, transform_indices = @transform_1, window_bounds = array<i64: 4, 64, 32>}, {pipeline_mode = #tpu.pipeline_mode<synchronous>, transform_indices = @transform_2, window_bounds = array<i64: 1, 32>}, {transform_indices = @transform_3, window_bounds = array<i64: 1, 19, 32>}]} {
    %cst = arith.constant 0.000000e+00 : f32
    %0 = vector.broadcast %cst : f32 to vector<19x32xf32>
    %c0 = arith.constant 0 : index
    %c0_0 = arith.constant 0 : index
    %c0_1 = arith.constant 0 : index
    %1 = vector.load %arg1[%c0, %c0_0, %c0_1] : memref<1x25x64xbf16, #tpu.memory_space<vmem>>, vector<1x19x64xbf16>
    %2 = vector.shape_cast %1 : vector<1x19x64xbf16> to vector<19x64xbf16>
    %c0_2 = arith.constant 0 : index
    %c0_3 = arith.constant 0 : index
    %c0_4 = arith.constant 0 : index
    %3 = vector.load %arg2[%c0_2, %c0_3, %c0_4] : memref<4x64x32xbf16, #tpu.memory_space<vmem>>, vector<1x64x32xbf16>
    %4 = vector.shape_cast %3 : vector<1x64x32xbf16> to vector<64x32xbf16>
    %cst_5 = arith.constant dense<0.000000e+00> : vector<19x32xf32>
    %5 = tpu.matmul %2, %4, %cst_5 {dimension_numbers = #tpu.dot_dimension_numbers<[1], [0], [0], [1], [0, 0, 1, 1], [], []>} : vector<19x64xbf16>, vector<64x32xbf16>, vector<19x32xf32> -> vector<19x32xf32>
    %6 = arith.addf %0, %5 : vector<19x32xf32>
    %c0_6 = arith.constant 0 : index
    %c1 = arith.constant 1 : index
    %c0_7 = arith.constant 0 : index
    %7 = vector.load %arg1[%c0_6, %c1, %c0_7] : memref<1x25x64xbf16, #tpu.memory_space<vmem>>, vector<1x19x64xbf16>
    %8 = vector.shape_cast %7 : vector<1x19x64xbf16> to vector<19x64xbf16>
    %c1_8 = arith.constant 1 : index
    %c0_9 = arith.constant 0 : index
    %c0_10 = arith.constant 0 : index
    %9 = vector.load %arg2[%c1_8, %c0_9, %c0_10] : memref<4x64x32xbf16, #tpu.memory_space<vmem>>, vector<1x64x32xbf16>
    %10 = vector.shape_cast %9 : vector<1x64x32xbf16> to vector<64x32xbf16>
    %cst_11 = arith.constant dense<0.000000e+00> : vector<19x32xf32>
    %11 = tpu.matmul %8, %10, %cst_11 {dimension_numbers = #tpu.dot_dimension_numbers<[1], [0], [0], [1], [0, 0, 1, 1], [], []>} : vector<19x64xbf16>, vector<64x32xbf16>, vector<19x32xf32> -> vector<19x32xf32>
    %12 = arith.addf %6, %11 : vector<19x32xf32>
    %c0_12 = arith.constant 0 : index
    %c5 = arith.constant 5 : index
    %c0_13 = arith.constant 0 : index
    %13 = vector.load %arg1[%c0_12, %c5, %c0_13] : memref<1x25x64xbf16, #tpu.memory_space<vmem>>, vector<1x19x64xbf16>
    %14 = vector.shape_cast %13 : vector<1x19x64xbf16> to vector<19x64xbf16>
    %c2 = arith.constant 2 : index
    %c0_14 = arith.constant 0 : index
    %c0_15 = arith.constant 0 : index
    %15 = vector.load %arg2[%c2, %c0_14, %c0_15] : memref<4x64x32xbf16, #tpu.memory_space<vmem>>, vector<1x64x32xbf16>
    %16 = vector.shape_cast %15 : vector<1x64x32xbf16> to vector<64x32xbf16>
    %cst_16 = arith.constant dense<0.000000e+00> : vector<19x32xf32>
    %17 = tpu.matmul %14, %16, %cst_16 {dimension_numbers = #tpu.dot_dimension_numbers<[1], [0], [0], [1], [0, 0, 1, 1], [], []>} : vector<19x64xbf16>, vector<64x32xbf16>, vector<19x32xf32> -> vector<19x32xf32>
    %18 = arith.addf %12, %17 : vector<19x32xf32>
    %c0_17 = arith.constant 0 : index
    %c6 = arith.constant 6 : index
    %c0_18 = arith.constant 0 : index
    %19 = vector.load %arg1[%c0_17, %c6, %c0_18] : memref<1x25x64xbf16, #tpu.memory_space<vmem>>, vector<1x19x64xbf16>
    %20 = vector.shape_cast %19 : vector<1x19x64xbf16> to vector<19x64xbf16>
    %c3 = arith.constant 3 : index
    %c0_19 = arith.constant 0 : index
    %c0_20 = arith.constant 0 : index
    %21 = vector.load %arg2[%c3, %c0_19, %c0_20] : memref<4x64x32xbf16, #tpu.memory_space<vmem>>, vector<1x64x32xbf16>
    %22 = vector.shape_cast %21 : vector<1x64x32xbf16> to vector<64x32xbf16>
    %cst_21 = arith.constant dense<0.000000e+00> : vector<19x32xf32>
    %23 = tpu.matmul %20, %22, %cst_21 {dimension_numbers = #tpu.dot_dimension_numbers<[1], [0], [0], [1], [0, 0, 1, 1], [], []>} : vector<19x64xbf16>, vector<64x32xbf16>, vector<19x32xf32> -> vector<19x32xf32>
    %24 = arith.addf %18, %23 : vector<19x32xf32>
    %c0_22 = arith.constant 0 : index
    %c0_23 = arith.constant 0 : index
    %25 = vector.load %arg3[%c0_22, %c0_23] : memref<1x32xf32, #tpu.memory_space<vmem>>, vector<1x32xf32>
    %26 = vector.broadcast %25 : vector<1x32xf32> to vector<19x32xf32>
    %27 = arith.addf %24, %26 : vector<19x32xf32>
    %cst_24 = arith.constant 0.000000e+00 : f32
    %28 = vector.broadcast %cst_24 : f32 to vector<19x32xf32>
    %29 = arith.maximumf %27, %28 : vector<19x32xf32>
    %30 = arith.truncf %29 : vector<19x32xf32> to vector<19x32xbf16>
    %c0_25 = arith.constant 0 : index
    %c0_26 = arith.constant 0 : index
    %c0_27 = arith.constant 0 : index
    %31 = vector.load %arg4[%c0_25, %c0_26, %c0_27] : memref<1x19x32xbf16, #tpu.memory_space<vmem>>, vector<1x19x32xbf16>
    %32 = vector.shape_cast %31 : vector<1x19x32xbf16> to vector<19x32xbf16>
    %33 = vector.shape_cast %30 : vector<19x32xbf16> to vector<1x19x32xbf16>
    tpu.vector_store %arg4[%c0_25, %c0_26, %c0_27], %33 {strides = array<i32>} : memref<1x19x32xbf16, #tpu.memory_space<vmem>>, vector<1x19x32xbf16>,
    return
  }
  func.func @transform_0(%arg0: i32) -> (i32, i32, i32) {
    %c0_i32 = arith.constant 0 : i32
    %c0_i32_0 = arith.constant 0 : i32
    %c0_i32_1 = arith.constant 0 : i32
    return %arg0, %c0_i32, %c0_i32_0 : i32, i32, i32
  }
  func.func @transform_1(%arg0: i32) -> (i32, i32, i32) {
    %c0_i32 = arith.constant 0 : i32
    %c0_i32_0 = arith.constant 0 : i32
    %c0_i32_1 = arith.constant 0 : i32
    %c0_i32_2 = arith.constant 0 : i32
    return %c0_i32, %c0_i32_0, %c0_i32_1 : i32, i32, i32
  }
  func.func @transform_2(%arg0: i32) -> (i32, i32) {
    %c0_i32 = arith.constant 0 : i32
    %c0_i32_0 = arith.constant 0 : i32
    %c0_i32_1 = arith.constant 0 : i32
    return %c0_i32, %c0_i32_0 : i32, i32
  }
  func.func @transform_3(%arg0: i32) -> (i32, i32, i32) {
    %c0_i32 = arith.constant 0 : i32
    %c0_i32_0 = arith.constant 0 : i32
    %c0_i32_1 = arith.constant 0 : i32
    return %arg0, %c0_i32, %c0_i32_0 : i32, i32, i32
  }
}

module attributes {stable_mosaic.version = 11 : i64} {
  func.func @_conv3_res_stack_kernel(%arg0: i32, %arg1: memref<1x36x32xbf16, #tpu.memory_space<vmem>>, %arg2: memref<9x32x32xbf16, #tpu.memory_space<vmem>>, %arg3: memref<1x32xf32, #tpu.memory_space<vmem>>, %arg4: memref<2x9x32x8xbf16, #tpu.memory_space<vmem>>, %arg5: memref<2x8x32xbf16, #tpu.memory_space<vmem>>, %arg6: memref<36x1xf32, #tpu.memory_space<vmem>>, %arg7: memref<1x22x32xf32, #tpu.memory_space<vmem>>, %arg8: memref<36x32xf32, #tpu.memory_space<vmem>>) attributes {dimension_semantics = [#tpu.dimension_semantics<parallel>], iteration_bounds = array<i64: 2>, scalar_prefetch = 0 : i64, scratch_operands = 1 : i64, tpu.core_type = #tpu.core_type<tc>, window_params = [{transform_indices = @transform_0, window_bounds = array<i64: 1, 36, 32>}, {pipeline_mode = #tpu.pipeline_mode<synchronous>, transform_indices = @transform_1, window_bounds = array<i64: 9, 32, 32>}, {pipeline_mode = #tpu.pipeline_mode<synchronous>, transform_indices = @transform_2, window_bounds = array<i64: 1, 32>}, {pipeline_mode = #tpu.pipeline_mode<synchronous>, transform_indices = @transform_3, window_bounds = array<i64: 2, 9, 32, 8>}, {pipeline_mode = #tpu.pipeline_mode<synchronous>, transform_indices = @transform_4, window_bounds = array<i64: 2, 8, 32>}, {pipeline_mode = #tpu.pipeline_mode<synchronous>, transform_indices = @transform_5, window_bounds = array<i64: 36, 1>}, {transform_indices = @transform_6, window_bounds = array<i64: 1, 22, 32>}]} {
    %cst = arith.constant 0.000000e+00 : f32
    %0 = vector.broadcast %cst : f32 to vector<22x32xf32>
    %c0 = arith.constant 0 : index
    %c0_0 = arith.constant 0 : index
    %c0_1 = arith.constant 0 : index
    %1 = vector.load %arg1[%c0, %c0_0, %c0_1] : memref<1x36x32xbf16, #tpu.memory_space<vmem>>, vector<1x22x32xbf16>
    %2 = vector.shape_cast %1 : vector<1x22x32xbf16> to vector<22x32xbf16>
    %c0_2 = arith.constant 0 : index
    %c0_3 = arith.constant 0 : index
    %c0_4 = arith.constant 0 : index
    %3 = vector.load %arg2[%c0_2, %c0_3, %c0_4] : memref<9x32x32xbf16, #tpu.memory_space<vmem>>, vector<1x32x32xbf16>
    %4 = vector.shape_cast %3 : vector<1x32x32xbf16> to vector<32x32xbf16>
    %cst_5 = arith.constant dense<0.000000e+00> : vector<22x32xf32>
    %5 = tpu.matmul %2, %4, %cst_5 {dimension_numbers = #tpu.dot_dimension_numbers<[1], [0], [0], [1], [0, 0, 1, 1], [], []>} : vector<22x32xbf16>, vector<32x32xbf16>, vector<22x32xf32> -> vector<22x32xf32>
    %6 = arith.addf %0, %5 : vector<22x32xf32>
    %c0_6 = arith.constant 0 : index
    %c1 = arith.constant 1 : index
    %c0_7 = arith.constant 0 : index
    %7 = vector.load %arg1[%c0_6, %c1, %c0_7] : memref<1x36x32xbf16, #tpu.memory_space<vmem>>, vector<1x22x32xbf16>
    %8 = vector.shape_cast %7 : vector<1x22x32xbf16> to vector<22x32xbf16>
    %c1_8 = arith.constant 1 : index
    %c0_9 = arith.constant 0 : index
    %c0_10 = arith.constant 0 : index
    %9 = vector.load %arg2[%c1_8, %c0_9, %c0_10] : memref<9x32x32xbf16, #tpu.memory_space<vmem>>, vector<1x32x32xbf16>
    %10 = vector.shape_cast %9 : vector<1x32x32xbf16> to vector<32x32xbf16>
    %cst_11 = arith.constant dense<0.000000e+00> : vector<22x32xf32>
    %11 = tpu.matmul %8, %10, %cst_11 {dimension_numbers = #tpu.dot_dimension_numbers<[1], [0], [0], [1], [0, 0, 1, 1], [], []>} : vector<22x32xbf16>, vector<32x32xbf16>, vector<22x32xf32> -> vector<22x32xf32>
    %12 = arith.addf %6, %11 : vector<22x32xf32>
    %c0_12 = arith.constant 0 : index
    %c2 = arith.constant 2 : index
    %c0_13 = arith.constant 0 : index
    %13 = vector.load %arg1[%c0_12, %c2, %c0_13] : memref<1x36x32xbf16, #tpu.memory_space<vmem>>, vector<1x22x32xbf16>
    %14 = vector.shape_cast %13 : vector<1x22x32xbf16> to vector<22x32xbf16>
    %c2_14 = arith.constant 2 : index
    %c0_15 = arith.constant 0 : index
    %c0_16 = arith.constant 0 : index
    %15 = vector.load %arg2[%c2_14, %c0_15, %c0_16] : memref<9x32x32xbf16, #tpu.memory_space<vmem>>, vector<1x32x32xbf16>
    %16 = vector.shape_cast %15 : vector<1x32x32xbf16> to vector<32x32xbf16>
    %cst_17 = arith.constant dense<0.000000e+00> : vector<22x32xf32>
    %17 = tpu.matmul %14, %16, %cst_17 {dimension_numbers = #tpu.dot_dimension_numbers<[1], [0], [0], [1], [0, 0, 1, 1], [], []>} : vector<22x32xbf16>, vector<32x32xbf16>, vector<22x32xf32> -> vector<22x32xf32>
    %18 = arith.addf %12, %17 : vector<22x32xf32>
    %c0_18 = arith.constant 0 : index
    %c6 = arith.constant 6 : index
    %c0_19 = arith.constant 0 : index
    %19 = vector.load %arg1[%c0_18, %c6, %c0_19] : memref<1x36x32xbf16, #tpu.memory_space<vmem>>, vector<1x22x32xbf16>
    %20 = vector.shape_cast %19 : vector<1x22x32xbf16> to vector<22x32xbf16>
    %c3 = arith.constant 3 : index
    %c0_20 = arith.constant 0 : index
    %c0_21 = arith.constant 0 : index
    %21 = vector.load %arg2[%c3, %c0_20, %c0_21] : memref<9x32x32xbf16, #tpu.memory_space<vmem>>, vector<1x32x32xbf16>
    %22 = vector.shape_cast %21 : vector<1x32x32xbf16> to vector<32x32xbf16>
    %cst_22 = arith.constant dense<0.000000e+00> : vector<22x32xf32>
    %23 = tpu.matmul %20, %22, %cst_22 {dimension_numbers = #tpu.dot_dimension_numbers<[1], [0], [0], [1], [0, 0, 1, 1], [], []>} : vector<22x32xbf16>, vector<32x32xbf16>, vector<22x32xf32> -> vector<22x32xf32>
    %24 = arith.addf %18, %23 : vector<22x32xf32>
    %c0_23 = arith.constant 0 : index
    %c7 = arith.constant 7 : index
    %c0_24 = arith.constant 0 : index
    %25 = vector.load %arg1[%c0_23, %c7, %c0_24] : memref<1x36x32xbf16, #tpu.memory_space<vmem>>, vector<1x22x32xbf16>
    %26 = vector.shape_cast %25 : vector<1x22x32xbf16> to vector<22x32xbf16>
    %c4 = arith.constant 4 : index
    %c0_25 = arith.constant 0 : index
    %c0_26 = arith.constant 0 : index
    %27 = vector.load %arg2[%c4, %c0_25, %c0_26] : memref<9x32x32xbf16, #tpu.memory_space<vmem>>, vector<1x32x32xbf16>
    %28 = vector.shape_cast %27 : vector<1x32x32xbf16> to vector<32x32xbf16>
    %cst_27 = arith.constant dense<0.000000e+00> : vector<22x32xf32>
    %29 = tpu.matmul %26, %28, %cst_27 {dimension_numbers = #tpu.dot_dimension_numbers<[1], [0], [0], [1], [0, 0, 1, 1], [], []>} : vector<22x32xbf16>, vector<32x32xbf16>, vector<22x32xf32> -> vector<22x32xf32>
    %30 = arith.addf %24, %29 : vector<22x32xf32>
    %c0_28 = arith.constant 0 : index
    %c8 = arith.constant 8 : index
    %c0_29 = arith.constant 0 : index
    %31 = vector.load %arg1[%c0_28, %c8, %c0_29] : memref<1x36x32xbf16, #tpu.memory_space<vmem>>, vector<1x22x32xbf16>
    %32 = vector.shape_cast %31 : vector<1x22x32xbf16> to vector<22x32xbf16>
    %c5 = arith.constant 5 : index
    %c0_30 = arith.constant 0 : index
    %c0_31 = arith.constant 0 : index
    %33 = vector.load %arg2[%c5, %c0_30, %c0_31] : memref<9x32x32xbf16, #tpu.memory_space<vmem>>, vector<1x32x32xbf16>
    %34 = vector.shape_cast %33 : vector<1x32x32xbf16> to vector<32x32xbf16>
    %cst_32 = arith.constant dense<0.000000e+00> : vector<22x32xf32>
    %35 = tpu.matmul %32, %34, %cst_32 {dimension_numbers = #tpu.dot_dimension_numbers<[1], [0], [0], [1], [0, 0, 1, 1], [], []>} : vector<22x32xbf16>, vector<32x32xbf16>, vector<22x32xf32> -> vector<22x32xf32>
    %36 = arith.addf %30, %35 : vector<22x32xf32>
    %c0_33 = arith.constant 0 : index
    %c12 = arith.constant 12 : index
    %c0_34 = arith.constant 0 : index
    %37 = vector.load %arg1[%c0_33, %c12, %c0_34] : memref<1x36x32xbf16, #tpu.memory_space<vmem>>, vector<1x22x32xbf16>
    %38 = vector.shape_cast %37 : vector<1x22x32xbf16> to vector<22x32xbf16>
    %c6_35 = arith.constant 6 : index
    %c0_36 = arith.constant 0 : index
    %c0_37 = arith.constant 0 : index
    %39 = vector.load %arg2[%c6_35, %c0_36, %c0_37] : memref<9x32x32xbf16, #tpu.memory_space<vmem>>, vector<1x32x32xbf16>
    %40 = vector.shape_cast %39 : vector<1x32x32xbf16> to vector<32x32xbf16>
    %cst_38 = arith.constant dense<0.000000e+00> : vector<22x32xf32>
    %41 = tpu.matmul %38, %40, %cst_38 {dimension_numbers = #tpu.dot_dimension_numbers<[1], [0], [0], [1], [0, 0, 1, 1], [], []>} : vector<22x32xbf16>, vector<32x32xbf16>, vector<22x32xf32> -> vector<22x32xf32>
    %42 = arith.addf %36, %41 : vector<22x32xf32>
    %c0_39 = arith.constant 0 : index
    %c13 = arith.constant 13 : index
    %c0_40 = arith.constant 0 : index
    %43 = vector.load %arg1[%c0_39, %c13, %c0_40] : memref<1x36x32xbf16, #tpu.memory_space<vmem>>, vector<1x22x32xbf16>
    %44 = vector.shape_cast %43 : vector<1x22x32xbf16> to vector<22x32xbf16>
    %c7_41 = arith.constant 7 : index
    %c0_42 = arith.constant 0 : index
    %c0_43 = arith.constant 0 : index
    %45 = vector.load %arg2[%c7_41, %c0_42, %c0_43] : memref<9x32x32xbf16, #tpu.memory_space<vmem>>, vector<1x32x32xbf16>
    %46 = vector.shape_cast %45 : vector<1x32x32xbf16> to vector<32x32xbf16>
    %cst_44 = arith.constant dense<0.000000e+00> : vector<22x32xf32>
    %47 = tpu.matmul %44, %46, %cst_44 {dimension_numbers = #tpu.dot_dimension_numbers<[1], [0], [0], [1], [0, 0, 1, 1], [], []>} : vector<22x32xbf16>, vector<32x32xbf16>, vector<22x32xf32> -> vector<22x32xf32>
    %48 = arith.addf %42, %47 : vector<22x32xf32>
    %c0_45 = arith.constant 0 : index
    %c14 = arith.constant 14 : index
    %c0_46 = arith.constant 0 : index
    %49 = vector.load %arg1[%c0_45, %c14, %c0_46] : memref<1x36x32xbf16, #tpu.memory_space<vmem>>, vector<1x22x32xbf16>
    %50 = vector.shape_cast %49 : vector<1x22x32xbf16> to vector<22x32xbf16>
    %c8_47 = arith.constant 8 : index
    %c0_48 = arith.constant 0 : index
    %c0_49 = arith.constant 0 : index
    %51 = vector.load %arg2[%c8_47, %c0_48, %c0_49] : memref<9x32x32xbf16, #tpu.memory_space<vmem>>, vector<1x32x32xbf16>
    %52 = vector.shape_cast %51 : vector<1x32x32xbf16> to vector<32x32xbf16>
    %cst_50 = arith.constant dense<0.000000e+00> : vector<22x32xf32>
    %53 = tpu.matmul %50, %52, %cst_50 {dimension_numbers = #tpu.dot_dimension_numbers<[1], [0], [0], [1], [0, 0, 1, 1], [], []>} : vector<22x32xbf16>, vector<32x32xbf16>, vector<22x32xf32> -> vector<22x32xf32>
    %54 = arith.addf %48, %53 : vector<22x32xf32>
    %c0_51 = arith.constant 0 : index
    %c0_52 = arith.constant 0 : index
    %55 = vector.load %arg3[%c0_51, %c0_52] : memref<1x32xf32, #tpu.memory_space<vmem>>, vector<1x32xf32>
    %56 = vector.broadcast %55 : vector<1x32xf32> to vector<22x32xf32>
    %57 = arith.addf %54, %56 : vector<22x32xf32>
    %cst_53 = arith.constant 0.000000e+00 : f32
    %58 = vector.broadcast %cst_53 : f32 to vector<36x32xf32>
    %c0_54 = arith.constant 0 : index
    %c0_55 = arith.constant 0 : index
    %59 = vector.load %arg8[%c0_54, %c0_55] : memref<36x32xf32, #tpu.memory_space<vmem>>, vector<36x32xf32>
    tpu.vector_store %arg8[%c0_54, %c0_55], %58 {strides = array<i32>} : memref<36x32xf32, #tpu.memory_space<vmem>>, vector<36x32xf32>,
    %c7_56 = arith.constant 7 : index
    %c0_57 = arith.constant 0 : index
    %60 = vector.load %arg8[%c7_56, %c0_57] : memref<36x32xf32, #tpu.memory_space<vmem>>, vector<22x32xf32>
    tpu.vector_store %arg8[%c7_56, %c0_57], %57 {strides = array<i32>} : memref<36x32xf32, #tpu.memory_space<vmem>>, vector<22x32xf32>,
    %c0_58 = arith.constant 0 : index
    %c0_59 = arith.constant 0 : index
    %61 = vector.load %arg8[%c0_58, %c0_59] : memref<36x32xf32, #tpu.memory_space<vmem>>, vector<36x32xf32>
    %c0_60 = arith.constant 0 : index
    %c0_61 = arith.constant 0 : index
    %62 = vector.load %arg6[%c0_60, %c0_61] : memref<36x1xf32, #tpu.memory_space<vmem>>, vector<36x1xf32>
    %63 = vector.broadcast %62 : vector<36x1xf32> to vector<36x32xf32>
    %64 = arith.mulf %61, %63 : vector<36x32xf32>
    %c0_62 = arith.constant 0 : index
    %c0_63 = arith.constant 0 : index
    %65 = vector.load %arg8[%c0_62, %c0_63] : memref<36x32xf32, #tpu.memory_space<vmem>>, vector<36x32xf32>
    tpu.vector_store %arg8[%c0_62, %c0_63], %64 {strides = array<i32>} : memref<36x32xf32, #tpu.memory_space<vmem>>, vector<36x32xf32>,
    %cst_64 = arith.constant 0.000000e+00 : f32
    %66 = vector.broadcast %cst_64 : f32 to vector<22x8xf32>
    %c0_65 = arith.constant 0 : index
    %c0_66 = arith.constant 0 : index
    %67 = vector.load %arg8[%c0_65, %c0_66] : memref<36x32xf32, #tpu.memory_space<vmem>>, vector<22x32xf32>
    %cst_67 = arith.constant 0.000000e+00 : f32
    %68 = vector.broadcast %cst_67 : f32 to vector<22x32xf32>
    %69 = arith.maximumf %67, %68 : vector<22x32xf32>
    %70 = arith.truncf %69 : vector<22x32xf32> to vector<22x32xbf16>
    %c0_68 = arith.constant 0 : index
    %c0_69 = arith.constant 0 : index
    %c0_70 = arith.constant 0 : index
    %c0_71 = arith.constant 0 : index
    %71 = vector.load %arg4[%c0_68, %c0_69, %c0_70, %c0_71] : memref<2x9x32x8xbf16, #tpu.memory_space<vmem>>, vector<1x1x32x8xbf16>
    %72 = vector.shape_cast %71 : vector<1x1x32x8xbf16> to vector<32x8xbf16>
    %cst_72 = arith.constant dense<0.000000e+00> : vector<22x8xf32>
    %73 = tpu.matmul %70, %72, %cst_72 {dimension_numbers = #tpu.dot_dimension_numbers<[1], [0], [0], [1], [0, 0, 1, 1], [], []>} : vector<22x32xbf16>, vector<32x8xbf16>, vector<22x8xf32> -> vector<22x8xf32>
    %74 = arith.addf %66, %73 : vector<22x8xf32>
    %c1_73 = arith.constant 1 : index
    %c0_74 = arith.constant 0 : index
    %75 = vector.load %arg8[%c1_73, %c0_74] : memref<36x32xf32, #tpu.memory_space<vmem>>, vector<22x32xf32>
    %cst_75 = arith.constant 0.000000e+00 : f32
    %76 = vector.broadcast %cst_75 : f32 to vector<22x32xf32>
    %77 = arith.maximumf %75, %76 : vector<22x32xf32>
    %78 = arith.truncf %77 : vector<22x32xf32> to vector<22x32xbf16>
    %c0_76 = arith.constant 0 : index
    %c1_77 = arith.constant 1 : index
    %c0_78 = arith.constant 0 : index
    %c0_79 = arith.constant 0 : index
    %79 = vector.load %arg4[%c0_76, %c1_77, %c0_78, %c0_79] : memref<2x9x32x8xbf16, #tpu.memory_space<vmem>>, vector<1x1x32x8xbf16>
    %80 = vector.shape_cast %79 : vector<1x1x32x8xbf16> to vector<32x8xbf16>
    %cst_80 = arith.constant dense<0.000000e+00> : vector<22x8xf32>
    %81 = tpu.matmul %78, %80, %cst_80 {dimension_numbers = #tpu.dot_dimension_numbers<[1], [0], [0], [1], [0, 0, 1, 1], [], []>} : vector<22x32xbf16>, vector<32x8xbf16>, vector<22x8xf32> -> vector<22x8xf32>
    %82 = arith.addf %74, %81 : vector<22x8xf32>
    %c2_81 = arith.constant 2 : index
    %c0_82 = arith.constant 0 : index
    %83 = vector.load %arg8[%c2_81, %c0_82] : memref<36x32xf32, #tpu.memory_space<vmem>>, vector<22x32xf32>
    %cst_83 = arith.constant 0.000000e+00 : f32
    %84 = vector.broadcast %cst_83 : f32 to vector<22x32xf32>
    %85 = arith.maximumf %83, %84 : vector<22x32xf32>
    %86 = arith.truncf %85 : vector<22x32xf32> to vector<22x32xbf16>
    %c0_84 = arith.constant 0 : index
    %c2_85 = arith.constant 2 : index
    %c0_86 = arith.constant 0 : index
    %c0_87 = arith.constant 0 : index
    %87 = vector.load %arg4[%c0_84, %c2_85, %c0_86, %c0_87] : memref<2x9x32x8xbf16, #tpu.memory_space<vmem>>, vector<1x1x32x8xbf16>
    %88 = vector.shape_cast %87 : vector<1x1x32x8xbf16> to vector<32x8xbf16>
    %cst_88 = arith.constant dense<0.000000e+00> : vector<22x8xf32>
    %89 = tpu.matmul %86, %88, %cst_88 {dimension_numbers = #tpu.dot_dimension_numbers<[1], [0], [0], [1], [0, 0, 1, 1], [], []>} : vector<22x32xbf16>, vector<32x8xbf16>, vector<22x8xf32> -> vector<22x8xf32>
    %90 = arith.addf %82, %89 : vector<22x8xf32>
    %c6_89 = arith.constant 6 : index
    %c0_90 = arith.constant 0 : index
    %91 = vector.load %arg8[%c6_89, %c0_90] : memref<36x32xf32, #tpu.memory_space<vmem>>, vector<22x32xf32>
    %cst_91 = arith.constant 0.000000e+00 : f32
    %92 = vector.broadcast %cst_91 : f32 to vector<22x32xf32>
    %93 = arith.maximumf %91, %92 : vector<22x32xf32>
    %94 = arith.truncf %93 : vector<22x32xf32> to vector<22x32xbf16>
    %c0_92 = arith.constant 0 : index
    %c3_93 = arith.constant 3 : index
    %c0_94 = arith.constant 0 : index
    %c0_95 = arith.constant 0 : index
    %95 = vector.load %arg4[%c0_92, %c3_93, %c0_94, %c0_95] : memref<2x9x32x8xbf16, #tpu.memory_space<vmem>>, vector<1x1x32x8xbf16>
    %96 = vector.shape_cast %95 : vector<1x1x32x8xbf16> to vector<32x8xbf16>
    %cst_96 = arith.constant dense<0.000000e+00> : vector<22x8xf32>
    %97 = tpu.matmul %94, %96, %cst_96 {dimension_numbers = #tpu.dot_dimension_numbers<[1], [0], [0], [1], [0, 0, 1, 1], [], []>} : vector<22x32xbf16>, vector<32x8xbf16>, vector<22x8xf32> -> vector<22x8xf32>
    %98 = arith.addf %90, %97 : vector<22x8xf32>
    %c7_97 = arith.constant 7 : index
    %c0_98 = arith.constant 0 : index
    %99 = vector.load %arg8[%c7_97, %c0_98] : memref<36x32xf32, #tpu.memory_space<vmem>>, vector<22x32xf32>
    %cst_99 = arith.constant 0.000000e+00 : f32
    %100 = vector.broadcast %cst_99 : f32 to vector<22x32xf32>
    %101 = arith.maximumf %99, %100 : vector<22x32xf32>
    %102 = arith.truncf %101 : vector<22x32xf32> to vector<22x32xbf16>
    %c0_100 = arith.constant 0 : index
    %c4_101 = arith.constant 4 : index
    %c0_102 = arith.constant 0 : index
    %c0_103 = arith.constant 0 : index
    %103 = vector.load %arg4[%c0_100, %c4_101, %c0_102, %c0_103] : memref<2x9x32x8xbf16, #tpu.memory_space<vmem>>, vector<1x1x32x8xbf16>
    %104 = vector.shape_cast %103 : vector<1x1x32x8xbf16> to vector<32x8xbf16>
    %cst_104 = arith.constant dense<0.000000e+00> : vector<22x8xf32>
    %105 = tpu.matmul %102, %104, %cst_104 {dimension_numbers = #tpu.dot_dimension_numbers<[1], [0], [0], [1], [0, 0, 1, 1], [], []>} : vector<22x32xbf16>, vector<32x8xbf16>, vector<22x8xf32> -> vector<22x8xf32>
    %106 = arith.addf %98, %105 : vector<22x8xf32>
    %c8_105 = arith.constant 8 : index
    %c0_106 = arith.constant 0 : index
    %107 = vector.load %arg8[%c8_105, %c0_106] : memref<36x32xf32, #tpu.memory_space<vmem>>, vector<22x32xf32>
    %cst_107 = arith.constant 0.000000e+00 : f32
    %108 = vector.broadcast %cst_107 : f32 to vector<22x32xf32>
    %109 = arith.maximumf %107, %108 : vector<22x32xf32>
    %110 = arith.truncf %109 : vector<22x32xf32> to vector<22x32xbf16>
    %c0_108 = arith.constant 0 : index
    %c5_109 = arith.constant 5 : index
    %c0_110 = arith.constant 0 : index
    %c0_111 = arith.constant 0 : index
    %111 = vector.load %arg4[%c0_108, %c5_109, %c0_110, %c0_111] : memref<2x9x32x8xbf16, #tpu.memory_space<vmem>>, vector<1x1x32x8xbf16>
    %112 = vector.shape_cast %111 : vector<1x1x32x8xbf16> to vector<32x8xbf16>
    %cst_112 = arith.constant dense<0.000000e+00> : vector<22x8xf32>
    %113 = tpu.matmul %110, %112, %cst_112 {dimension_numbers = #tpu.dot_dimension_numbers<[1], [0], [0], [1], [0, 0, 1, 1], [], []>} : vector<22x32xbf16>, vector<32x8xbf16>, vector<22x8xf32> -> vector<22x8xf32>
    %114 = arith.addf %106, %113 : vector<22x8xf32>
    %c12_113 = arith.constant 12 : index
    %c0_114 = arith.constant 0 : index
    %115 = vector.load %arg8[%c12_113, %c0_114] : memref<36x32xf32, #tpu.memory_space<vmem>>, vector<22x32xf32>
    %cst_115 = arith.constant 0.000000e+00 : f32
    %116 = vector.broadcast %cst_115 : f32 to vector<22x32xf32>
    %117 = arith.maximumf %115, %116 : vector<22x32xf32>
    %118 = arith.truncf %117 : vector<22x32xf32> to vector<22x32xbf16>
    %c0_116 = arith.constant 0 : index
    %c6_117 = arith.constant 6 : index
    %c0_118 = arith.constant 0 : index
    %c0_119 = arith.constant 0 : index
    %119 = vector.load %arg4[%c0_116, %c6_117, %c0_118, %c0_119] : memref<2x9x32x8xbf16, #tpu.memory_space<vmem>>, vector<1x1x32x8xbf16>
    %120 = vector.shape_cast %119 : vector<1x1x32x8xbf16> to vector<32x8xbf16>
    %cst_120 = arith.constant dense<0.000000e+00> : vector<22x8xf32>
    %121 = tpu.matmul %118, %120, %cst_120 {dimension_numbers = #tpu.dot_dimension_numbers<[1], [0], [0], [1], [0, 0, 1, 1], [], []>} : vector<22x32xbf16>, vector<32x8xbf16>, vector<22x8xf32> -> vector<22x8xf32>
    %122 = arith.addf %114, %121 : vector<22x8xf32>
    %c13_121 = arith.constant 13 : index
    %c0_122 = arith.constant 0 : index
    %123 = vector.load %arg8[%c13_121, %c0_122] : memref<36x32xf32, #tpu.memory_space<vmem>>, vector<22x32xf32>
    %cst_123 = arith.constant 0.000000e+00 : f32
    %124 = vector.broadcast %cst_123 : f32 to vector<22x32xf32>
    %125 = arith.maximumf %123, %124 : vector<22x32xf32>
    %126 = arith.truncf %125 : vector<22x32xf32> to vector<22x32xbf16>
    %c0_124 = arith.constant 0 : index
    %c7_125 = arith.constant 7 : index
    %c0_126 = arith.constant 0 : index
    %c0_127 = arith.constant 0 : index
    %127 = vector.load %arg4[%c0_124, %c7_125, %c0_126, %c0_127] : memref<2x9x32x8xbf16, #tpu.memory_space<vmem>>, vector<1x1x32x8xbf16>
    %128 = vector.shape_cast %127 : vector<1x1x32x8xbf16> to vector<32x8xbf16>
    %cst_128 = arith.constant dense<0.000000e+00> : vector<22x8xf32>
    %129 = tpu.matmul %126, %128, %cst_128 {dimension_numbers = #tpu.dot_dimension_numbers<[1], [0], [0], [1], [0, 0, 1, 1], [], []>} : vector<22x32xbf16>, vector<32x8xbf16>, vector<22x8xf32> -> vector<22x8xf32>
    %130 = arith.addf %122, %129 : vector<22x8xf32>
    %c14_129 = arith.constant 14 : index
    %c0_130 = arith.constant 0 : index
    %131 = vector.load %arg8[%c14_129, %c0_130] : memref<36x32xf32, #tpu.memory_space<vmem>>, vector<22x32xf32>
    %cst_131 = arith.constant 0.000000e+00 : f32
    %132 = vector.broadcast %cst_131 : f32 to vector<22x32xf32>
    %133 = arith.maximumf %131, %132 : vector<22x32xf32>
    %134 = arith.truncf %133 : vector<22x32xf32> to vector<22x32xbf16>
    %c0_132 = arith.constant 0 : index
    %c8_133 = arith.constant 8 : index
    %c0_134 = arith.constant 0 : index
    %c0_135 = arith.constant 0 : index
    %135 = vector.load %arg4[%c0_132, %c8_133, %c0_134, %c0_135] : memref<2x9x32x8xbf16, #tpu.memory_space<vmem>>, vector<1x1x32x8xbf16>
    %136 = vector.shape_cast %135 : vector<1x1x32x8xbf16> to vector<32x8xbf16>
    %cst_136 = arith.constant dense<0.000000e+00> : vector<22x8xf32>
    %137 = tpu.matmul %134, %136, %cst_136 {dimension_numbers = #tpu.dot_dimension_numbers<[1], [0], [0], [1], [0, 0, 1, 1], [], []>} : vector<22x32xbf16>, vector<32x8xbf16>, vector<22x8xf32> -> vector<22x8xf32>
    %138 = arith.addf %130, %137 : vector<22x8xf32>
    %cst_137 = arith.constant 0.000000e+00 : f32
    %139 = vector.broadcast %cst_137 : f32 to vector<22x8xf32>
    %140 = arith.maximumf %138, %139 : vector<22x8xf32>
    %141 = arith.truncf %140 : vector<22x8xf32> to vector<22x8xbf16>
    %c0_138 = arith.constant 0 : index
    %c0_139 = arith.constant 0 : index
    %c0_140 = arith.constant 0 : index
    %142 = vector.load %arg5[%c0_138, %c0_139, %c0_140] : memref<2x8x32xbf16, #tpu.memory_space<vmem>>, vector<1x8x32xbf16>
    %143 = vector.shape_cast %142 : vector<1x8x32xbf16> to vector<8x32xbf16>
    %cst_141 = arith.constant dense<0.000000e+00> : vector<22x32xf32>
    %144 = tpu.matmul %141, %143, %cst_141 {dimension_numbers = #tpu.dot_dimension_numbers<[1], [0], [0], [1], [0, 0, 1, 1], [], []>} : vector<22x8xbf16>, vector<8x32xbf16>, vector<22x32xf32> -> vector<22x32xf32>
    %c7_142 = arith.constant 7 : index
    %c0_143 = arith.constant 0 : index
    %145 = vector.load %arg8[%c7_142, %c0_143] : memref<36x32xf32, #tpu.memory_space<vmem>>, vector<22x32xf32>
    %146 = arith.addf %145, %144 : vector<22x32xf32>
    %c7_144 = arith.constant 7 : index
    %c0_145 = arith.constant 0 : index
    %147 = vector.load %arg8[%c7_144, %c0_145] : memref<36x32xf32, #tpu.memory_space<vmem>>, vector<22x32xf32>
    tpu.vector_store %arg8[%c7_144, %c0_145], %146 {strides = array<i32>} : memref<36x32xf32, #tpu.memory_space<vmem>>, vector<22x32xf32>,
    %c0_146 = arith.constant 0 : index
    %c0_147 = arith.constant 0 : index
    %148 = vector.load %arg8[%c0_146, %c0_147] : memref<36x32xf32, #tpu.memory_space<vmem>>, vector<36x32xf32>
    %c0_148 = arith.constant 0 : index
    %c0_149 = arith.constant 0 : index
    %149 = vector.load %arg6[%c0_148, %c0_149] : memref<36x1xf32, #tpu.memory_space<vmem>>, vector<36x1xf32>
    %150 = vector.broadcast %149 : vector<36x1xf32> to vector<36x32xf32>
    %151 = arith.mulf %148, %150 : vector<36x32xf32>
    %c0_150 = arith.constant 0 : index
    %c0_151 = arith.constant 0 : index
    %152 = vector.load %arg8[%c0_150, %c0_151] : memref<36x32xf32, #tpu.memory_space<vmem>>, vector<36x32xf32>
    tpu.vector_store %arg8[%c0_150, %c0_151], %151 {strides = array<i32>} : memref<36x32xf32, #tpu.memory_space<vmem>>, vector<36x32xf32>,
    %cst_152 = arith.constant 0.000000e+00 : f32
    %153 = vector.broadcast %cst_152 : f32 to vector<22x8xf32>
    %c0_153 = arith.constant 0 : index
    %c0_154 = arith.constant 0 : index
    %154 = vector.load %arg8[%c0_153, %c0_154] : memref<36x32xf32, #tpu.memory_space<vmem>>, vector<22x32xf32>
    %cst_155 = arith.constant 0.000000e+00 : f32
    %155 = vector.broadcast %cst_155 : f32 to vector<22x32xf32>
    %156 = arith.maximumf %154, %155 : vector<22x32xf32>
    %157 = arith.truncf %156 : vector<22x32xf32> to vector<22x32xbf16>
    %c1_156 = arith.constant 1 : index
    %c0_157 = arith.constant 0 : index
    %c0_158 = arith.constant 0 : index
    %c0_159 = arith.constant 0 : index
    %158 = vector.load %arg4[%c1_156, %c0_157, %c0_158, %c0_159] : memref<2x9x32x8xbf16, #tpu.memory_space<vmem>>, vector<1x1x32x8xbf16>
    %159 = vector.shape_cast %158 : vector<1x1x32x8xbf16> to vector<32x8xbf16>
    %cst_160 = arith.constant dense<0.000000e+00> : vector<22x8xf32>
    %160 = tpu.matmul %157, %159, %cst_160 {dimension_numbers = #tpu.dot_dimension_numbers<[1], [0], [0], [1], [0, 0, 1, 1], [], []>} : vector<22x32xbf16>, vector<32x8xbf16>, vector<22x8xf32> -> vector<22x8xf32>
    %161 = arith.addf %153, %160 : vector<22x8xf32>
    %c1_161 = arith.constant 1 : index
    %c0_162 = arith.constant 0 : index
    %162 = vector.load %arg8[%c1_161, %c0_162] : memref<36x32xf32, #tpu.memory_space<vmem>>, vector<22x32xf32>
    %cst_163 = arith.constant 0.000000e+00 : f32
    %163 = vector.broadcast %cst_163 : f32 to vector<22x32xf32>
    %164 = arith.maximumf %162, %163 : vector<22x32xf32>
    %165 = arith.truncf %164 : vector<22x32xf32> to vector<22x32xbf16>
    %c1_164 = arith.constant 1 : index
    %c1_165 = arith.constant 1 : index
    %c0_166 = arith.constant 0 : index
    %c0_167 = arith.constant 0 : index
    %166 = vector.load %arg4[%c1_164, %c1_165, %c0_166, %c0_167] : memref<2x9x32x8xbf16, #tpu.memory_space<vmem>>, vector<1x1x32x8xbf16>
    %167 = vector.shape_cast %166 : vector<1x1x32x8xbf16> to vector<32x8xbf16>
    %cst_168 = arith.constant dense<0.000000e+00> : vector<22x8xf32>
    %168 = tpu.matmul %165, %167, %cst_168 {dimension_numbers = #tpu.dot_dimension_numbers<[1], [0], [0], [1], [0, 0, 1, 1], [], []>} : vector<22x32xbf16>, vector<32x8xbf16>, vector<22x8xf32> -> vector<22x8xf32>
    %169 = arith.addf %161, %168 : vector<22x8xf32>
    %c2_169 = arith.constant 2 : index
    %c0_170 = arith.constant 0 : index
    %170 = vector.load %arg8[%c2_169, %c0_170] : memref<36x32xf32, #tpu.memory_space<vmem>>, vector<22x32xf32>
    %cst_171 = arith.constant 0.000000e+00 : f32
    %171 = vector.broadcast %cst_171 : f32 to vector<22x32xf32>
    %172 = arith.maximumf %170, %171 : vector<22x32xf32>
    %173 = arith.truncf %172 : vector<22x32xf32> to vector<22x32xbf16>
    %c1_172 = arith.constant 1 : index
    %c2_173 = arith.constant 2 : index
    %c0_174 = arith.constant 0 : index
    %c0_175 = arith.constant 0 : index
    %174 = vector.load %arg4[%c1_172, %c2_173, %c0_174, %c0_175] : memref<2x9x32x8xbf16, #tpu.memory_space<vmem>>, vector<1x1x32x8xbf16>
    %175 = vector.shape_cast %174 : vector<1x1x32x8xbf16> to vector<32x8xbf16>
    %cst_176 = arith.constant dense<0.000000e+00> : vector<22x8xf32>
    %176 = tpu.matmul %173, %175, %cst_176 {dimension_numbers = #tpu.dot_dimension_numbers<[1], [0], [0], [1], [0, 0, 1, 1], [], []>} : vector<22x32xbf16>, vector<32x8xbf16>, vector<22x8xf32> -> vector<22x8xf32>
    %177 = arith.addf %169, %176 : vector<22x8xf32>
    %c6_177 = arith.constant 6 : index
    %c0_178 = arith.constant 0 : index
    %178 = vector.load %arg8[%c6_177, %c0_178] : memref<36x32xf32, #tpu.memory_space<vmem>>, vector<22x32xf32>
    %cst_179 = arith.constant 0.000000e+00 : f32
    %179 = vector.broadcast %cst_179 : f32 to vector<22x32xf32>
    %180 = arith.maximumf %178, %179 : vector<22x32xf32>
    %181 = arith.truncf %180 : vector<22x32xf32> to vector<22x32xbf16>
    %c1_180 = arith.constant 1 : index
    %c3_181 = arith.constant 3 : index
    %c0_182 = arith.constant 0 : index
    %c0_183 = arith.constant 0 : index
    %182 = vector.load %arg4[%c1_180, %c3_181, %c0_182, %c0_183] : memref<2x9x32x8xbf16, #tpu.memory_space<vmem>>, vector<1x1x32x8xbf16>
    %183 = vector.shape_cast %182 : vector<1x1x32x8xbf16> to vector<32x8xbf16>
    %cst_184 = arith.constant dense<0.000000e+00> : vector<22x8xf32>
    %184 = tpu.matmul %181, %183, %cst_184 {dimension_numbers = #tpu.dot_dimension_numbers<[1], [0], [0], [1], [0, 0, 1, 1], [], []>} : vector<22x32xbf16>, vector<32x8xbf16>, vector<22x8xf32> -> vector<22x8xf32>
    %185 = arith.addf %177, %184 : vector<22x8xf32>
    %c7_185 = arith.constant 7 : index
    %c0_186 = arith.constant 0 : index
    %186 = vector.load %arg8[%c7_185, %c0_186] : memref<36x32xf32, #tpu.memory_space<vmem>>, vector<22x32xf32>
    %cst_187 = arith.constant 0.000000e+00 : f32
    %187 = vector.broadcast %cst_187 : f32 to vector<22x32xf32>
    %188 = arith.maximumf %186, %187 : vector<22x32xf32>
    %189 = arith.truncf %188 : vector<22x32xf32> to vector<22x32xbf16>
    %c1_188 = arith.constant 1 : index
    %c4_189 = arith.constant 4 : index
    %c0_190 = arith.constant 0 : index
    %c0_191 = arith.constant 0 : index
    %190 = vector.load %arg4[%c1_188, %c4_189, %c0_190, %c0_191] : memref<2x9x32x8xbf16, #tpu.memory_space<vmem>>, vector<1x1x32x8xbf16>
    %191 = vector.shape_cast %190 : vector<1x1x32x8xbf16> to vector<32x8xbf16>
    %cst_192 = arith.constant dense<0.000000e+00> : vector<22x8xf32>
    %192 = tpu.matmul %189, %191, %cst_192 {dimension_numbers = #tpu.dot_dimension_numbers<[1], [0], [0], [1], [0, 0, 1, 1], [], []>} : vector<22x32xbf16>, vector<32x8xbf16>, vector<22x8xf32> -> vector<22x8xf32>
    %193 = arith.addf %185, %192 : vector<22x8xf32>
    %c8_193 = arith.constant 8 : index
    %c0_194 = arith.constant 0 : index
    %194 = vector.load %arg8[%c8_193, %c0_194] : memref<36x32xf32, #tpu.memory_space<vmem>>, vector<22x32xf32>
    %cst_195 = arith.constant 0.000000e+00 : f32
    %195 = vector.broadcast %cst_195 : f32 to vector<22x32xf32>
    %196 = arith.maximumf %194, %195 : vector<22x32xf32>
    %197 = arith.truncf %196 : vector<22x32xf32> to vector<22x32xbf16>
    %c1_196 = arith.constant 1 : index
    %c5_197 = arith.constant 5 : index
    %c0_198 = arith.constant 0 : index
    %c0_199 = arith.constant 0 : index
    %198 = vector.load %arg4[%c1_196, %c5_197, %c0_198, %c0_199] : memref<2x9x32x8xbf16, #tpu.memory_space<vmem>>, vector<1x1x32x8xbf16>
    %199 = vector.shape_cast %198 : vector<1x1x32x8xbf16> to vector<32x8xbf16>
    %cst_200 = arith.constant dense<0.000000e+00> : vector<22x8xf32>
    %200 = tpu.matmul %197, %199, %cst_200 {dimension_numbers = #tpu.dot_dimension_numbers<[1], [0], [0], [1], [0, 0, 1, 1], [], []>} : vector<22x32xbf16>, vector<32x8xbf16>, vector<22x8xf32> -> vector<22x8xf32>
    %201 = arith.addf %193, %200 : vector<22x8xf32>
    %c12_201 = arith.constant 12 : index
    %c0_202 = arith.constant 0 : index
    %202 = vector.load %arg8[%c12_201, %c0_202] : memref<36x32xf32, #tpu.memory_space<vmem>>, vector<22x32xf32>
    %cst_203 = arith.constant 0.000000e+00 : f32
    %203 = vector.broadcast %cst_203 : f32 to vector<22x32xf32>
    %204 = arith.maximumf %202, %203 : vector<22x32xf32>
    %205 = arith.truncf %204 : vector<22x32xf32> to vector<22x32xbf16>
    %c1_204 = arith.constant 1 : index
    %c6_205 = arith.constant 6 : index
    %c0_206 = arith.constant 0 : index
    %c0_207 = arith.constant 0 : index
    %206 = vector.load %arg4[%c1_204, %c6_205, %c0_206, %c0_207] : memref<2x9x32x8xbf16, #tpu.memory_space<vmem>>, vector<1x1x32x8xbf16>
    %207 = vector.shape_cast %206 : vector<1x1x32x8xbf16> to vector<32x8xbf16>
    %cst_208 = arith.constant dense<0.000000e+00> : vector<22x8xf32>
    %208 = tpu.matmul %205, %207, %cst_208 {dimension_numbers = #tpu.dot_dimension_numbers<[1], [0], [0], [1], [0, 0, 1, 1], [], []>} : vector<22x32xbf16>, vector<32x8xbf16>, vector<22x8xf32> -> vector<22x8xf32>
    %209 = arith.addf %201, %208 : vector<22x8xf32>
    %c13_209 = arith.constant 13 : index
    %c0_210 = arith.constant 0 : index
    %210 = vector.load %arg8[%c13_209, %c0_210] : memref<36x32xf32, #tpu.memory_space<vmem>>, vector<22x32xf32>
    %cst_211 = arith.constant 0.000000e+00 : f32
    %211 = vector.broadcast %cst_211 : f32 to vector<22x32xf32>
    %212 = arith.maximumf %210, %211 : vector<22x32xf32>
    %213 = arith.truncf %212 : vector<22x32xf32> to vector<22x32xbf16>
    %c1_212 = arith.constant 1 : index
    %c7_213 = arith.constant 7 : index
    %c0_214 = arith.constant 0 : index
    %c0_215 = arith.constant 0 : index
    %214 = vector.load %arg4[%c1_212, %c7_213, %c0_214, %c0_215] : memref<2x9x32x8xbf16, #tpu.memory_space<vmem>>, vector<1x1x32x8xbf16>
    %215 = vector.shape_cast %214 : vector<1x1x32x8xbf16> to vector<32x8xbf16>
    %cst_216 = arith.constant dense<0.000000e+00> : vector<22x8xf32>
    %216 = tpu.matmul %213, %215, %cst_216 {dimension_numbers = #tpu.dot_dimension_numbers<[1], [0], [0], [1], [0, 0, 1, 1], [], []>} : vector<22x32xbf16>, vector<32x8xbf16>, vector<22x8xf32> -> vector<22x8xf32>
    %217 = arith.addf %209, %216 : vector<22x8xf32>
    %c14_217 = arith.constant 14 : index
    %c0_218 = arith.constant 0 : index
    %218 = vector.load %arg8[%c14_217, %c0_218] : memref<36x32xf32, #tpu.memory_space<vmem>>, vector<22x32xf32>
    %cst_219 = arith.constant 0.000000e+00 : f32
    %219 = vector.broadcast %cst_219 : f32 to vector<22x32xf32>
    %220 = arith.maximumf %218, %219 : vector<22x32xf32>
    %221 = arith.truncf %220 : vector<22x32xf32> to vector<22x32xbf16>
    %c1_220 = arith.constant 1 : index
    %c8_221 = arith.constant 8 : index
    %c0_222 = arith.constant 0 : index
    %c0_223 = arith.constant 0 : index
    %222 = vector.load %arg4[%c1_220, %c8_221, %c0_222, %c0_223] : memref<2x9x32x8xbf16, #tpu.memory_space<vmem>>, vector<1x1x32x8xbf16>
    %223 = vector.shape_cast %222 : vector<1x1x32x8xbf16> to vector<32x8xbf16>
    %cst_224 = arith.constant dense<0.000000e+00> : vector<22x8xf32>
    %224 = tpu.matmul %221, %223, %cst_224 {dimension_numbers = #tpu.dot_dimension_numbers<[1], [0], [0], [1], [0, 0, 1, 1], [], []>} : vector<22x32xbf16>, vector<32x8xbf16>, vector<22x8xf32> -> vector<22x8xf32>
    %225 = arith.addf %217, %224 : vector<22x8xf32>
    %cst_225 = arith.constant 0.000000e+00 : f32
    %226 = vector.broadcast %cst_225 : f32 to vector<22x8xf32>
    %227 = arith.maximumf %225, %226 : vector<22x8xf32>
    %228 = arith.truncf %227 : vector<22x8xf32> to vector<22x8xbf16>
    %c1_226 = arith.constant 1 : index
    %c0_227 = arith.constant 0 : index
    %c0_228 = arith.constant 0 : index
    %229 = vector.load %arg5[%c1_226, %c0_227, %c0_228] : memref<2x8x32xbf16, #tpu.memory_space<vmem>>, vector<1x8x32xbf16>
    %230 = vector.shape_cast %229 : vector<1x8x32xbf16> to vector<8x32xbf16>
    %cst_229 = arith.constant dense<0.000000e+00> : vector<22x32xf32>
    %231 = tpu.matmul %228, %230, %cst_229 {dimension_numbers = #tpu.dot_dimension_numbers<[1], [0], [0], [1], [0, 0, 1, 1], [], []>} : vector<22x8xbf16>, vector<8x32xbf16>, vector<22x32xf32> -> vector<22x32xf32>
    %c7_230 = arith.constant 7 : index
    %c0_231 = arith.constant 0 : index
    %232 = vector.load %arg8[%c7_230, %c0_231] : memref<36x32xf32, #tpu.memory_space<vmem>>, vector<22x32xf32>
    %233 = arith.addf %232, %231 : vector<22x32xf32>
    %c7_232 = arith.constant 7 : index
    %c0_233 = arith.constant 0 : index
    %234 = vector.load %arg8[%c7_232, %c0_233] : memref<36x32xf32, #tpu.memory_space<vmem>>, vector<22x32xf32>
    tpu.vector_store %arg8[%c7_232, %c0_233], %233 {strides = array<i32>} : memref<36x32xf32, #tpu.memory_space<vmem>>, vector<22x32xf32>,
    %c0_234 = arith.constant 0 : index
    %c0_235 = arith.constant 0 : index
    %235 = vector.load %arg8[%c0_234, %c0_235] : memref<36x32xf32, #tpu.memory_space<vmem>>, vector<36x32xf32>
    %c0_236 = arith.constant 0 : index
    %c0_237 = arith.constant 0 : index
    %236 = vector.load %arg6[%c0_236, %c0_237] : memref<36x1xf32, #tpu.memory_space<vmem>>, vector<36x1xf32>
    %237 = vector.broadcast %236 : vector<36x1xf32> to vector<36x32xf32>
    %238 = arith.mulf %235, %237 : vector<36x32xf32>
    %c0_238 = arith.constant 0 : index
    %c0_239 = arith.constant 0 : index
    %239 = vector.load %arg8[%c0_238, %c0_239] : memref<36x32xf32, #tpu.memory_space<vmem>>, vector<36x32xf32>
    tpu.vector_store %arg8[%c0_238, %c0_239], %238 {strides = array<i32>} : memref<36x32xf32, #tpu.memory_space<vmem>>, vector<36x32xf32>,
    %c7_240 = arith.constant 7 : index
    %c0_241 = arith.constant 0 : index
    %240 = vector.load %arg8[%c7_240, %c0_241] : memref<36x32xf32, #tpu.memory_space<vmem>>, vector<22x32xf32>
    %cst_242 = arith.constant 0.000000e+00 : f32
    %241 = vector.broadcast %cst_242 : f32 to vector<22x32xf32>
    %242 = arith.maximumf %240, %241 : vector<22x32xf32>
    %c0_243 = arith.constant 0 : index
    %c0_244 = arith.constant 0 : index
    %c0_245 = arith.constant 0 : index
    %243 = vector.load %arg7[%c0_243, %c0_244, %c0_245] : memref<1x22x32xf32, #tpu.memory_space<vmem>>, vector<1x22x32xf32>
    %244 = vector.shape_cast %243 : vector<1x22x32xf32> to vector<22x32xf32>
    %245 = vector.shape_cast %242 : vector<22x32xf32> to vector<1x22x32xf32>
    tpu.vector_store %arg7[%c0_243, %c0_244, %c0_245], %245 {strides = array<i32>} : memref<1x22x32xf32, #tpu.memory_space<vmem>>, vector<1x22x32xf32>,
    return
  }
  func.func @transform_0(%arg0: i32) -> (i32, i32, i32) {
    %c0_i32 = arith.constant 0 : i32
    %c0_i32_0 = arith.constant 0 : i32
    %c0_i32_1 = arith.constant 0 : i32
    return %arg0, %c0_i32, %c0_i32_0 : i32, i32, i32
  }
  func.func @transform_1(%arg0: i32) -> (i32, i32, i32) {
    %c0_i32 = arith.constant 0 : i32
    %c0_i32_0 = arith.constant 0 : i32
    %c0_i32_1 = arith.constant 0 : i32
    %c0_i32_2 = arith.constant 0 : i32
    return %c0_i32, %c0_i32_0, %c0_i32_1 : i32, i32, i32
  }
  func.func @transform_2(%arg0: i32) -> (i32, i32) {
    %c0_i32 = arith.constant 0 : i32
    %c0_i32_0 = arith.constant 0 : i32
    %c0_i32_1 = arith.constant 0 : i32
    return %c0_i32, %c0_i32_0 : i32, i32
  }
  func.func @transform_3(%arg0: i32) -> (i32, i32, i32, i32) {
    %c0_i32 = arith.constant 0 : i32
    %c0_i32_0 = arith.constant 0 : i32
    %c0_i32_1 = arith.constant 0 : i32
    %c0_i32_2 = arith.constant 0 : i32
    %c0_i32_3 = arith.constant 0 : i32
    return %c0_i32, %c0_i32_0, %c0_i32_1, %c0_i32_2 : i32, i32, i32, i32
  }
  func.func @transform_4(%arg0: i32) -> (i32, i32, i32) {
    %c0_i32 = arith.constant 0 : i32
    %c0_i32_0 = arith.constant 0 : i32
    %c0_i32_1 = arith.constant 0 : i32
    %c0_i32_2 = arith.constant 0 : i32
    return %c0_i32, %c0_i32_0, %c0_i32_1 : i32, i32, i32
  }
  func.func @transform_5(%arg0: i32) -> (i32, i32) {
    %c0_i32 = arith.constant 0 : i32
    %c0_i32_0 = arith.constant 0 : i32
    %c0_i32_1 = arith.constant 0 : i32
    return %c0_i32, %c0_i32_0 : i32, i32
  }
  func.func @transform_6(%arg0: i32) -> (i32, i32, i32) {
    %c0_i32 = arith.constant 0 : i32
    %c0_i32_0 = arith.constant 0 : i32
    %c0_i32_1 = arith.constant 0 : i32
    return %arg0, %c0_i32, %c0_i32_0 : i32, i32, i32
  }
}

</mosaic_0001>

<bundles_post_ra>
// kernel: encoder_forward.3
= control target key start
LH: loop header
LB: loop body
LE: loop exit
PB: predicated region body
PF: predicated region fallthrough
CT: control target
= control target key end

     0   :  { %s1135_s12 = smov 0   ;;  %s1338_s0 = inlined_call_operand.vmem [shape: bf16[2,81,16], index: 0, kind: input, shape index: {}]   ;;  %s1339_s1 = inlined_call_operand.vmem [shape: bf16[4,16,16], index: 1, kind: input, shape index: {}]   ;;  %s1340_s2 = inlined_call_operand.vmem [shape: f32[1,16], index: 2, kind: input, shape index: {}]   ;;  %s1341_s3 = inlined_call_operand.vmem [shape: bf16[2,71,16], index: 3, kind: output, shape index: {}]  }
   0x1 LB: > { %s889_s13 = sadd.s32 4294967295, %s1111_s12   ;;  %p893_p0 = scmp.ge.s32.totalorder %s1111_s12, 1  ;;  %s1111_s12 = sphi %s1135_s12, %s13_s12  }
   0x2   : > { %p137_p1 = scmp.lt.s32.totalorder %s1111_s12, 3 }
   0x4   : > { %p138_p2 = pnand %p893_p0, %p137_p1 }
   0x5   : > { %p161_p3 = scmp.lt.s32.totalorder (!%p138_p2), %s889_s13, 1 }
   0x6   : > { %141 = sbr.rel (%p138_p2) target bundleno = 300 (0x12c), region = 32 }
   0xb   : > { %v1086_v0 = vld [vmem:[%s1339_s1] sm:$0xff]   ;;  %v1113_v1 = vmov 0.0   ;;  %v1087_v2 = vld [vmem:[%s1339_s1 + $0x8] sm:$0xff]   ;;  %vm1114_vm0 = vmmov 0   ;;  %s1343_s13 = smov (!%p161_p3, %s889_s13), 1  ;;  %vm255_vm1 = vcmask 130048  }
   0xc   : > { %1008 = vmatprep.subr.bf16.mxu1 %v1113_v1  ;;  %986 = vmatprep.subr.bf16.mxu0 %v1113_v1  ;;  %s1074_s18 = smul.u32 44, %s1343_s13  ;;  %v1091_v3 = vld [vmem:[%s1339_s1 + $0x18] sm:$0xff]   ;;  %vm209_vm2 = vsmask.f32 7424  ;;  %v1090_v12 = vld [vmem:[%s1339_s1 + $0x10] sm:$0xff]   ;;  %vm645_vm3 = vcmask 1046528  }
   0xd   : > { %1009 = vmatpush3.bf16.msra.mxu1 %v1086_v0  ;;  %1010 = vmatprep.mubr.msk.bf16.mxu1 %vm1114_vm0, %v1113_v1  ;;  %s1075_s28 = smul.u32 36, %s1343_s13  ;;  %vm819_vm4 = vcmask 125952   ;;  %vm829_vm5 = vsmask.f32 3328 }
   0xe   : > { %987 = vmatpush3.bf16.msra.mxu0 %v1087_v2  ;;  %988 = vmatprep.mubr.msk.bf16.mxu0 %vm1114_vm0, %v1113_v1  ;;  %s1163_s21 = scalar_lea.vmem %s1338_s0, %s1074_s18  ;;  %vm830_vm6 = vmand %vm819_vm4, %vm829_vm5 }
   0xf   : > { %1030 = vmatprep.subr.bf16.mxu0 %v1113_v1  ;;  %1052 = vmatprep.subr.bf16.mxu1 %v1113_v1  ;;  %v1088_v4 = vld [vmem:[%s1163_s21] sm:$0xff]   ;;  %v1089_v5 = vld [vmem:[%s1163_s21 + $0x8] sm:$0xff]   ;;  %v1092_v9 = vld [vmem:[%s1163_s21 + $0x10] sm:$0xff]   ;;  %s1297_s4 = scalar_lea.vmem %s1341_s3, %s1075_s28 }
  0x10   : > { %1011 = vmatmul.mubr.msk.bf16.vlgmr.msra.gmra.mxu1 %vm255_vm1, %v1088_v4  ;;  %v211_v6 = vshrl.u32 %v1088_v4, 16  ;;  %v213_v7 = vshll.u32 %v1088_v4, 16  ;;  %v218_v8 = vshll.u32 %v1089_v5, 16  ;;  %v222_v14 = vshrl.u32 %v1089_v5, 16  ;;  %v1093_v19 = vld [vmem:[%s1163_s21 + $0x18] sm:$0xff]   ;;  %v1097_v41 = vld [vmem:[%s1163_s21 + $0x4] sm:$0xff]  }
  0x11   : > { %1053 = vmatpush3.bf16.msra.mxu1 %v1091_v3  ;;  %1014 = vmatprep.mubr.msk.bf16.mxu1 %vm1114_vm0, %v1113_v1  ;;  %v226_v15 = vshll.u32 %v1092_v9, 16  ;;  %v230_v20 = vshrl.u32 %v1092_v9, 16  ;;  %v234_v22 = vshll.u32 %v1093_v19, 16  ;;  %v1102_v23 = vld [vmem:[%s1163_s21 + $0x1c] sm:$0xff]   ;;  %v1189_v26 = vld [vmem:[%s1163_s21 + $0x24] ss:$0 sps:$4 sm:$0xff]  }
  0x12   : > { %v215_v10 = vrot.slane %v213_v7, 1  ;;  %v220_v11 = vrot.slane %v218_v8, 1  ;;  %v490_v24 = vshll.u32 %v1102_v23, 16  ;;  %v494_v25 = vshrl.u32 %v1102_v23, 16  ;;  %v1094_v29 = vld [vmem:[%s1163_s21 + $0x20] ss:$0 sps:$4 sm:$0xff]  }
  0x13   : > { %v228_v18 = vrot.slane %v226_v15, 1  ;;  %v236_v28 = vrot.slane %v234_v22, 1  ;;  %v498_v31 = vshll.u32 %v1189_v26, 16  ;;  %v238_v35 = vshrl.u32 %v1093_v19, 16  ;;  %v1095_v42 = vld [vmem:[%s1163_s21 + $0x4] sm:$0xfe]  }
  0x14   : > { %v216_v13 = vor.u32 %v215_v10, %v211_v6  ;;  %v224_v17 = vor.u32 %v222_v14, %v220_v11  ;;  %v1195_v30 = vrot.slane %v490_v24, 1  ;;  %v242_v36 = vshll.u32 %v1094_v29, 16  ;;  %v1096_v43 = vld [vmem:[%s1163_s21 + $0xc] sm:$0xff]   ;;  %v1099_v54 = vld [vmem:[%s1163_s21 + $0x14] sm:$0xff]   ;;  %v1101_v63 = vld [vmem:[%s1163_s21 + $0x1c] sm:$0xff]  }
  0x15   : > { %v232_v27 = vor.u32 %v230_v20, %v228_v18  ;;  %v1201_v33 = vrot.slane %v498_v31, 1  ;;  %v240_v38 = vor.u32 %v238_v35, %v236_v28  ;;  %v246_v44 = vshrl.u32 %v1094_v29, 16  ;;  %v1098_v45 = vld [vmem:[%s1163_s21 + $0xc] sm:$0xff]   ;;  %v1100_v57 = vld [vmem:[%s1163_s21 + $0x14] sm:$0xff]   ;;  %v1103_v7 = vld [vmem:[%s1163_s21 + $0x24] sm:$0x1f]  }
  0x16   : > { %v221_v16 = vsel %vm209_vm2, %v216_v13, %v220_v11  ;;  %v229_v21 = vsel %vm209_vm2, %v224_v17, %v228_v18  ;;  %v496_v32 = vor.u32 %v494_v25, %v1195_v30  ;;  %v244_v39 = vrot.slane %v242_v36, 1 }
  0x17   : > { %989 = vmatmul.mubr.msk.bf16.vlgmr.msra.gmra.mxu0 %vm255_vm1, %v221_v16  ;;  %v237_v34 = vsel %vm209_vm2, %v232_v27, %v236_v28  ;;  %v469_v46 = vshll.u32 %v1097_v41, 16  ;;  %v646_v47 = vrot.slane %v1095_v42, 1  ;;  %v647_v48 = vrot.slane %v1096_v43, 1 }
  0x18   : > { %1031 = vmatpush3.bf16.msra.mxu0 %v1090_v12  ;;  %1015 = vmatmul.mubr.msk.bf16.gmra.mxu1 %vm255_vm1, %v1089_v5  ;;  %v1206_v37 = vsel %vm209_vm2, %v496_v32, %v1201_v33  ;;  %v245_v40 = vsel %vm209_vm2, %v240_v38, %v244_v39  ;;  %v248_v49 = vor.u32 %v246_v44, %v244_v39  ;;  %v467_v50 = vshrl.u32 %v1097_v41, 16 }
  0x19   : > { %992 = vmatprep.mubr.msk.bf16.mxu0 %vm1114_vm0, %v1113_v1  ;;  %1018 = vmatprep.mubr.msk.bf16.mxu1 %vm1114_vm0, %v1113_v1  ;;  %v471_v51 = vrot.slane %v469_v46, 1  ;;  %v474_v52 = vshll.u32 %v1098_v45, 16  ;;  %v648_v53 = vsel %vm645_vm3, %v646_v47, %v647_v48  ;;  %v649_v58 = vrot.slane %v1099_v54, 1 }
  0x1a   : > { %v478_v60 = vshrl.u32 %v1098_v45, 16  ;;  %v482_v61 = vshll.u32 %v1100_v57, 16  ;;  %v651_v3 = vrot.slane %v1101_v63, 1  ;;  %v486_v5 = vshrl.u32 %v1100_v57, 16 }
  0x1b   : > { %v472_v55 = vor.u32 %v471_v51, %v467_v50  ;;  %v476_v56 = vrot.slane %v474_v52, 1  ;;  %v650_v62 = vsel %vm645_vm3, %v647_v48, %v649_v58  ;;  %v502_v12 = vshrl.u32 %v1189_v26, 16 }
  0x1c   : > { %v484_v2 = vrot.slane %v482_v61, 1  ;;  %v652_v6 = vsel %vm645_vm3, %v649_v58, %v651_v3  ;;  %v1290_v61 = vld [vmem:[%s1340_s2] ss:$0 sm:$0xff] }
  0x1d   : > { %v477_v59 = vsel %vm209_vm2, %v472_v55, %v476_v56  ;;  %v480_v0 = vor.u32 %v478_v60, %v476_v56  ;;  %v504_v13 = vor.u32 %v502_v12, %v1201_v33 }
  0x1e   : > { %v488_v8 = vor.u32 %v486_v5, %v484_v2 }
  0x1f   : > { %993 = vmatmul.mubr.msk.bf16.gmra.mxu0 %vm255_vm1, %v229_v21  ;;  %v485_v4 = vsel %vm209_vm2, %v480_v0, %v484_v2 }
  0x20   : > { %1019 = vmatmul.mubr.msk.bf16.gmra.mxu1 %vm255_vm1, %v1092_v9  ;;  %996 = vmatprep.mubr.msk.bf16.mxu0 %vm1114_vm0, %v1113_v1  ;;  %v653_v9 = vrot.slane %v1103_v7, 1  ;;  %v493_v10 = vsel %vm209_vm2, %v488_v8, %v1195_v30 }
  0x21   : > { %1022 = vmatprep.mubr.msk.bf16.mxu1 %vm1114_vm0, %v1113_v1 }
  0x22   : > { %v654_v11 = vsel %vm645_vm3, %v651_v3, %v653_v9 }
  0x27   : > { %997 = vmatmul.mubr.msk.bf16.gmra.mxu0 %vm255_vm1, %v237_v34 }
  0x28   : > { %1023 = vmatmul.mubr.msk.bf16.gmra.mxu1 %vm255_vm1, %v1093_v19  ;;  %1000 = vmatprep.mubr.msk.bf16.mxu0 %vm1114_vm0, %v1113_v1 }
  0x29   : > { %1026 = vmatprep.mubr.msk.bf16.mxu1 %vm1114_vm0, %v1113_v1 }
  0x2f   : > { %1001 = vmatmul.mubr.msk.bf16.gmra.mxu0 %vm255_vm1, %v245_v40 }
  0x30   : > { %1027 = vmatmul.mubr.msk.bf16.gmra.mxu1 %vm255_vm1, %v1094_v29  ;;  %1004 = vmatprep.mubr.msk.bf16.mxu0 %vm1114_vm0, %v1113_v1 }
  0x31   : > { %1054 = vmatprep.mubr.msk.bf16.mxu1 %vm1114_vm0, %v1113_v1 }
  0x37   : > { %1005 = vmatmul.mubr.msk.bf16.gmra.mxu0 %vm255_vm1, %v248_v49 }
  0x38   : > { %1055 = vmatmul.mubr.msk.bf16.vlgmr.msra.gmra.mxu1 %vm255_vm1, %v648_v53  ;;  %1032 = vmatprep.mubr.msk.bf16.mxu0 %vm1114_vm0, %v1113_v1 }
  0x39   : > { %1058 = vmatprep.mubr.msk.bf16.mxu1 %vm1114_vm0, %v1113_v1 }
  0x3f   : > { %1033 = vmatmul.mubr.msk.bf16.vlgmr.msra.gmra.mxu0 %vm255_vm1, %v477_v59 }
  0x40   : > { %1059 = vmatmul.mubr.msk.bf16.gmra.mxu1 %vm255_vm1, %v650_v62  ;;  %1036 = vmatprep.mubr.msk.bf16.mxu0 %vm1114_vm0, %v1113_v1 }
  0x41   : > { %1062 = vmatprep.mubr.msk.bf16.mxu1 %vm1114_vm0, %v1113_v1 }
  0x47   : > { %1037 = vmatmul.mubr.msk.bf16.gmra.mxu0 %vm255_vm1, %v485_v4 }
  0x48   : > { %1063 = vmatmul.mubr.msk.bf16.gmra.mxu1 %vm255_vm1, %v652_v6  ;;  %1040 = vmatprep.mubr.msk.bf16.mxu0 %vm1114_vm0, %v1113_v1 }
  0x49   : > { %1066 = vmatprep.mubr.msk.bf16.mxu1 %vm1114_vm0, %v1113_v1 }
  0x4f   : > { %1041 = vmatmul.mubr.msk.bf16.gmra.mxu0 %vm255_vm1, %v493_v10 }
  0x50   : > { %1067 = vmatmul.mubr.msk.bf16.gmra.mxu1 %vm255_vm1, %v654_v11  ;;  %1044 = vmatprep.mubr.msk.bf16.mxu0 %vm1114_vm0, %v1113_v1 }
  0x51   : > { %1070 = vmatprep.mubr.msk.bf16.mxu1 %vm1114_vm0, %v1113_v1 }
  0x57   : > { %1045 = vmatmul.mubr.msk.bf16.gmra.mxu0 %vm255_vm1, %v1206_v37 }
  0x58   : > { %1071 = vmatmul.mubr.msk.bf16.gmra.mxu1 %vm255_vm1, %v653_v9  ;;  %1048 = vmatprep.mubr.msk.bf16.mxu0 %vm1114_vm0, %v1113_v1 }
  0x5f   : > { %1049 = vmatmul.mubr.msk.bf16.gmra.mxu0 %vm255_vm1, %v504_v13 }
  0xd0   : > { %v393_v14 = vpop.f32.mrf.mxu1 }
  0xd2   : > { %v1012_v15 = vpop.f32.mrf.mxu1 }
  0xd4   : > { %v396_v16 = vpop.f32.mrf.mxu1 }
  0xd6   : > { %v1013_v17 = vpop.f32.mrf.mxu1 }
  0xd7   : > { %v305_v18 = vpop.f32.mrf.mxu0 }
  0xd8   : > { %v401_v19 = vpop.f32.mrf.mxu1  ;;  %v394_v56 = vadd.f32 %v393_v14, %v305_v18 }
  0xd9   : > { %v990_v20 = vpop.f32.mrf.mxu0 }
  0xda   : > { %v1016_v21 = vpop.f32.mrf.mxu1 }
  0xdb   : > { %v308_v22 = vpop.f32.mrf.mxu0 }
  0xdc   : > { %v404_v23 = vpop.f32.mrf.mxu1  ;;  %v397_v63 = vadd.f32 %v396_v16, %v308_v22 }
  0xdd   : > { %v991_v24 = vpop.f32.mrf.mxu0 }
  0xde   : > { %v1017_v25 = vpop.f32.mrf.mxu1 }
  0xdf   : > { %v313_v26 = vpop.f32.mrf.mxu0 }
  0xe0   : > { %v1269_v27 = vpop.f32.mrf.mxu1  ;;  %v402_v8 = vadd.f32 %v401_v19, %v313_v26 }
  0xe1   : > { %v994_v1 = vpop.f32.mrf.mxu0 }
  0xe2   : > { %v1020_v28 = vpop.f32.mrf.mxu1 }
  0xe3   : > { %v316_v29 = vpop.f32.mrf.mxu0 }
  0xe4   : > { %v1271_v30 = vpop.f32.mrf.mxu1  ;;  %v405_v18 = vadd.f32 %v404_v23, %v316_v29 }
  0xe5   : > { %v995_v31 = vpop.f32.mrf.mxu0 }
  0xe6   : > { %v1021_v32 = vpop.f32.mrf.mxu1 }
  0xe7   : > { %v321_v33 = vpop.f32.mrf.mxu0 }
  0xe8   : > { %v1273_v34 = vpop.f32.mrf.mxu1  ;;  %v410_v31 = vadd.f32 %v1269_v27, %v321_v33 }
  0xe9   : > { %v998_v35 = vpop.f32.mrf.mxu0 }
  0xea   : > { %v1024_v36 = vpop.f32.mrf.mxu1 }
  0xeb   : > { %v1275_v37 = vpop.f32.mrf.mxu0 }
  0xec   : > { %v1277_v38 = vpop.f32.mrf.mxu1 }
  0xed   : > { %v999_v39 = vpop.f32.mrf.mxu0 }
  0xee   : > { %v1025_v40 = vpop.f32.mrf.mxu1 }
  0xef   : > { %v1279_v41 = vpop.f32.mrf.mxu0 }
  0xf0   : > { %v1281_v42 = vpop.f32.mrf.mxu1 }
  0xf1   : > { %v1002_v43 = vpop.f32.mrf.mxu0 }
  0xf2   : > { %v1028_v44 = vpop.f32.mrf.mxu1 }
  0xf3   : > { %v1283_v45 = vpop.f32.mrf.mxu0 }
  0xf4   : > { %v428_v46 = vpop.f32.mrf.mxu1 }
  0xf5   : > { %v1003_v47 = vpop.f32.mrf.mxu0  ;;  %v413_v46 = vadd.f32 %v1271_v30, %v1275_v37 }
  0xf6   : > { %v1029_v48 = vpop.f32.mrf.mxu1 }
  0xf7   : > { %v1285_v49 = vpop.f32.mrf.mxu0 }
  0xf8   : > { %v710_v50 = vpop.f32.mrf.mxu1 }
  0xf9   : > { %v1006_v51 = vpop.f32.mrf.mxu0 }
  0xfa   : > { %v1056_v52 = vpop.f32.mrf.mxu1 }
  0xfb   : > { %v340_v53 = vpop.f32.mrf.mxu0 }
  0xfc   : > { %v713_v54 = vpop.f32.mrf.mxu1 }
  0xfd   : > { %v1007_v55 = vpop.f32.mrf.mxu0 }
  0xfe   : > { %v1057_v57 = vpop.f32.mrf.mxu1  ;;  %v418_v55 = vadd.f32 %v1273_v34, %v1279_v41 }
  0xff   : > { %v560_v58 = vpop.f32.mrf.mxu0 }
 0x100   : > { %v598_v59 = vadd.f32 %v560_v58, %v394_v56  ;;  %v718_v60 = vpop.f32.mrf.mxu1 }
 0x101   : > { %v1034_v62 = vpop.f32.mrf.mxu0 }
 0x102   : > { %v748_v0 = vadd.f32 %v710_v50, %v598_v59  ;;  %v1060_v2 = vpop.f32.mrf.mxu1 }
 0x103   : > { %v563_v3 = vpop.f32.mrf.mxu0 }
 0x104   : > { %v764_v4 = vadd.f32 %v1290_v61, %v748_v0  ;;  %v599_v5 = vadd.f32 %v563_v3, %v397_v63  ;;  %v721_v6 = vpop.f32.mrf.mxu1  ;;  %v421_v0 = vadd.f32 %v1277_v38, %v1283_v45 }
 0x105   : > { %v1035_v7 = vpop.f32.mrf.mxu0 }
 0x106   : > { %v773_v9 = vmax.f32 %v764_v4, 0.0  ;;  %v749_v10 = vadd.f32 %v713_v54, %v599_v5  ;;  %v1061_v11 = vpop.f32.mrf.mxu1 }
 0x107   : > { %v568_v12 = vpop.f32.mrf.mxu0 }
 0x108   : > { %v953_v13 = vpack.c.bf16 %v773_v9, %v773_v9  ;;  %v765_v14 = vadd.f32 %v1290_v61, %v749_v10  ;;  %v600_v15 = vadd.f32 %v568_v12, %v402_v8  ;;  %v726_v16 = vpop.f32.mrf.mxu1  ;;  %v426_v9 = vadd.f32 %v1281_v42, %v1285_v49 }
 0x109   : > { %v1038_v17 = vpop.f32.mrf.mxu0 }
 0x10a   : > { %820 = vst.msk [vmem:[%s1297_s4] sm:$0xf] %vm819_vm4, %v953_v13  ;;  %v774_v19 = vmax.f32 %v765_v14, 0.0  ;;  %v750_v20 = vadd.f32 %v718_v60, %v600_v15  ;;  %v1064_v21 = vpop.f32.mrf.mxu1 }
 0x10b   : > { %v571_v22 = vpop.f32.mrf.mxu0  ;;  %v831_v21 = vld [vmem:[%s1297_s4 + $0x20] sm:$0xf] }
 0x10c   : > { %v954_v24 = vpack.c.bf16 %v774_v19, %v774_v19  ;;  %v766_v25 = vadd.f32 %v1290_v61, %v750_v20  ;;  %v601_v26 = vadd.f32 %v571_v22, %v405_v18  ;;  %v729_v1 = vpop.f32.mrf.mxu1 }
 0x10d   : > { %v1039_v28 = vpop.f32.mrf.mxu0 }
 0x10e   : > { %821 = vst.msk [vmem:[%s1297_s4 + $0x4] sm:$0xf] %vm819_vm4, %v954_v24  ;;  %v775_v32 = vmax.f32 %v766_v25, 0.0  ;;  %v751_v35 = vadd.f32 %v721_v6, %v601_v26  ;;  %v1065_v23 = vpop.f32.mrf.mxu1 }
 0x10f   : > { %v576_v29 = vpop.f32.mrf.mxu0 }
 0x110   : > { %v955_v36 = vpack.c.bf16 %v775_v32, %v775_v32  ;;  %v767_v39 = vadd.f32 %v1290_v61, %v751_v35  ;;  %v602_v40 = vadd.f32 %v576_v29, %v410_v31  ;;  %v734_v43 = vpop.f32.mrf.mxu1 }
 0x111   : > { %v1042_v44 = vpop.f32.mrf.mxu0 }
 0x112   : > { %822 = vst.msk [vmem:[%s1297_s4 + $0x8] sm:$0xf] %vm819_vm4, %v955_v36  ;;  %v776_v47 = vmax.f32 %v767_v39, 0.0  ;;  %v752_v27 = vadd.f32 %v726_v16, %v602_v40  ;;  %v1068_v33 = vpop.f32.mrf.mxu1 }
 0x113   : > { %v579_v48 = vpop.f32.mrf.mxu0 }
 0x114   : > { %v956_v50 = vpack.c.bf16 %v776_v47, %v776_v47  ;;  %v768_v51 = vadd.f32 %v1290_v61, %v752_v27  ;;  %v603_v52 = vadd.f32 %v579_v48, %v413_v46  ;;  %v737_v53 = vpop.f32.mrf.mxu1 }
 0x115   : > { %v1043_v54 = vpop.f32.mrf.mxu0 }
 0x116   : > { %823 = vst.msk [vmem:[%s1297_s4 + $0xc] sm:$0xf] %vm819_vm4, %v956_v50  ;;  %v777_v56 = vmax.f32 %v768_v51, 0.0  ;;  %v753_v30 = vadd.f32 %v729_v1, %v603_v52  ;;  %v1069_v37 = vpop.f32.mrf.mxu1 }
 0x117   : > { %v584_v57 = vpop.f32.mrf.mxu0 }
 0x118   : > { %v957_v58 = vpack.c.bf16 %v777_v56, %v777_v56  ;;  %v769_v59 = vadd.f32 %v1290_v61, %v753_v30  ;;  %v604_v60 = vadd.f32 %v584_v57, %v418_v55  ;;  %v742_v62 = vpop.f32.mrf.mxu1 }
 0x119   : > { %v1046_v63 = vpop.f32.mrf.mxu0 }
 0x11a   : > { %824 = vst.msk [vmem:[%s1297_s4 + $0x10] sm:$0xf] %vm819_vm4, %v957_v58  ;;  %v778_v2 = vmax.f32 %v769_v59, 0.0  ;;  %v754_v34 = vadd.f32 %v734_v43, %v604_v60  ;;  %v1072_v41 = vpop.f32.mrf.mxu1 }
 0x11b   : > { %v587_v3 = vpop.f32.mrf.mxu0 }
 0x11c   : > { %v958_v4 = vpack.c.bf16 %v778_v2, %v778_v2  ;;  %v770_v5 = vadd.f32 %v1290_v61, %v754_v34  ;;  %v605_v6 = vadd.f32 %v587_v3, %v421_v0  ;;  %v745_v7 = vpop.f32.mrf.mxu1 }
 0x11d   : > { %v1047_v8 = vpop.f32.mrf.mxu0 }
 0x11e   : > { %825 = vst.msk [vmem:[%s1297_s4 + $0x14] sm:$0xf] %vm819_vm4, %v958_v4  ;;  %v779_v10 = vmax.f32 %v770_v5, 0.0  ;;  %v755_v38 = vadd.f32 %v737_v53, %v605_v6  ;;  %v1073_v45 = vpop.f32.mrf.mxu1 }
 0x11f   : > { %v592_v11 = vpop.f32.mrf.mxu0 }
 0x120   : > { %v959_v12 = vpack.c.bf16 %v779_v10, %v779_v10  ;;  %v771_v13 = vadd.f32 %v1290_v61, %v755_v38  ;;  %v606_v14 = vadd.f32 %v592_v11, %v426_v9 }
 0x121   : > { %v1050_v15 = vpop.f32.mrf.mxu0 }
 0x122   : > { %826 = vst.msk [vmem:[%s1297_s4 + $0x18] sm:$0xf] %vm819_vm4, %v959_v12  ;;  %v780_v16 = vmax.f32 %v771_v13, 0.0  ;;  %v756_v17 = vadd.f32 %v742_v62, %v606_v14 }
 0x123   : > { %v595_v18 = vpop.f32.mrf.mxu0 }
 0x124   : > { %v960_v42 = vpack.c.bf16 %v780_v16, %v780_v16  ;;  %v772_v49 = vadd.f32 %v1290_v61, %v756_v17 }
 0x125   : > { %v1051_v19 = vpop.f32.mrf.mxu0 }
 0x126   : > { %827 = vst.msk [vmem:[%s1297_s4 + $0x1c] sm:$0xf] %vm819_vm4, %v960_v42  ;;  %v781_v20 = vmax.f32 %v772_v49, 0.0 }
 0x128   : > { %v961_v22 = vpack.c.bf16 %v781_v20, %v781_v20 }
 0x12a   : > { %v832_v24 = vsel %vm830_vm6, %v961_v22, %v831_v21 }
 0x12b   : > { %833 = vst [vmem:[%s1297_s4 + $0x20] sm:$0xf] %v832_v24 }
 0x12c PF: > { %s13_s12 = sadd.s32 1, %s1111_s12  }
 0x12d   : > { %p10_p4 = scmp.ge.s32.totalorder %s13_s12, 4  }
 0x12f   :  { %12 = sbr.rel (!%p10_p4) target bundleno = 1 (0x1), region = 65 }

// kernel: encoder_forward.4
= control target key start
LH: loop header
LB: loop body
LE: loop exit
PB: predicated region body
PF: predicated region fallthrough
CT: control target
= control target key end

     0   :  { %s888_s12 = smov 0   ;;  %s979_s0 = inlined_call_operand.vmem [shape: bf16[2,25,64], index: 0, kind: input, shape index: {}]   ;;  %s980_s1 = inlined_call_operand.vmem [shape: bf16[4,64,32], index: 1, kind: input, shape index: {}]   ;;  %s981_s2 = inlined_call_operand.vmem [shape: f32[1,32], index: 2, kind: input, shape index: {}]   ;;  %s982_s3 = inlined_call_operand.vmem [shape: bf16[2,19,32], index: 3, kind: output, shape index: {}]  }
   0x1 LB: > { %s685_s13 = sadd.s32 4294967295, %s866_s12   ;;  %p689_p0 = scmp.ge.s32.totalorder %s866_s12, 1  ;;  %s866_s12 = sphi %s888_s12, %s13_s12  }
   0x2   : > { %p137_p1 = scmp.lt.s32.totalorder %s866_s12, 3 }
   0x4   : > { %p138_p2 = pnand %p689_p0, %p137_p1 }
   0x5   : > { %p161_p3 = scmp.lt.s32.totalorder (!%p138_p2), %s685_s13, 1 }
   0x6   : > { %141 = sbr.rel (%p138_p2) target bundleno = 254 (0xfe), region = 32 }
   0xb   : > { %v838_v0 = vld [vmem:[%s980_s1 + $0x38] sm:$0xff]   ;;  %v840_v2 = vld [vmem:[%s980_s1 + $0x30] sm:$0xff]   ;;  %s984_s13 = smov (!%p161_p3, %s685_s13), 1  ;;  %v842_v4 = vld [vmem:[%s980_s1 + $0x28] sm:$0xff]   ;;  %vm240_vm0 = vcmask 523264   ;;  %vm510_vm2 = vcmask 1044480  }
   0xc   : > { %v839_v1 = vld [vmem:[%s980_s1 + $0x18] sm:$0xff]   ;;  %781 = vmatprep.subr.bf16.mxu0 %v838_v0  ;;  %v841_v3 = vld [vmem:[%s980_s1 + $0x10] sm:$0xff]   ;;  %s753_s24 = sshll.u32 %s984_s13, 4  ;;  %v843_v5 = vld [vmem:[%s980_s1 + $0x8] sm:$0xff]   ;;  %vm200_vm1 = vsmask.f32 7424 }
   0xd   : > { %793 = vmatprep.subr.bf16.mxu1 %v839_v1  ;;  %782 = vmatpush3.bf16.msra.mxu0 %v838_v0  ;;  %s920_s29 = scalar_lea.vmem %s979_s0, %s753_s24  ;;  %v844_v6 = vld [vmem:[%s980_s1 + $0x20] sm:$0xff]   ;;  %v848_v16 = vld [vmem:[%s980_s1 + $0x58] sm:$0xff]   ;;  %v850_v22 = vld [vmem:[%s980_s1 + $0x50] sm:$0xff]   ;;  %vm388_vm3 = vsmask.f32 5376  ;;  %s829_s25 = smul.u32 12, %s984_s13 }
   0xe   : > { %794 = vmatpush3.bf16.msra.mxu1 %v839_v1  ;;  %783 = vmatprep.subr.bf16.mxu0 %v840_v2  ;;  %v172_v7 = vld [vmem:[%s920_s29] sm:$0xf]  ;;  %v173_v8 = vld [vmem:[%s920_s29 + $0x4] sm:$0xf]  ;;  %v849_v19 = vld [vmem:[%s980_s1 + $0x78] sm:$0xff]   ;;  %vm624_vm4 = vcmask 254976  }
   0xf   : > { %795 = vmatprep.subr.bf16.mxu1 %v841_v3  ;;  %v845_v9 = vld [vmem:[%s980_s1] sm:$0xff]   ;;  %v701_v10 = vcombine.low %v172_v7, %v173_v8  ;;  %v847_v11 = vld [vmem:[%s920_s29 + $0x8] ss:$0 sps:$4 sm:$0x33]   ;;  %v851_v24 = vld [vmem:[%s980_s1 + $0x70] sm:$0xff]   ;;  %s170_s30 = scalar_lea.vmem %s982_s3, %s829_s25  ;;  %vm621_vm7 = vcmask 257024  }
  0x10   : > { %v209_v14 = vshll.u32 %v847_v11, 16  ;;  %v213_v15 = vshrl.u32 %v847_v11, 16  ;;  %v371_v25 = vld [vmem:[%s920_s29] sm:$0xc]  ;;  %v852_v26 = vld [vmem:[%s980_s1 + $0x48] sm:$0xff]  }
  0x11   : > { %784 = vmatpush3.bf16.msra.mxu0 %v840_v2  ;;  %v202_v12 = vshrl.u32 %v701_v10, 16  ;;  %v204_v13 = vshll.u32 %v701_v10, 16  ;;  %801 = vmatprep.mubr.msk.bf16.mxu1 %vm240_vm0, %v701_v10  ;;  %v853_v27 = vld [vmem:[%s980_s1 + $0x68] sm:$0xff]   ;;  %v723_v28 = vcombine.low %v371_v25, %v173_v8  ;;  %v858_v34 = vld [vmem:[%s920_s29] sm:$0xf8]  }
  0x12   : > { %796 = vmatpush3.bf16.msra.mxu1 %v841_v3  ;;  %785 = vmatprep.subr.bf16.mxu0 %v842_v4  ;;  %v211_v18 = vrot.slane %v209_v14, 1  ;;  %v857_v29 = vld [vmem:[%s920_s29 + $0x8] ss:$0 sps:$4 sm:$0xff]   ;;  %v511_v40 = vrot.slane %v858_v34, 3  ;;  %v854_v42 = vld [vmem:[%s980_s1 + $0x40] sm:$0xff]  }
  0x13   : > { %797 = vmatprep.subr.bf16.mxu1 %v843_v5  ;;  %v206_v17 = vrot.slane %v204_v13, 1  ;;  %v390_v30 = vshrl.u32 %v723_v28, 16  ;;  %v393_v31 = vshll.u32 %v723_v28, 16  ;;  %v398_v32 = vshrl.u32 %v857_v29, 16  ;;  %v859_v35 = vld [vmem:[%s920_s29 + $0x8] sm:$0x1f]  }
  0x14   : > { %v215_v21 = vor.u32 %v213_v15, %v211_v18  ;;  %v401_v33 = vshll.u32 %v857_v29, 16  ;;  %v512_v41 = vrot.slane %v859_v35, 3  ;;  %v855_v43 = vld [vmem:[%s980_s1 + $0x60] sm:$0xff]   ;;  %vm625_vm5 = vsmask.f32 1280 }
  0x15   : > { %786 = vmatpush3.bf16.msra.mxu0 %v842_v4  ;;  %v207_v20 = vor.u32 %v206_v17, %v202_v12  ;;  %v392_v36 = vrot.slane %v390_v30, 2  ;;  %v395_v37 = vrot.slane %v393_v31, 3  ;;  %v400_v38 = vrot.slane %v398_v32, 2  ;;  %v747_v61 = vld [vmem:[%s981_s2] ss:$0 sm:$0xff]  ;;  %vm626_vm6 = vmand %vm624_vm4, %vm625_vm5 }
  0x16   : > { %798 = vmatpush3.bf16.msra.mxu1 %v843_v5  ;;  %787 = vmatprep.subr.bf16.mxu0 %v844_v6  ;;  %v403_v39 = vrot.slane %v401_v33, 3  ;;  %v513_v46 = vsel %vm510_vm2, %v511_v40, %v512_v41 }
  0x17   : > { %799 = vmatprep.subr.bf16.mxu1 %v845_v9  ;;  %v212_v23 = vsel %vm200_vm1, %v207_v20, %v211_v18  ;;  %v396_v44 = vor.u32 %v395_v37, %v392_v36 }
  0x18   : > { %789 = vmatprep.mubr.msk.bf16.mxu0 %vm240_vm0, %v212_v23  ;;  %v404_v45 = vor.u32 %v403_v39, %v400_v38 }
  0x19   : > { %788 = vmatpush3.bf16.msra.mxu0 %v844_v6 }
  0x1a   : > { %800 = vmatpush3.bf16.msra.mxu1 %v845_v9  ;;  %805 = vmatprep.subr.bf16.mxu0 %v848_v16  ;;  %v405_v47 = vsel %vm388_vm3, %v396_v44, %v404_v45 }
  0x1b   : > { %817 = vmatprep.subr.bf16.mxu1 %v849_v19 }
  0x1c   : > { %790 = vmatmul.mubr.msk.bf16.vlgmr.msra.gmra.mxu0 %vm240_vm0, %v215_v21 }
  0x1d   : > { %802 = vmatmul.mubr.msk.bf16.vlgmr.msra.gmra.mxu1 %vm240_vm0, %v847_v11  ;;  %806 = vmatpush3.bf16.msra.mxu0 %v848_v16  ;;  %v627_v11 = vld [vmem:[%s170_s30 + $0x8] sm:$0x3] }
  0x1e   : > { %818 = vmatpush3.bf16.msra.mxu1 %v849_v19  ;;  %807 = vmatprep.subr.bf16.mxu0 %v850_v22 }
  0x1f   : > { %819 = vmatprep.subr.bf16.mxu1 %v851_v24  ;;  %825 = vmatprep.mubr.msk.bf16.mxu1 %vm240_vm0, %v513_v46 }
  0x20   : > { %813 = vmatprep.mubr.msk.bf16.mxu0 %vm240_vm0, %v405_v47 }
  0x21   : > { %808 = vmatpush3.bf16.msra.mxu0 %v850_v22 }
  0x22   : > { %820 = vmatpush3.bf16.msra.mxu1 %v851_v24  ;;  %809 = vmatprep.subr.bf16.mxu0 %v852_v26 }
  0x23   : > { %821 = vmatprep.subr.bf16.mxu1 %v853_v27 }
  0x25   : > { %810 = vmatpush3.bf16.msra.mxu0 %v852_v26 }
  0x26   : > { %822 = vmatpush3.bf16.msra.mxu1 %v853_v27  ;;  %811 = vmatprep.subr.bf16.mxu0 %v854_v42 }
  0x27   : > { %823 = vmatprep.subr.bf16.mxu1 %v855_v43 }
  0x29   : > { %812 = vmatpush3.bf16.msra.mxu0 %v854_v42 }
  0x2a   : > { %824 = vmatpush3.bf16.msra.mxu1 %v855_v43 }
  0x2c   : > { %814 = vmatmul.mubr.msk.bf16.vlgmr.msra.gmra.mxu0 %vm240_vm0, %v404_v45 }
  0x2d   : > { %826 = vmatmul.mubr.msk.bf16.vlgmr.msra.gmra.mxu1 %vm240_vm0, %v512_v41 }
  0xdc   : > { %v791_v48 = vpop.f32.mrf.mxu0 }
  0xdd   : > { %v803_v49 = vpop.f32.mrf.mxu1 }
  0xde   : > { %v281_v50 = vpop.f32.mrf.mxu0  ;;  %v366_v56 = vadd.f32 %v803_v49, %v791_v48 }
  0xdf   : > { %v357_v51 = vpop.f32.mrf.mxu1 }
  0xe0   : > { %v792_v52 = vpop.f32.mrf.mxu0  ;;  %v358_v59 = vadd.f32 %v357_v51, %v281_v50 }
  0xe1   : > { %v804_v53 = vpop.f32.mrf.mxu1 }
  0xe2   : > { %v284_v54 = vpop.f32.mrf.mxu0 }
  0xe3   : > { %v360_v55 = vpop.f32.mrf.mxu1 }
  0xe4   : > { %v361_v4 = vadd.f32 %v360_v55, %v284_v54 }
  0xec   : > { %v815_v57 = vpop.f32.mrf.mxu0 }
  0xed   : > { %v827_v58 = vpop.f32.mrf.mxu1  ;;  %v486_v60 = vadd.f32 %v815_v57, %v366_v56 }
  0xee   : > { %v470_v62 = vpop.f32.mrf.mxu0 }
  0xef   : > { %v578_v63 = vpop.f32.mrf.mxu1  ;;  %v594_v0 = vadd.f32 %v827_v58, %v486_v60  ;;  %v484_v1 = vadd.f32 %v470_v62, %v358_v59 }
  0xf0   : > { %v816_v2 = vpop.f32.mrf.mxu0 }
  0xf1   : > { %v828_v3 = vpop.f32.mrf.mxu1  ;;  %v604_v5 = vadd.f32 %v747_v61, %v594_v0  ;;  %v592_v6 = vadd.f32 %v578_v63, %v484_v1 }
  0xf2   : > { %v473_v7 = vpop.f32.mrf.mxu0 }
  0xf3   : > { %v607_v8 = vmax.f32 %v604_v5, 0.0  ;;  %v602_v9 = vadd.f32 %v747_v61, %v592_v6  ;;  %v485_v10 = vadd.f32 %v473_v7, %v361_v4  ;;  %v581_v12 = vpop.f32.mrf.mxu1 }
  0xf5   : > { %v756_v13 = vpack.c.bf16 %v607_v8, %v607_v8  ;;  %v605_v14 = vmax.f32 %v602_v9, 0.0  ;;  %v593_v15 = vadd.f32 %v581_v12, %v485_v10 }
  0xf7   : > { %v628_v16 = vsel %vm626_vm6, %v756_v13, %v627_v11  ;;  %v754_v17 = vpack.c.bf16 %v605_v14, %v605_v14  ;;  %v603_v18 = vadd.f32 %v747_v61, %v593_v15 }
  0xf8   : > { %629 = vst [vmem:[%s170_s30 + $0x8] sm:$0x3] %v628_v16 }
  0xf9   : > { %622 = vst.msk [vmem:[%s170_s30] sm:$0xf] %vm621_vm7, %v754_v17  ;;  %v606_v19 = vmax.f32 %v603_v18, 0.0 }
  0xfb   : > { %v755_v20 = vpack.c.bf16 %v606_v19, %v606_v19 }
  0xfd   : > { %623 = vst.msk [vmem:[%s170_s30 + $0x4] sm:$0xf] %vm621_vm7, %v755_v20 }
  0xfe PF: > { %s13_s12 = sadd.s32 1, %s866_s12  }
  0xff   : > { %p10_p4 = scmp.ge.s32.totalorder %s13_s12, 4  }
 0x101   :  { %12 = sbr.rel (!%p10_p4) target bundleno = 1 (0x1), region = 65 }

// kernel: encoder_forward.5
= control target key start
LH: loop header
LB: loop body
LE: loop exit
PB: predicated region body
PF: predicated region fallthrough
CT: control target
= control target key end

     0   :  { %s3569_s21 = smov 0   ;;  %s4005_s0 = inlined_call_operand.vmem [shape: bf16[2,36,32], index: 0, kind: input, shape index: {}]   ;;  %s4006_s1 = inlined_call_operand.vmem [shape: bf16[9,32,32], index: 1, kind: input, shape index: {}]   ;;  %s4007_s2 = inlined_call_operand.vmem [shape: f32[1,32], index: 2, kind: input, shape index: {}]   ;;  %s4008_s3 = inlined_call_operand.vmem [shape: bf16[2,9,32,8], index: 3, kind: input, shape index: {}]   ;;  %s4009_s4 = inlined_call_operand.vmem [shape: bf16[2,8,32], index: 4, kind: input, shape index: {}]   ;;  %s4010_s5 = inlined_call_operand.vmem [shape: f32[36,1], index: 5, kind: input, shape index: {}]   ;;  %s4011_s6 = inlined_call_operand.vmem [shape: f32[2,22,32], index: 6, kind: output, shape index: {}]  }
   0x1 LB: > { %s2863_s22 = sadd.s32 4294967295, %s3530_s21   ;;  %p2867_p0 = scmp.ge.s32.totalorder %s3530_s21, 1  ;;  %s3530_s21 = sphi %s3569_s21, %s16_s21  }
   0x2   : > { %p212_p1 = scmp.lt.s32.totalorder %s3530_s21, 3 }
   0x4   : > { %p213_p2 = pnand %p2867_p0, %p212_p1 }
   0x5   : > { %p242_p3 = scmp.lt.s32.totalorder (!%p213_p2), %s2863_s22, 1 }
   0x6   : > { %216 = sbr.rel (%p213_p2) target bundleno = 1207 (0x4b7), region = 44 }
   0xb   : > { %v3457_v0 = vld [vmem:[%s4006_s1 + $0x18] sm:$0xff]   ;;  %v3458_v1 = vld [vmem:[%s4006_s1 + $0x8] sm:$0xff]   ;;  %v3459_v2 = vld [vmem:[%s4006_s1 + $0x10] sm:$0xff]   ;;  %s4013_s22 = smov (!%p242_p3, %s2863_s22), 1  ;;  %vm302_vm0 = vcmask 261120   ;;  %vm434_vm2 = vcmask 1046528  }
   0xc   : > { %3213 = vmatprep.subr.bf16.mxu0 %v3457_v0  ;;  %3221 = vmatprep.subr.bf16.mxu1 %v3458_v1  ;;  %v3460_v3 = vld [vmem:[%s4006_s1] sm:$0xff]   ;;  %s3443_s7 = smul.u32 20, %s4013_s22  ;;  %v3463_v4 = vld [vmem:[%s4006_s1 + $0x28] sm:$0xff]   ;;  %v3465_v5 = vld [vmem:[%s4006_s1 + $0x38] sm:$0xff]   ;;  %vm274_vm1 = vsmask.f32 7424 }
   0xd   : > { %3214 = vmatpush3.bf16.msra.mxu0 %v3457_v0  ;;  %3222 = vmatpush3.bf16.msra.mxu1 %v3458_v1  ;;  %v3467_v11 = vld [vmem:[%s4006_s1 + $0x30] sm:$0xff]   ;;  %v3472_v30 = vld [vmem:[%s4006_s1 + $0x58] sm:$0xff]   ;;  %vm526_vm3 = vcmask 1044480   ;;  %v3466_v33 = vld [vmem:[%s4006_s1 + $0x20] sm:$0xff]   ;;  %vm608_vm4 = vsmask.f32 4352 }
   0xe   : > { %3215 = vmatprep.subr.bf16.mxu0 %v3459_v2  ;;  %3223 = vmatprep.subr.bf16.mxu1 %v3460_v3  ;;  %s3601_s14 = scalar_lea.vmem %s4005_s0, %s3443_s7  ;;  %v3474_v40 = vld [vmem:[%s4006_s1 + $0x50] sm:$0xff]   ;;  %v3471_v45 = vld [vmem:[%s4006_s1 + $0x48] sm:$0xff]   ;;  %v3473_v48 = vld [vmem:[%s4006_s1 + $0x40] sm:$0xff]   ;;  %vm790_vm5 = vcmask 1045504   ;;  %vm872_vm6 = vsmask.f32 5376 }
   0xf   : > { %v253_v6 = vld [vmem:[%s3601_s14] sm:$0xf]  ;;  %v254_v7 = vld [vmem:[%s3601_s14 + $0x4] sm:$0xf]  ;;  %v3606_v9 = vld [vmem:[%s3601_s14 + $0x8] ss:$0 sps:$4 sm:$0xff]  }
  0x10   : > { %v2874_v8 = vcombine.low %v253_v6, %v254_v7  ;;  %v3464_v10 = vld [vmem:[%s3601_s14 + $0x8] ss:$0 sps:$4 sm:$0x77]   ;;  %v283_v14 = vshll.u32 %v3606_v9, 16  ;;  %v287_v15 = vshrl.u32 %v3606_v9, 16  ;;  %v436_v17 = vrot.slane %v3606_v9, 1 }
  0x11   : > { %3216 = vmatpush3.bf16.msra.mxu0 %v3459_v2  ;;  %3224 = vmatpush3.bf16.msra.mxu1 %v3460_v3  ;;  %v425_v16 = vld [vmem:[%s3601_s14] sm:$0xe]  ;;  %v508_v22 = vld [vmem:[%s3601_s14 + $0x4] sm:$0xf]  ;;  %v509_v23 = vld [vmem:[%s3601_s14 + $0x8] sm:$0xf] }
  0x12   : > { %3229 = vmatprep.subr.bf16.mxu0 %v3463_v4  ;;  %3237 = vmatprep.subr.bf16.mxu1 %v3465_v5  ;;  %v276_v12 = vshrl.u32 %v2874_v8, 16  ;;  %v278_v13 = vshll.u32 %v2874_v8, 16  ;;  %v507_v18 = vld [vmem:[%s3601_s14] sm:$0x8]  ;;  %v285_v20 = vrot.slane %v283_v14, 1  ;;  %v2889_v21 = vcombine.low %v425_v16, %v254_v7  ;;  %v3479_v57 = vld [vmem:[%s4006_s1 + $0x78] sm:$0xff]  }
  0x13   : > { %3225 = vmatprep.mubr.msk.bf16.mxu1 %vm302_vm0, %v2874_v8  ;;  %v510_v24 = vld [vmem:[%s3601_s14 + $0xc] sm:$0x3]  ;;  %v2898_v25 = vcombine.low %v507_v18, %v508_v22  ;;  %v2917_v42 = vcombine.low %v508_v22, %v509_v23  ;;  %v771_v52 = vld [vmem:[%s3601_s14 + $0x4] sm:$0xc]  ;;  %v772_v53 = vld [vmem:[%s3601_s14 + $0x8] sm:$0xf] }
  0x14   : > { %3226 = vmatmul.mubr.msk.bf16.vlgmr.msra.gmra.mxu1 %vm302_vm0, %v3464_v10  ;;  %v280_v19 = vrot.slane %v278_v13, 1  ;;  %v289_v27 = vor.u32 %v287_v15, %v285_v20  ;;  %v435_v28 = vrot.slane %v2889_v21, 1  ;;  %v2899_v29 = vcombine.low %v509_v23, %v510_v24  ;;  %v599_v36 = vld [vmem:[%s3601_s14 + $0xc] sm:$0x7]  ;;  %v774_v55 = vld [vmem:[%s3601_s14 + $0x10] sm:$0x1] }
  0x15   : > { %3238 = vmatpush3.bf16.msra.mxu1 %v3465_v5  ;;  %v527_v31 = vrot.slane %v2898_v25, 3  ;;  %v610_v37 = vshrl.u32 %v2898_v25, 16  ;;  %v613_v38 = vshll.u32 %v2898_v25, 16  ;;  %v2908_v41 = vcombine.low %v509_v23, %v599_v36  ;;  %v773_v54 = vld [vmem:[%s3601_s14 + $0xc] sm:$0xf]  ;;  %v3481_v2 = vld [vmem:[%s4006_s1 + $0x70] sm:$0xff]  }
  0x16   : > { %3239 = vmatprep.subr.bf16.mxu1 %v3467_v11  ;;  %v281_v26 = vor.u32 %v280_v19, %v276_v12  ;;  %v437_v34 = vsel %vm434_vm2, %v435_v28, %v436_v17  ;;  %v528_v35 = vrot.slane %v2899_v29, 3  ;;  %v2927_v58 = vcombine.low %v771_v52, %v772_v53  ;;  %v863_v60 = vld [vmem:[%s3601_s14 + $0x10] sm:$0x3]  ;;  %v959_v1 = vld [vmem:[%s3601_s14 + $0x4] sm:$0x8]  ;;  %v3477_v8 = vld [vmem:[%s4006_s1 + $0x68] sm:$0xff]  }
  0x17   : > { %v612_v43 = vrot.slane %v610_v37, 3  ;;  %v615_v44 = vrot.slane %v613_v38, 4  ;;  %v618_v46 = vshrl.u32 %v2908_v41, 16  ;;  %v621_v47 = vshll.u32 %v2908_v41, 16  ;;  %v1065_v7 = vld [vmem:[%s4010_s5] sm:$0xff]  ;;  %v1067_v16 = vld [vmem:[%s4010_s5 + $0x10] sm:$0xff] }
  0x18   : > { %v286_v32 = vsel %vm274_vm1, %v281_v26, %v285_v20  ;;  %v529_v39 = vsel %vm526_vm3, %v527_v31, %v528_v35  ;;  %v2928_v59 = vcombine.low %v773_v54, %v774_v55  ;;  %v2918_v61 = vcombine.low %v599_v36, %v599_v36  ;;  %v1066_v23 = vld [vmem:[%s4010_s5 + $0x8] sm:$0xff]  ;;  %v1068_v25 = vld [vmem:[%s4010_s5 + $0x18] sm:$0xff]  ;;  %v3486_v28 = vld [vmem:[%s4006_s1 + $0x80] sm:$0xff]   ;;  %s3444_s23 = smul.u32 24, %s4013_s22 }
  0x19   : > { %3240 = vmatpush3.bf16.msra.mxu1 %v3467_v11  ;;  %3217 = vmatprep.mubr.msk.bf16.mxu0 %vm302_vm0, %v286_v32  ;;  %v616_v49 = vor.u32 %v615_v44, %v612_v43  ;;  %v620_v50 = vrot.slane %v618_v46, 3  ;;  %v623_v51 = vrot.slane %v621_v47, 4  ;;  %v3657_v62 = vcombine.low %v773_v54, %v863_v60  ;;  %v3485_v26 = vld [vmem:[%s4006_s1 + $0x88] sm:$0xff]   ;;  %v2763_v31 = vld [vmem:[%s4010_s5 + $0x20] sm:$0xf]  ;;  %v3741_v38 = vld [vmem:[%s4008_s3 + $0x38] sm:$0xff]  }
  0x1a   : > { %3253 = vmatprep.subr.bf16.mxu1 %v3472_v30  ;;  %3218 = vmatmul.mubr.msk.bf16.vlgmr.msra.gmra.mxu0 %vm302_vm0, %v289_v27  ;;  %v874_v0 = vshrl.u32 %v2927_v58, 16  ;;  %v877_v3 = vshll.u32 %v2927_v58, 16  ;;  %v2946_v6 = vcombine.low %v959_v1, %v772_v53  ;;  %v791_v9 = vrot.slane %v2927_v58, 2  ;;  %v1069_v27 = vld [vmem:[%s4010_s5 + $0x20] sm:$0xf]  ;;  %v3735_v37 = vld [vmem:[%s4008_s3 + $0x28] sm:$0xff]   ;;  %s251_s26 = scalar_lea.vmem %s4011_s6, %s3444_s23 }
  0x1b   : > { %3230 = vmatpush3.bf16.msra.mxu0 %v3463_v4  ;;  %3233 = vmatprep.mubr.msk.bf16.mxu0 %vm302_vm0, %v437_v34  ;;  %v624_v56 = vor.u32 %v623_v51, %v620_v50  ;;  %v882_v4 = vshrl.u32 %v3657_v62, 16  ;;  %v885_v5 = vshll.u32 %v3657_v62, 16  ;;  %v792_v10 = vrot.slane %v2928_v59, 2  ;;  %v3489_v34 = vld [vmem:[%s4008_s3 + $0x8] sm:$0xff]   ;;  %v3491_v36 = vld [vmem:[%s4008_s3] sm:$0xff]  }
  0x1c   : > { %3231 = vmatprep.subr.bf16.mxu0 %v3466_v33  ;;  %3241 = vmatprep.mubr.msk.bf16.mxu1 %vm302_vm0, %v529_v39  ;;  %v876_v11 = vrot.slane %v874_v0, 2  ;;  %v879_v12 = vrot.slane %v877_v3, 3  ;;  %v3532_v15 = vmov 0   ;;  %v968_v18 = vrot.slane %v2946_v6, 3 }
  0x1d   : > { %3242 = vmatmul.mubr.msk.bf16.vlgmr.msra.gmra.mxu1 %vm302_vm0, %v528_v35  ;;  %v625_v63 = vsel %vm608_vm4, %v616_v49, %v624_v56  ;;  %v884_v13 = vrot.slane %v882_v4, 2  ;;  %v887_v14 = vrot.slane %v885_v5, 3  ;;  %3455 = vset.pattern.permute.xlu0 %v3532_v15  ;;  %v969_v19 = vrot.slane %v3657_v62, 3  ;;  %v3490_v35 = vld [vmem:[%s4008_s3 + $0x10] sm:$0xff]  }
  0x1e   : > { %3254 = vmatpush3.bf16.msra.mxu1 %v3472_v30  ;;  %3257 = vmatprep.mubr.msk.bf16.mxu1 %vm302_vm0, %v2917_v42  ;;  %v880_v20 = vor.u32 %v879_v12, %v876_v11  ;;  %v793_v22 = vsel %vm790_vm5, %v791_v9, %v792_v10  ;;  %v1916_v30 = vld [vmem:[%s4010_s5 + $0x20] sm:$0xf]  ;;  %vm1054_vm7 = vcmask 257024   ;;  %v3533_v32 = vmov 0.0  }
  0x1f   : > { %3232 = vmatpush3.bf16.msra.mxu0 %v3466_v33  ;;  %3255 = vmatprep.subr.bf16.mxu1 %v3474_v40  ;;  %v888_v21 = vor.u32 %v887_v14, %v884_v13  ;;  %v970_v29 = vsel %vm526_vm3, %v968_v18, %v969_v19  ;;  %1055 = vst.msk [vmem:[#allocation2 + $0x20] sm:$0xf] %vm1054_vm7, %v3533_v32  ;;  %v3488_v33 = vld [vmem:[%s4008_s3 + $0x18] sm:$0xff]   ;;  %vm1058_vm8 = vcmask 259072   ;;  %vm1849_vm9 = vcmask 1043456  }
  0x20   : > { %3245 = vmatprep.subr.bf16.mxu0 %v3471_v45  ;;  %1072 = vperm.xlu0 %3455, %v1065_v7   ;;  %1050 = vst.msk [vmem:[#allocation2] sm:$0xff] %vm302_vm0, %v3533_v32  ;;  %1051 = vst.msk [vmem:[#allocation2 + $0x8] sm:$0xff] %vm302_vm0, %v3533_v32  ;;  %vm1842_vm10 = vcmask 64512  }
  0x21   : > { %3456 = vset.pattern.permute.xlu1 %v3532_v15  ;;  %v889_v24 = vsel %vm872_vm6, %v880_v20, %v888_v21  ;;  %1052 = vst.msk [vmem:[#allocation2 + $0x10] sm:$0xff] %vm302_vm0, %v3533_v32  ;;  %1053 = vst.msk [vmem:[#allocation2 + $0x18] sm:$0xff] %vm302_vm0, %v3533_v32 }
  0x22   : > { %3234 = vmatmul.mubr.msk.bf16.vlgmr.msra.gmra.mxu0 %vm302_vm0, %v436_v17  ;;  %3256 = vmatpush3.bf16.msra.mxu1 %v3474_v40  ;;  %v3480_v17 = vld [vmem:[%s4006_s1 + $0x60] sm:$0xff]  }
  0x23   : > { %3246 = vmatpush3.bf16.msra.mxu0 %v3471_v45  ;;  %3249 = vmatprep.mubr.msk.bf16.mxu0 %vm302_vm0, %v625_v63 }
  0x24   : > { %3247 = vmatprep.subr.bf16.mxu0 %v3473_v48  ;;  %3269 = vmatprep.subr.bf16.mxu1 %v3479_v57 }
  0x25   : > { %3258 = vmatmul.mubr.msk.bf16.vlgmr.msra.gmra.mxu1 %vm302_vm0, %v2918_v61  ;;  %1082 = vperm.xlu1 %3456, %v1067_v16  }
  0x26   : > { %3270 = vmatpush3.bf16.msra.mxu1 %v3479_v57  ;;  %3273 = vmatprep.mubr.msk.bf16.mxu1 %vm302_vm0, %v889_v24  ;;  %v1064_v41 = vld [vmem:[#allocation2 + $0x20] sm:$0xf] }
  0x27   : > { %3248 = vmatpush3.bf16.msra.mxu0 %v3473_v48  ;;  %3271 = vmatprep.subr.bf16.mxu1 %v3481_v2 }
  0x28   : > { %3261 = vmatprep.subr.bf16.mxu0 %v3477_v8  ;;  %1077 = vperm.xlu0 %3455, %v1066_v23  }
  0x29   : > { %1087 = vperm.xlu1 %3456, %v1068_v25  }
  0x2a   : > { %3250 = vmatmul.mubr.msk.bf16.vlgmr.msra.gmra.mxu0 %vm302_vm0, %v624_v56  ;;  %3272 = vmatpush3.bf16.msra.mxu1 %v3481_v2 }
  0x2b   : > { %3262 = vmatpush3.bf16.msra.mxu0 %v3477_v8  ;;  %3265 = vmatprep.mubr.msk.bf16.mxu0 %vm302_vm0, %v793_v22 }
  0x2c   : > { %3263 = vmatprep.subr.bf16.mxu0 %v3480_v17  ;;  %1092 = vperm.xlu0 %3455, %v1069_v27  }
  0x2d   : > { %3274 = vmatmul.mubr.msk.bf16.vlgmr.msra.gmra.mxu1 %vm302_vm0, %v888_v21  ;;  %1919 = vperm.xlu1 %3456, %v1065_v7  }
  0x2e   : > { %3285 = vmatprep.subr.bf16.mxu1 %v3488_v33 }
  0x2f   : > { %3264 = vmatpush3.bf16.msra.mxu0 %v3480_v17  ;;  %3286 = vmatpush3.bf16.msra.mxu1 %v3488_v33 }
  0x30   : > { %3277 = vmatprep.subr.bf16.mxu0 %v3485_v26  ;;  %1924 = vperm.xlu0 %3455, %v1066_v23  }
  0x31   : > { %1929 = vperm.xlu1 %3456, %v1067_v16   ;;  %3287 = vmatprep.subr.bf16.mxu1 %v3490_v35 }
  0x32   : > { %3266 = vmatmul.mubr.msk.bf16.vlgmr.msra.gmra.mxu0 %vm302_vm0, %v792_v10 }
  0x33   : > { %3278 = vmatpush3.bf16.msra.mxu0 %v3485_v26  ;;  %3281 = vmatprep.mubr.msk.bf16.mxu0 %vm302_vm0, %v970_v29 }
  0x34   : > { %3279 = vmatprep.subr.bf16.mxu0 %v3486_v28  ;;  %1934 = vperm.xlu0 %3455, %v1068_v25  }
  0x35   : > { %1939 = vperm.xlu1 %3456, %v1916_v30   ;;  %3288 = vmatpush3.bf16.msra.mxu1 %v3490_v35 }
  0x36   : > { %3301 = vmatprep.subr.bf16.mxu1 %v3735_v37 }
  0x37   : > { %3280 = vmatpush3.bf16.msra.mxu0 %v3486_v28 }
  0x38   : > { %2766 = vperm.xlu0 %3455, %v1065_v7   ;;  %3293 = vmatprep.subr.bf16.mxu0 %v3489_v34 }
  0x39   : > { %2771 = vperm.xlu1 %3456, %v1066_v23  }
  0x3a   : > { %3282 = vmatmul.mubr.msk.bf16.vlgmr.msra.gmra.mxu0 %vm302_vm0, %v969_v19 }
  0x3b   : > { %3294 = vmatpush3.bf16.msra.mxu0 %v3489_v34 }
  0x3c   : > { %2776 = vperm.xlu0 %3455, %v1067_v16   ;;  %3295 = vmatprep.subr.bf16.mxu0 %v3491_v36 }
  0x3d   : > { %2781 = vperm.xlu1 %3456, %v1068_v25  }
  0x3f   : > { %3296 = vmatpush3.bf16.msra.mxu0 %v3491_v36 }
  0x40   : > { %2786 = vperm.xlu0 %3455, %v2763_v31   ;;  %3309 = vmatprep.subr.bf16.mxu0 %v3741_v38  ;;  %v2951_v31 = vld [vmem:[%s4007_s2] ss:$0 sm:$0xff] }
  0x9b   : > { %v3744_v39 = vpop.permute.xlu0 %1072 }
  0xa0   : > { %v1083_v24 = vpop.permute.xlu1 %1082 }
  0xa3   : > { %v3746_v40 = vpop.permute.xlu0 %1077 }
  0xa4   : > { %v1088_v35 = vpop.permute.xlu1 %1087 }
  0xa7   : > { %v1093_v42 = vpop.permute.xlu0 %1092 }
  0xa8   : > { %v1099_v43 = vmul.f32 %v1093_v42, %v1064_v41 }
  0xaa   : > { %1104 = vst.msk [vmem:[#allocation2 + $0x20] sm:$0xf] %vm1054_vm7, %v1099_v43 }
  0xd4   : > { %v3227_v44 = vpop.f32.mrf.mxu1 }
  0xd6   : > { %v411_v45 = vpop.f32.mrf.mxu1 }
  0xd8   : > { %v3228_v46 = vpop.f32.mrf.mxu1 }
  0xda   : > { %v414_v47 = vpop.f32.mrf.mxu1  ;;  %v3219_v48 = vpop.f32.mrf.mxu0 }
  0xdb   : > { %v420_v60 = vadd.f32 %v3227_v44, %v3219_v48 }
  0xdc   : > { %v343_v49 = vpop.f32.mrf.mxu0 }
  0xdd   : > { %v3243_v50 = vpop.f32.mrf.mxu1  ;;  %v412_v63 = vadd.f32 %v411_v45, %v343_v49  ;;  %v3754_v49 = vpop.permute.xlu1 %1919 }
  0xde   : > { %v3220_v51 = vpop.f32.mrf.mxu0 }
  0xdf   : > { %v582_v52 = vpop.f32.mrf.mxu1 }
  0xe0   : > { %v346_v53 = vpop.f32.mrf.mxu0 }
  0xe1   : > { %v3244_v54 = vpop.f32.mrf.mxu1  ;;  %v415_v6 = vadd.f32 %v414_v47, %v346_v53 }
  0xe2   : > { %v3235_v55 = vpop.f32.mrf.mxu0  ;;  %v3757_v54 = vpop.permute.xlu1 %1929 }
  0xe3   : > { %v585_v56 = vpop.f32.mrf.mxu1  ;;  %v506_v0 = vadd.f32 %v3235_v55, %v420_v60 }
  0xe4   : > { %v490_v57 = vpop.f32.mrf.mxu0 }
  0xe5   : > { %v3259_v58 = vpop.f32.mrf.mxu1  ;;  %v504_v3 = vadd.f32 %v490_v57, %v412_v63  ;;  %v598_v7 = vadd.f32 %v3243_v50, %v506_v0 }
  0xe6   : > { %v3236_v59 = vpop.f32.mrf.mxu0 }
  0xe7   : > { %v754_v61 = vpop.f32.mrf.mxu1  ;;  %v596_v10 = vadd.f32 %v582_v52, %v504_v3 }
  0xe8   : > { %v493_v62 = vpop.f32.mrf.mxu0 }
  0xe9   : > { %v3260_v1 = vpop.f32.mrf.mxu1  ;;  %v505_v11 = vadd.f32 %v493_v62, %v415_v6 }
  0xea   : > { %v3251_v2 = vpop.f32.mrf.mxu0 }
  0xeb   : > { %v757_v4 = vpop.f32.mrf.mxu1  ;;  %v694_v12 = vadd.f32 %v3251_v2, %v598_v7  ;;  %v597_v18 = vadd.f32 %v585_v56, %v505_v11 }
  0xec   : > { %v678_v5 = vpop.f32.mrf.mxu0 }
  0xed   : > { %v3275_v8 = vpop.f32.mrf.mxu1  ;;  %v692_v15 = vadd.f32 %v678_v5, %v596_v10  ;;  %v770_v19 = vadd.f32 %v3259_v58, %v694_v12  ;;  %v1911_v58 = vld [vmem:[#allocation2 + $0x20] sm:$0xf] }
  0xee   : > { %v3252_v9 = vpop.f32.mrf.mxu0 }
  0xef   : > { %v942_v13 = vpop.f32.mrf.mxu1  ;;  %v768_v21 = vadd.f32 %v754_v61, %v692_v15  ;;  %v1940_v61 = vpop.permute.xlu1 %1939 }
  0xf0   : > { %v681_v14 = vpop.f32.mrf.mxu0  ;;  %v1946_v62 = vmul.f32 %v1940_v61, %v1911_v58 }
  0xf1   : > { %v3276_v16 = vpop.f32.mrf.mxu1  ;;  %v693_v22 = vadd.f32 %v681_v14, %v597_v18 }
  0xf2   : > { %v3267_v17 = vpop.f32.mrf.mxu0 }
  0xf3   : > { %v862_v23 = vadd.f32 %v3267_v17, %v770_v19  ;;  %v769_v28 = vadd.f32 %v757_v4, %v693_v22  ;;  %v945_v43 = vpop.f32.mrf.mxu1 }
  0xf4   : > { %v846_v20 = vpop.f32.mrf.mxu0 }
  0xf5   : > { %v860_v26 = vadd.f32 %v846_v20, %v768_v21  ;;  %v958_v29 = vadd.f32 %v3275_v8, %v862_v23 }
  0xf6   : > { %v3268_v25 = vpop.f32.mrf.mxu0 }
  0xf7   : > { %v956_v32 = vadd.f32 %v942_v13, %v860_v26 }
  0xf8   : > { %v849_v27 = vpop.f32.mrf.mxu0 }
  0xf9   : > { %v861_v33 = vadd.f32 %v849_v27, %v769_v28  ;;  %v3495_v27 = vld [vmem:[%s4008_s3 + $0x30] sm:$0xff]  }
  0xfa   : > { %v3283_v30 = vpop.f32.mrf.mxu0 }
  0xfb   : > { %v1039_v34 = vadd.f32 %v3283_v30, %v958_v29  ;;  %v957_v45 = vadd.f32 %v945_v43, %v861_v33 }
  0xfc   : > { %v1023_v36 = vpop.f32.mrf.mxu0 }
  0xfd   : > { %v1049_v41 = vadd.f32 %v2951_v31, %v1039_v34  ;;  %v1037_v42 = vadd.f32 %v1023_v36, %v956_v32  ;;  %v3496_v32 = vld [vmem:[%s4008_s3 + $0x48] sm:$0xff]  }
  0xfe   : > { %v3284_v44 = vpop.f32.mrf.mxu0 }
  0xff   : > { %1059 = vst.msk [vmem:[#allocation2 + $0x17] sm:$0x3f] %vm1058_vm8, %v1049_v41  ;;  %v1047_v46 = vadd.f32 %v2951_v31, %v1037_v42  ;;  %v3498_v44 = vld [vmem:[%s4008_s3 + $0x40] sm:$0xff]  }
 0x100   : > { %v1026_v47 = vpop.f32.mrf.mxu0 }
 0x101   : > { %1056 = vst.msk [vmem:[#allocation2 + $0x7] sm:$0xff] %vm302_vm0, %v1047_v46  ;;  %v1038_v48 = vadd.f32 %v1026_v47, %v957_v45  ;;  %v3499_v47 = vld [vmem:[%s4008_s3 + $0x50] sm:$0xff]  }
 0x103   : > { %v1048_v50 = vadd.f32 %v2951_v31, %v1038_v48 }
 0x105   : > { %1057 = vst.msk [vmem:[#allocation2 + $0xf] sm:$0xff] %vm302_vm0, %v1048_v50 }
 0x106   : > { %v1063_v51 = vld [vmem:[#allocation2 + $0x18] sm:$0xff] }
 0x107   : > { %v1098_v52 = vmul.f32 %v1088_v35, %v1063_v51  ;;  %v3497_v35 = vld [vmem:[%s4008_s3 + $0x58] sm:$0xff]  }
 0x108   : > { %v1060_v53 = vld [vmem:[#allocation2] sm:$0xff] }
 0x109   : > { %1103 = vst.msk [vmem:[#allocation2 + $0x18] sm:$0xff] %vm302_vm0, %v1098_v52  ;;  %v1095_v55 = vmul.f32 %v3744_v39, %v1060_v53  ;;  %v3500_v53 = vld [vmem:[%s4008_s3 + $0x68] sm:$0xff]  }
 0x10b   : > { %1100 = vst.msk [vmem:[#allocation2] sm:$0xff] %vm302_vm0, %v1095_v55 }
 0x10c   : > { %v1061_v56 = vld [vmem:[#allocation2 + $0x8] sm:$0xff]  ;;  %v1062_v57 = vld [vmem:[#allocation2 + $0x10] sm:$0xff] }
 0x10d   : > { %v1096_v59 = vmul.f32 %v3746_v40, %v1061_v56  ;;  %v1097_v60 = vmul.f32 %v1083_v24, %v1062_v57  ;;  %v3494_v24 = vld [vmem:[%s4008_s3 + $0x20] sm:$0xff]  }
 0x10f   : > { %1101 = vst.msk [vmem:[#allocation2 + $0x8] sm:$0xff] %vm302_vm0, %v1096_v59  ;;  %1102 = vst.msk [vmem:[#allocation2 + $0x10] sm:$0xff] %vm302_vm0, %v1097_v60  ;;  %v3501_v59 = vld [vmem:[%s4008_s3 + $0x78] sm:$0xff]  }
 0x110   : > { %v3765_v63 = vld [vmem:[#allocation2 + $0x1c] sm:$0x3f] }
 0x111   : > { %v3767_v0 = vld [vmem:[#allocation2 + $0x1d] sm:$0x3f] }
 0x112   : > { %v3769_v1 = vld [vmem:[#allocation2 + $0x1e] sm:$0x3f]  ;;  %v1510_v48 = vld [vmem:[#allocation2 + $0x18] sm:$0x3f] }
 0x113   : > { %1951 = vst.msk [vmem:[#allocation2 + $0x20] sm:$0xf] %vm1054_vm7, %v1946_v62  ;;  %v1105_v39 = vld [vmem:[#allocation2] sm:$0xff]  ;;  %v1513_v58 = vmax.f32 %v1510_v48, 0.0 }
 0x114   : > { %v1108_v40 = vmax.f32 %v1105_v39, 0.0 }
 0x116   : > { %v1117_v2 = vld [vmem:[#allocation2 + $0x1] sm:$0xff]  ;;  %v1118_v3 = vld [vmem:[#allocation2 + $0x9] sm:$0xff]  ;;  %v1119_v8 = vld [vmem:[#allocation2 + $0x11] sm:$0x3f] }
 0x117   : > { %v1106_v4 = vld [vmem:[#allocation2 + $0x8] sm:$0xff]  ;;  %v1120_v5 = vmax.f32 %v1117_v2, 0.0  ;;  %v1121_v6 = vmax.f32 %v1118_v3, 0.0  ;;  %v1122_v10 = vmax.f32 %v1119_v8, 0.0  ;;  %v1107_v11 = vld [vmem:[#allocation2 + $0x10] sm:$0x3f]  ;;  %v1515_v3 = vpack.c.bf16 %v1513_v58, %v1513_v58 }
 0x118   : > { %v1109_v7 = vmax.f32 %v1106_v4, 0.0  ;;  %v1262_v9 = vld [vmem:[#allocation2 + $0x2] sm:$0xff]  ;;  %v1263_v12 = vld [vmem:[#allocation2 + $0xa] sm:$0xff]  ;;  %v1110_v15 = vmax.f32 %v1107_v11, 0.0  ;;  %v1264_v25 = vld [vmem:[#allocation2 + $0x12] sm:$0x3f] }
 0x119   : > { %v1123_v13 = vpack.c.bf16 %v1121_v6, %v1120_v5  ;;  %v1344_v16 = vld [vmem:[#allocation2 + $0x6] sm:$0xff]  ;;  %v3772_v17 = vld [vmem:[#allocation2 + $0xe] sm:$0xff]  ;;  %v1124_v18 = vpack.c.bf16 %v1122_v10, %v1122_v10  ;;  %v1265_v19 = vmax.f32 %v1262_v9, 0.0  ;;  %v1266_v20 = vmax.f32 %v1263_v12, 0.0  ;;  %v1346_v28 = vld [vmem:[#allocation2 + $0x16] sm:$0x3f] }
 0x11a   : > { %v1111_v14 = vpack.c.bf16 %v1109_v7, %v1108_v40  ;;  %v1347_v21 = vmax.f32 %v1344_v16, 0.0  ;;  %v1112_v22 = vpack.c.bf16 %v1110_v15, %v1110_v15  ;;  %v1348_v23 = vmax.f32 %v3772_v17, 0.0  ;;  %v3788_v30 = vld [vmem:[#allocation2 + $0x7] sm:$0xff]  ;;  %v3790_v31 = vld [vmem:[#allocation2 + $0xf] sm:$0xff]  ;;  %v3806_v45 = vld [vmem:[#allocation2 + $0x17] sm:$0x3f] }
 0x11b   : > { %3289 = vmatprep.mubr.msk.bf16.mxu1 %vm302_vm0, %v1123_v13  ;;  %v1268_v26 = vpack.c.bf16 %v1266_v20, %v1265_v19  ;;  %v1267_v33 = vmax.f32 %v1264_v25, 0.0  ;;  %v1509_v34 = vld [vmem:[#allocation2 + $0x10] sm:$0xff]  ;;  %v1429_v36 = vmax.f32 %v3788_v30, 0.0  ;;  %v1430_v41 = vmax.f32 %v3790_v31, 0.0  ;;  %v3502_v4 = vld [vmem:[%s4008_s3 + $0x60] sm:$0xff]   ;;  %v3504_v8 = vld [vmem:[%s4008_s3 + $0x88] sm:$0xff]  }
 0x11c   : > { %3297 = vmatprep.mubr.msk.bf16.mxu0 %vm302_vm0, %v1111_v14  ;;  %3290 = vmatmul.mubr.msk.bf16.vlgmr.msra.gmra.mxu1 %vm302_vm0, %v1124_v18  ;;  %v1350_v29 = vpack.c.bf16 %v1348_v23, %v1347_v21  ;;  %v1590_v51 = vld [vmem:[#allocation2 + $0xc] sm:$0xff]  ;;  %v1591_v52 = vld [vmem:[#allocation2 + $0x14] sm:$0xff]  ;;  %v1431_v55 = vmax.f32 %v3806_v45, 0.0  ;;  %v1595_v9 = vmax.f32 %v3765_v63, 0.0  ;;  %v1677_v10 = vmax.f32 %v3767_v0, 0.0  ;;  %v3505_v13 = vld [vmem:[%s4008_s3 + $0x80] sm:$0xff]  }
 0x11d   : > { %3298 = vmatmul.mubr.msk.bf16.vlgmr.msra.gmra.mxu0 %vm302_vm0, %v1112_v22  ;;  %3302 = vmatpush3.bf16.msra.mxu1 %v3735_v37  ;;  %v1349_v37 = vmax.f32 %v1346_v28, 0.0  ;;  %v1269_v42 = vpack.c.bf16 %v1267_v33, %v1267_v33  ;;  %v1432_v46 = vpack.c.bf16 %v1430_v41, %v1429_v36  ;;  %v1672_v56 = vld [vmem:[#allocation2 + $0xd] sm:$0xff]  ;;  %v1673_v57 = vld [vmem:[#allocation2 + $0x15] sm:$0xff]  ;;  %v1593_v60 = vmax.f32 %v1590_v51, 0.0  ;;  %v1841_v16 = vld [vmem:[%s4009_s4] sm:$0xf] }
 0x11e   : > { %3305 = vmatprep.mubr.msk.bf16.mxu1 %vm302_vm0, %v1268_v26  ;;  %3310 = vmatpush3.bf16.msra.mxu0 %v3741_v38  ;;  %v1512_v38 = vmax.f32 %v1509_v34, 0.0  ;;  %v1594_v61 = vmax.f32 %v1591_v52, 0.0  ;;  %v1675_v62 = vmax.f32 %v1672_v56, 0.0  ;;  %v1676_v39 = vmax.f32 %v1673_v57, 0.0  ;;  %v3503_v5 = vld [vmem:[%s4008_s3 + $0x70] sm:$0xff]  }
 0x11f   : > { %3313 = vmatprep.mubr.msk.bf16.mxu0 %vm302_vm0, %v1350_v29  ;;  %3303 = vmatprep.subr.bf16.mxu1 %v3494_v24  ;;  %v1351_v43 = vpack.c.bf16 %v1349_v37, %v1349_v37  ;;  %v1433_v2 = vpack.c.bf16 %v1431_v55, %v1431_v55  ;;  %v1597_v12 = vpack.c.bf16 %v1595_v9, %v1595_v9  ;;  %v1759_v0 = vmax.f32 %v3769_v1, 0.0 }
 0x120   : > { %3311 = vmatprep.subr.bf16.mxu0 %v3495_v27  ;;  %v1514_v50 = vpack.c.bf16 %v1512_v38, %v1109_v7  ;;  %v1596_v40 = vpack.c.bf16 %v1594_v61, %v1593_v60  ;;  %v1678_v6 = vpack.c.bf16 %v1676_v39, %v1675_v62  ;;  %v1755_v7 = vld [vmem:[#allocation2 + $0x16] sm:$0xff]  ;;  %v1679_v14 = vpack.c.bf16 %v1677_v10, %v1677_v10 }
 0x121   : > { %3304 = vmatpush3.bf16.msra.mxu1 %v3494_v24  ;;  %v1758_v11 = vmax.f32 %v1755_v7, 0.0  ;;  %v1761_v15 = vpack.c.bf16 %v1759_v0, %v1759_v0  ;;  %v1851_v17 = vsel %vm1849_vm9, %v1841_v16, 0 }
 0x122   : > { %3312 = vmatpush3.bf16.msra.mxu0 %v3495_v27  ;;  %3317 = vmatprep.subr.bf16.mxu1 %v3496_v32 }
 0x123   : > { %3325 = vmatprep.subr.bf16.mxu0 %v3497_v35  ;;  %v1760_v63 = vpack.c.bf16 %v1758_v11, %v1348_v23 }
 0x124   : > { %3306 = vmatmul.mubr.msk.bf16.vlgmr.msra.gmra.mxu1 %vm302_vm0, %v1269_v42 }
 0x125   : > { %3314 = vmatmul.mubr.msk.bf16.vlgmr.msra.gmra.mxu0 %vm302_vm0, %v1351_v43  ;;  %3318 = vmatpush3.bf16.msra.mxu1 %v3496_v32 }
 0x126   : > { %3321 = vmatprep.mubr.msk.bf16.mxu1 %vm302_vm0, %v1432_v46  ;;  %3326 = vmatpush3.bf16.msra.mxu0 %v3497_v35 }
 0x127   : > { %3329 = vmatprep.mubr.msk.bf16.mxu0 %vm302_vm0, %v1514_v50  ;;  %3319 = vmatprep.subr.bf16.mxu1 %v3498_v44 }
 0x128   : > { %3327 = vmatprep.subr.bf16.mxu0 %v3499_v47 }
 0x129   : > { %3320 = vmatpush3.bf16.msra.mxu1 %v3498_v44 }
 0x12a   : > { %3328 = vmatpush3.bf16.msra.mxu0 %v3499_v47  ;;  %3333 = vmatprep.subr.bf16.mxu1 %v3500_v53 }
 0x12b   : > { %3341 = vmatprep.subr.bf16.mxu0 %v3501_v59 }
 0x12c   : > { %3322 = vmatmul.mubr.msk.bf16.vlgmr.msra.gmra.mxu1 %vm302_vm0, %v1433_v2 }
 0x12d   : > { %3330 = vmatmul.mubr.msk.bf16.vlgmr.msra.gmra.mxu0 %vm302_vm0, %v1515_v3  ;;  %3334 = vmatpush3.bf16.msra.mxu1 %v3500_v53 }
 0x12e   : > { %3337 = vmatprep.mubr.msk.bf16.mxu1 %vm302_vm0, %v1596_v40  ;;  %3342 = vmatpush3.bf16.msra.mxu0 %v3501_v59 }
 0x12f   : > { %3345 = vmatprep.mubr.msk.bf16.mxu0 %vm302_vm0, %v1678_v6  ;;  %3335 = vmatprep.subr.bf16.mxu1 %v3502_v4 }
 0x130   : > { %3343 = vmatprep.subr.bf16.mxu0 %v3503_v5 }
 0x131   : > { %3336 = vmatpush3.bf16.msra.mxu1 %v3502_v4 }
 0x132   : > { %3344 = vmatpush3.bf16.msra.mxu0 %v3503_v5  ;;  %3349 = vmatprep.subr.bf16.mxu1 %v3504_v8 }
 0x133   : > { %3441 = vmatprep.subr.msk.bf16.mxu0 %vm1849_vm9, %v1841_v16 }
 0x134   : > { %3338 = vmatmul.mubr.msk.bf16.vlgmr.msra.gmra.mxu1 %vm302_vm0, %v1597_v12 }
 0x135   : > { %3346 = vmatmul.mubr.msk.bf16.vlgmr.msra.gmra.mxu0 %vm302_vm0, %v1679_v14  ;;  %3350 = vmatpush3.bf16.msra.mxu1 %v3504_v8 }
 0x136   : > { %3353 = vmatprep.mubr.msk.bf16.mxu1 %vm302_vm0, %v1760_v63  ;;  %3351 = vmatprep.subr.bf16.mxu1 %v3505_v13 }
 0x137   : > { %3358 = vmatpush3.bf16.msra.mxu0 %v1851_v17 }
 0x139   : > { %3352 = vmatpush3.bf16.msra.mxu1 %v3505_v13 }
 0x13c   : > { %3354 = vmatmul.mubr.msk.bf16.vlgmr.msra.gmra.mxu1 %vm302_vm0, %v1761_v15 }
 0x1dc   : > { %v3291_v18 = vpop.f32.mrf.mxu1 }
 0x1dd   : > { %v3299_v19 = vpop.f32.mrf.mxu0 }
 0x1de   : > { %v1182_v20 = vpop.f32.mrf.mxu1  ;;  %v1257_v37 = vadd.f32 %v3299_v19, %v3291_v18 }
 0x1df   : > { %v1248_v21 = vpop.f32.mrf.mxu0 }
 0x1e0   : > { %v3292_v22 = vpop.f32.mrf.mxu1  ;;  %v1249_v36 = vadd.f32 %v1248_v21, %v1182_v20 }
 0x1e1   : > { %v3300_v1 = vpop.f32.mrf.mxu0 }
 0x1e2   : > { %v1185_v23 = vpop.f32.mrf.mxu1 }
 0x1e3   : > { %v1251_v24 = vpop.f32.mrf.mxu0 }
 0x1e4   : > { %v3307_v25 = vpop.f32.mrf.mxu1  ;;  %v1252_v43 = vadd.f32 %v1251_v24, %v1185_v23  ;;  %v3506_v23 = vld [vmem:[%s4008_s3 + $0xa8] sm:$0xff]   ;;  %v3507_v24 = vld [vmem:[%s4008_s3 + $0x98] sm:$0xff]  }
 0x1e5   : > { %v3315_v26 = vpop.f32.mrf.mxu0  ;;  %v1343_v38 = vadd.f32 %v3307_v25, %v1257_v37  ;;  %v3508_v25 = vld [vmem:[%s4008_s3 + $0xa0] sm:$0xff]   ;;  %3363 = vmatprep.subr.bf16.mxu1 %v3506_v23  ;;  %3371 = vmatprep.subr.bf16.mxu0 %v3507_v24 }
 0x1e6   : > { %v1327_v27 = vpop.f32.mrf.mxu1  ;;  %3364 = vmatpush3.bf16.msra.mxu1 %v3506_v23 }
 0x1e7   : > { %v1409_v28 = vpop.f32.mrf.mxu0  ;;  %v1341_v44 = vadd.f32 %v1327_v27, %v1249_v36  ;;  %v1425_v51 = vadd.f32 %v3315_v26, %v1343_v38  ;;  %v3509_v26 = vld [vmem:[%s4008_s3 + $0x90] sm:$0xff]   ;;  %3365 = vmatprep.subr.bf16.mxu1 %v3508_v25  ;;  %v3869_v27 = vld [vmem:[%s4008_s3 + $0xb8] sm:$0xff]  }
 0x1e8   : > { %v3308_v29 = vpop.f32.mrf.mxu1 }
 0x1e9   : > { %v3316_v32 = vpop.f32.mrf.mxu0  ;;  %v1423_v53 = vadd.f32 %v1409_v28, %v1341_v44  ;;  %v3875_v28 = vld [vmem:[%s4008_s3 + $0xc8] sm:$0xff]   ;;  %v1925_v29 = vpop.permute.xlu0 %1924 }
 0x1ea   : > { %v1330_v33 = vpop.f32.mrf.mxu1  ;;  %3366 = vmatpush3.bf16.msra.mxu1 %v3508_v25 }
 0x1eb   : > { %v1412_v34 = vpop.f32.mrf.mxu0  ;;  %v1342_v48 = vadd.f32 %v1330_v33, %v1252_v43  ;;  %3379 = vmatprep.subr.bf16.mxu1 %v3869_v27 }
 0x1ec   : > { %v3323_v35 = vpop.f32.mrf.mxu1 }
 0x1ed   : > { %v3331_v41 = vpop.f32.mrf.mxu0  ;;  %v1507_v56 = vadd.f32 %v3323_v35, %v1425_v51  ;;  %v1424_v58 = vadd.f32 %v1412_v34, %v1342_v48  ;;  %v1935_v33 = vpop.permute.xlu0 %1934 }
 0x1ee   : > { %v1491_v42 = vpop.f32.mrf.mxu1 }
 0x1ef   : > { %v1573_v46 = vpop.f32.mrf.mxu0  ;;  %v1505_v59 = vadd.f32 %v1491_v42, %v1423_v53  ;;  %v1589_v2 = vadd.f32 %v3331_v41, %v1507_v56 }
 0x1f0   : > { %v3324_v47 = vpop.f32.mrf.mxu1 }
 0x1f1   : > { %v3332_v50 = vpop.f32.mrf.mxu0  ;;  %v1587_v4 = vadd.f32 %v1573_v46, %v1505_v59  ;;  %v3882_v38 = vpop.permute.xlu0 %2766 }
 0x1f2   : > { %v1494_v52 = vpop.f32.mrf.mxu1  ;;  %v2758_v50 = vld [vmem:[#allocation2 + $0x20] sm:$0xf] }
 0x1f3   : > { %v1576_v55 = vpop.f32.mrf.mxu0  ;;  %v1506_v62 = vadd.f32 %v1494_v52, %v1424_v58 }
 0x1f4   : > { %v3339_v57 = vpop.f32.mrf.mxu1 }
 0x1f5   : > { %v3347_v60 = vpop.f32.mrf.mxu0  ;;  %v1671_v5 = vadd.f32 %v3339_v57, %v1589_v2  ;;  %v1588_v7 = vadd.f32 %v1576_v55, %v1506_v62  ;;  %v3886_v47 = vpop.permute.xlu0 %2776 }
 0x1f6   : > { %v1655_v61 = vpop.f32.mrf.mxu1 }
 0x1f7   : > { %v1737_v39 = vpop.f32.mrf.mxu0  ;;  %v1669_v8 = vadd.f32 %v1655_v61, %v1587_v4  ;;  %v1753_v11 = vadd.f32 %v3347_v60, %v1671_v5 }
 0x1f8   : > { %v3340_v3 = vpop.f32.mrf.mxu1 }
 0x1f9   : > { %v3348_v40 = vpop.f32.mrf.mxu0  ;;  %v1751_v13 = vadd.f32 %v1737_v39, %v1669_v8 }
 0x1fa   : > { %v1658_v6 = vpop.f32.mrf.mxu1 }
 0x1fb   : > { %v1670_v10 = vadd.f32 %v1658_v6, %v1588_v7  ;;  %v1740_v14 = vpop.f32.mrf.mxu0 }
 0x1fc   : > { %v3355_v9 = vpop.f32.mrf.mxu1 }
 0x1fd   : > { %v1835_v63 = vadd.f32 %v3355_v9, %v1753_v11  ;;  %v1752_v15 = vadd.f32 %v1740_v14, %v1670_v10 }
 0x1fe   : > { %v1819_v12 = vpop.f32.mrf.mxu1 }
 0x1ff   : > { %v1833_v16 = vadd.f32 %v1819_v12, %v1751_v13  ;;  %v1838_v19 = vmax.f32 %v1835_v63, 0.0 }
 0x200   : > { %v3356_v0 = vpop.f32.mrf.mxu1 }
 0x201   : > { %v1836_v20 = vmax.f32 %v1833_v16, 0.0  ;;  %v1840_v1 = vpack.c.bf16 %v1838_v19, %v1838_v19 }
 0x202   : > { %v1822_v17 = vpop.f32.mrf.mxu1 }
 0x203   : > { %v1834_v18 = vadd.f32 %v1822_v17, %v1752_v15  ;;  %v3512_v15 = vld [vmem:[%s4008_s3 + $0xb0] sm:$0xff]  }
 0x205   : > { %v1837_v21 = vmax.f32 %v1834_v18, 0.0  ;;  %v3513_v18 = vld [vmem:[%s4008_s3 + $0xc0] sm:$0xff]  }
 0x207   : > { %v1839_v22 = vpack.c.bf16 %v1837_v21, %v1836_v20 }
 0x209   : > { %3359 = vmatprep.mubr.msk.bf16.mxu0 %vm1842_vm10, %v1839_v22 }
 0x20a   : > { %3360 = vmatmul.mubr.msk.bf16.vlgmr.msra.gmra.mxu0 %vm1842_vm10, %v1840_v1  ;;  %v3514_v1 = vld [vmem:[%s4008_s3 + $0xd8] sm:$0xff]  }
 0x20b   : > { %3372 = vmatpush3.bf16.msra.mxu0 %v3507_v24 }
 0x20c   : > { %3373 = vmatprep.subr.bf16.mxu0 %v3509_v26 }
 0x20f   : > { %3374 = vmatpush3.bf16.msra.mxu0 %v3509_v26  ;;  %v3515_v26 = vld [vmem:[%s4008_s3 + $0xe8] sm:$0xff]  }
 0x210   : > { %3387 = vmatprep.subr.bf16.mxu0 %v3875_v28 }
 0x2ca   : > { %v3361_v32 = vpop.f32.mrf.mxu0 }
 0x2cb   : > { %v1903_v34 = vadd.f32 %v3361_v32, %v3806_v45 }
 0x2cc   : > { %v1887_v37 = vpop.f32.mrf.mxu0 }
 0x2cd   : > { %1906 = vst.msk [vmem:[#allocation2 + $0x17] sm:$0x3f] %vm1058_vm8, %v1903_v34  ;;  %v1901_v35 = vadd.f32 %v1887_v37, %v3788_v30  ;;  %v3516_v34 = vld [vmem:[%s4008_s3 + $0xd0] sm:$0xff]  }
 0x2ce   : > { %v3362_v36 = vpop.f32.mrf.mxu0 }
 0x2cf   : > { %1904 = vst.msk [vmem:[#allocation2 + $0x7] sm:$0xff] %vm302_vm0, %v1901_v35  ;;  %v3517_v36 = vld [vmem:[%s4008_s3 + $0xe0] sm:$0xff]  }
 0x2d0   : > { %v1890_v41 = vpop.f32.mrf.mxu0 }
 0x2d1   : > { %v1902_v42 = vadd.f32 %v1890_v41, %v3790_v31  ;;  %v2787_v31 = vpop.permute.xlu0 %2786 }
 0x2d2   : > { %v2793_v53 = vmul.f32 %v2787_v31, %v2758_v50 }
 0x2d3   : > { %1905 = vst.msk [vmem:[#allocation2 + $0xf] sm:$0xff] %vm302_vm0, %v1902_v42 }
 0x2d4   : > { %v1910_v43 = vld [vmem:[#allocation2 + $0x18] sm:$0xff] }
 0x2d5   : > { %v1945_v44 = vmul.f32 %v1935_v33, %v1910_v43 }
 0x2d6   : > { %v1907_v46 = vld [vmem:[#allocation2] sm:$0xff] }
 0x2d7   : > { %v1942_v45 = vmul.f32 %v3754_v49, %v1907_v46  ;;  %1950 = vst.msk [vmem:[#allocation2 + $0x18] sm:$0xff] %vm302_vm0, %v1945_v44  ;;  %v3518_v46 = vld [vmem:[%s4008_s3 + $0xf8] sm:$0xff]  }
 0x2d9   : > { %1947 = vst.msk [vmem:[#allocation2] sm:$0xff] %vm302_vm0, %v1942_v45 }
 0x2da   : > { %v1908_v30 = vld [vmem:[#allocation2 + $0x8] sm:$0xff]  ;;  %v1909_v48 = vld [vmem:[#allocation2 + $0x10] sm:$0xff] }
 0x2db   : > { %v1943_v51 = vmul.f32 %v1925_v29, %v1908_v30  ;;  %v1944_v52 = vmul.f32 %v3757_v54, %v1909_v48 }
 0x2dd   : > { %1948 = vst.msk [vmem:[#allocation2 + $0x8] sm:$0xff] %vm302_vm0, %v1943_v51  ;;  %1949 = vst.msk [vmem:[#allocation2 + $0x10] sm:$0xff] %vm302_vm0, %v1944_v52  ;;  %v3519_v51 = vld [vmem:[%s4008_s3 + $0x108] sm:$0xff]  }
 0x2de   : > { %v3894_v55 = vld [vmem:[#allocation2 + $0x1c] sm:$0x3f] }
 0x2df   : > { %v3896_v56 = vld [vmem:[#allocation2 + $0x1d] sm:$0x3f] }
 0x2e0   : > { %v3898_v49 = vld [vmem:[#allocation2 + $0x1e] sm:$0x3f]  ;;  %v2358_v41 = vld [vmem:[#allocation2 + $0x18] sm:$0x3f] }
 0x2e1   : > { %2798 = vst.msk [vmem:[#allocation2 + $0x20] sm:$0xf] %vm1054_vm7, %v2793_v53  ;;  %v1952_v57 = vld [vmem:[#allocation2] sm:$0xff]  ;;  %v2361_v50 = vmax.f32 %v2358_v41, 0.0 }
 0x2e2   : > { %v1955_v61 = vmax.f32 %v1952_v57, 0.0 }
 0x2e4   : > { %v1965_v58 = vld [vmem:[#allocation2 + $0x1] sm:$0xff]  ;;  %v1966_v59 = vld [vmem:[#allocation2 + $0x9] sm:$0xff]  ;;  %v1967_v2 = vld [vmem:[#allocation2 + $0x11] sm:$0x3f] }
 0x2e5   : > { %v1953_v60 = vld [vmem:[#allocation2 + $0x8] sm:$0xff]  ;;  %v1968_v54 = vmax.f32 %v1965_v58, 0.0  ;;  %v1969_v62 = vmax.f32 %v1966_v59, 0.0  ;;  %v1970_v4 = vmax.f32 %v1967_v2, 0.0  ;;  %v1954_v40 = vld [vmem:[#allocation2 + $0x10] sm:$0x3f]  ;;  %v2363_v59 = vpack.c.bf16 %v2361_v50, %v2361_v50 }
 0x2e6   : > { %v1956_v39 = vmax.f32 %v1953_v60, 0.0  ;;  %v2110_v3 = vld [vmem:[#allocation2 + $0x2] sm:$0xff]  ;;  %v2111_v5 = vld [vmem:[#allocation2 + $0xa] sm:$0xff]  ;;  %v1957_v10 = vmax.f32 %v1954_v40, 0.0  ;;  %v2112_v16 = vld [vmem:[#allocation2 + $0x12] sm:$0x3f] }
 0x2e7   : > { %v2113_v6 = vmax.f32 %v2110_v3, 0.0  ;;  %v2192_v7 = vld [vmem:[#allocation2 + $0x6] sm:$0xff]  ;;  %v1971_v8 = vpack.c.bf16 %v1969_v62, %v1968_v54  ;;  %v2114_v11 = vmax.f32 %v2111_v5, 0.0  ;;  %v3901_v12 = vld [vmem:[#allocation2 + $0xe] sm:$0xff]  ;;  %v1972_v13 = vpack.c.bf16 %v1970_v4, %v1970_v4  ;;  %v2194_v19 = vld [vmem:[#allocation2 + $0x16] sm:$0x3f] }
 0x2e8   : > { %v1958_v9 = vpack.c.bf16 %v1956_v39, %v1955_v61  ;;  %v2195_v14 = vmax.f32 %v2192_v7, 0.0  ;;  %v2196_v63 = vmax.f32 %v3901_v12, 0.0  ;;  %v1959_v0 = vpack.c.bf16 %v1957_v10, %v1957_v10  ;;  %v3917_v21 = vld [vmem:[#allocation2 + $0x7] sm:$0xff]  ;;  %v3919_v22 = vld [vmem:[#allocation2 + $0xf] sm:$0xff]  ;;  %v3935_v37 = vld [vmem:[#allocation2 + $0x17] sm:$0x3f] }
 0x2e9   : > { %3367 = vmatprep.mubr.msk.bf16.mxu1 %vm302_vm0, %v1971_v8  ;;  %v2116_v17 = vpack.c.bf16 %v2114_v11, %v2113_v6  ;;  %v2115_v23 = vmax.f32 %v2112_v16, 0.0  ;;  %v2357_v24 = vld [vmem:[#allocation2 + $0x10] sm:$0xff]  ;;  %v2197_v25 = vmax.f32 %v2194_v19, 0.0  ;;  %v2278_v29 = vmax.f32 %v3919_v22, 0.0  ;;  %v3521_v54 = vld [vmem:[%s4008_s3 + $0x100] sm:$0xff]   ;;  %v3522_v2 = vld [vmem:[%s4008_s3 + $0x118] sm:$0xff]  }
 0x2ea   : > { %3375 = vmatprep.mubr.msk.bf16.mxu0 %vm302_vm0, %v1958_v9  ;;  %3368 = vmatmul.mubr.msk.bf16.vlgmr.msra.gmra.mxu1 %vm302_vm0, %v1972_v13  ;;  %v2198_v20 = vpack.c.bf16 %v2196_v63, %v2195_v14  ;;  %v2438_v43 = vld [vmem:[#allocation2 + $0xc] sm:$0xff]  ;;  %v2439_v44 = vld [vmem:[#allocation2 + $0x14] sm:$0xff]  ;;  %v2279_v45 = vmax.f32 %v3935_v37, 0.0  ;;  %v2443_v3 = vmax.f32 %v3894_v55, 0.0  ;;  %v2525_v4 = vmax.f32 %v3896_v56, 0.0 }
 0x2eb   : > { %3376 = vmatmul.mubr.msk.bf16.vlgmr.msra.gmra.mxu0 %vm302_vm0, %v1959_v0  ;;  %3380 = vmatpush3.bf16.msra.mxu1 %v3869_v27  ;;  %v2277_v27 = vmax.f32 %v3917_v21, 0.0  ;;  %v2117_v32 = vpack.c.bf16 %v2115_v23, %v2115_v23  ;;  %v2199_v33 = vpack.c.bf16 %v2197_v25, %v2197_v25  ;;  %v2520_v30 = vld [vmem:[#allocation2 + $0xd] sm:$0xff]  ;;  %v2521_v48 = vld [vmem:[#allocation2 + $0x15] sm:$0xff]  ;;  %v2441_v52 = vmax.f32 %v2438_v43, 0.0  ;;  %v3094_v9 = vld [vmem:[%s4009_s4 + $0x4] sm:$0xf] }
 0x2ec   : > { %3383 = vmatprep.mubr.msk.bf16.mxu1 %vm302_vm0, %v2116_v17  ;;  %3388 = vmatpush3.bf16.msra.mxu0 %v3875_v28  ;;  %v2360_v28 = vmax.f32 %v2357_v24, 0.0  ;;  %v2442_v31 = vmax.f32 %v2439_v44, 0.0  ;;  %v2523_v53 = vmax.f32 %v2520_v30, 0.0  ;;  %v2524_v57 = vmax.f32 %v2521_v48, 0.0  ;;  %v3520_v60 = vld [vmem:[%s4008_s3 + $0xf0] sm:$0xff]  }
 0x2ed   : > { %3391 = vmatprep.mubr.msk.bf16.mxu0 %vm302_vm0, %v2198_v20  ;;  %3381 = vmatprep.subr.bf16.mxu1 %v3512_v15  ;;  %v2280_v35 = vpack.c.bf16 %v2278_v29, %v2277_v27  ;;  %v2281_v58 = vpack.c.bf16 %v2279_v45, %v2279_v45  ;;  %v2445_v5 = vpack.c.bf16 %v2443_v3, %v2443_v3  ;;  %v3523_v6 = vld [vmem:[%s4008_s3 + $0x110] sm:$0xff]   ;;  %v2607_v56 = vmax.f32 %v3898_v49, 0.0 }
 0x2ee   : > { %3389 = vmatprep.subr.bf16.mxu0 %v3513_v18  ;;  %v2362_v42 = vpack.c.bf16 %v2360_v28, %v1956_v39  ;;  %v2444_v61 = vpack.c.bf16 %v2442_v31, %v2441_v52  ;;  %v2526_v62 = vpack.c.bf16 %v2524_v57, %v2523_v53  ;;  %v2603_v39 = vld [vmem:[#allocation2 + $0x16] sm:$0xff]  ;;  %v2527_v7 = vpack.c.bf16 %v2525_v4, %v2525_v4 }
 0x2ef   : > { %3382 = vmatpush3.bf16.msra.mxu1 %v3512_v15  ;;  %v2606_v40 = vmax.f32 %v2603_v39, 0.0  ;;  %v2609_v8 = vpack.c.bf16 %v2607_v56, %v2607_v56  ;;  %v2698_v10 = vsel %vm1849_vm9, %v3094_v9, 0 }
 0x2f0   : > { %3390 = vmatpush3.bf16.msra.mxu0 %v3513_v18  ;;  %3395 = vmatprep.subr.bf16.mxu1 %v3514_v1 }
 0x2f1   : > { %3403 = vmatprep.subr.bf16.mxu0 %v3515_v26  ;;  %v2608_v55 = vpack.c.bf16 %v2606_v40, %v2196_v63 }
 0x2f2   : > { %3384 = vmatmul.mubr.msk.bf16.vlgmr.msra.gmra.mxu1 %vm302_vm0, %v2117_v32 }
 0x2f3   : > { %3392 = vmatmul.mubr.msk.bf16.vlgmr.msra.gmra.mxu0 %vm302_vm0, %v2199_v33  ;;  %3396 = vmatpush3.bf16.msra.mxu1 %v3514_v1 }
 0x2f4   : > { %3399 = vmatprep.mubr.msk.bf16.mxu1 %vm302_vm0, %v2280_v35  ;;  %3404 = vmatpush3.bf16.msra.mxu0 %v3515_v26 }
 0x2f5   : > { %3407 = vmatprep.mubr.msk.bf16.mxu0 %vm302_vm0, %v2362_v42  ;;  %3397 = vmatprep.subr.bf16.mxu1 %v3516_v34 }
 0x2f6   : > { %3405 = vmatprep.subr.bf16.mxu0 %v3517_v36 }
 0x2f7   : > { %3398 = vmatpush3.bf16.msra.mxu1 %v3516_v34 }
 0x2f8   : > { %3406 = vmatpush3.bf16.msra.mxu0 %v3517_v36  ;;  %3411 = vmatprep.subr.bf16.mxu1 %v3518_v46 }
 0x2f9   : > { %3419 = vmatprep.subr.bf16.mxu0 %v3519_v51 }
 0x2fa   : > { %3400 = vmatmul.mubr.msk.bf16.vlgmr.msra.gmra.mxu1 %vm302_vm0, %v2281_v58 }
 0x2fb   : > { %3408 = vmatmul.mubr.msk.bf16.vlgmr.msra.gmra.mxu0 %vm302_vm0, %v2363_v59  ;;  %3412 = vmatpush3.bf16.msra.mxu1 %v3518_v46 }
 0x2fc   : > { %3415 = vmatprep.mubr.msk.bf16.mxu1 %vm302_vm0, %v2444_v61  ;;  %3420 = vmatpush3.bf16.msra.mxu0 %v3519_v51 }
 0x2fd   : > { %3423 = vmatprep.mubr.msk.bf16.mxu0 %vm302_vm0, %v2526_v62  ;;  %3413 = vmatprep.subr.bf16.mxu1 %v3520_v60 }
 0x2fe   : > { %3421 = vmatprep.subr.bf16.mxu0 %v3521_v54 }
 0x2ff   : > { %3414 = vmatpush3.bf16.msra.mxu1 %v3520_v60 }
 0x300   : > { %3422 = vmatpush3.bf16.msra.mxu0 %v3521_v54  ;;  %3427 = vmatprep.subr.bf16.mxu1 %v3522_v2 }
 0x301   : > { %3442 = vmatprep.subr.msk.bf16.mxu0 %vm1849_vm9, %v3094_v9 }
 0x302   : > { %3416 = vmatmul.mubr.msk.bf16.vlgmr.msra.gmra.mxu1 %vm302_vm0, %v2445_v5 }
 0x303   : > { %3424 = vmatmul.mubr.msk.bf16.vlgmr.msra.gmra.mxu0 %vm302_vm0, %v2527_v7  ;;  %3428 = vmatpush3.bf16.msra.mxu1 %v3522_v2 }
 0x304   : > { %3431 = vmatprep.mubr.msk.bf16.mxu1 %vm302_vm0, %v2608_v55  ;;  %3429 = vmatprep.subr.bf16.mxu1 %v3523_v6 }
 0x305   : > { %3436 = vmatpush3.bf16.msra.mxu0 %v2698_v10 }
 0x307   : > { %3430 = vmatpush3.bf16.msra.mxu1 %v3523_v6 }
 0x30a   : > { %3432 = vmatmul.mubr.msk.bf16.vlgmr.msra.gmra.mxu1 %vm302_vm0, %v2609_v8 }
 0x3aa   : > { %v3369_v11 = vpop.f32.mrf.mxu1 }
 0x3ab   : > { %v3377_v12 = vpop.f32.mrf.mxu0 }
 0x3ac   : > { %v2030_v13 = vpop.f32.mrf.mxu1  ;;  %v2105_v25 = vadd.f32 %v3377_v12, %v3369_v11 }
 0x3ad   : > { %v2096_v14 = vpop.f32.mrf.mxu0 }
 0x3ae   : > { %v3370_v63 = vpop.f32.mrf.mxu1  ;;  %v2097_v27 = vadd.f32 %v2096_v14, %v2030_v13 }
 0x3af   : > { %v3378_v0 = vpop.f32.mrf.mxu0 }
 0x3b0   : > { %v2033_v49 = vpop.f32.mrf.mxu1 }
 0x3b1   : > { %v2099_v15 = vpop.f32.mrf.mxu0 }
 0x3b2   : > { %v3385_v16 = vpop.f32.mrf.mxu1  ;;  %v2100_v33 = vadd.f32 %v2099_v15, %v2033_v49 }
 0x3b3   : > { %v3393_v17 = vpop.f32.mrf.mxu0  ;;  %v2191_v28 = vadd.f32 %v3385_v16, %v2105_v25 }
 0x3b4   : > { %v2175_v18 = vpop.f32.mrf.mxu1 }
 0x3b5   : > { %v2257_v19 = vpop.f32.mrf.mxu0  ;;  %v2189_v34 = vadd.f32 %v2175_v18, %v2097_v27  ;;  %v2273_v43 = vadd.f32 %v3393_v17, %v2191_v28  ;;  %v2772_v18 = vpop.permute.xlu1 %2771 }
 0x3b6   : > { %v3386_v20 = vpop.f32.mrf.mxu1 }
 0x3b7   : > { %v3394_v1 = vpop.f32.mrf.mxu0  ;;  %v2271_v46 = vadd.f32 %v2257_v19, %v2189_v34 }
 0x3b8   : > { %v2178_v23 = vpop.f32.mrf.mxu1 }
 0x3b9   : > { %v2260_v24 = vpop.f32.mrf.mxu0  ;;  %v2190_v41 = vadd.f32 %v2178_v23, %v2100_v33  ;;  %v2782_v23 = vpop.permute.xlu1 %2781 }
 0x3ba   : > { %v3401_v26 = vpop.f32.mrf.mxu1 }
 0x3bb   : > { %v3409_v29 = vpop.f32.mrf.mxu0  ;;  %v2355_v30 = vadd.f32 %v3401_v26, %v2273_v43  ;;  %v2272_v50 = vadd.f32 %v2260_v24, %v2190_v41 }
 0x3bc   : > { %v2339_v32 = vpop.f32.mrf.mxu1 }
 0x3bd   : > { %v2421_v35 = vpop.f32.mrf.mxu0  ;;  %v2353_v51 = vadd.f32 %v2339_v32, %v2271_v46  ;;  %v2437_v58 = vadd.f32 %v3409_v29, %v2355_v30 }
 0x3be   : > { %v3402_v36 = vpop.f32.mrf.mxu1 }
 0x3bf   : > { %v3410_v42 = vpop.f32.mrf.mxu0  ;;  %v2435_v60 = vadd.f32 %v2421_v35, %v2353_v51 }
 0x3c0   : > { %v2342_v44 = vpop.f32.mrf.mxu1 }
 0x3c1   : > { %v2424_v45 = vpop.f32.mrf.mxu0  ;;  %v2354_v53 = vadd.f32 %v2342_v44, %v2272_v50 }
 0x3c2   : > { %v3417_v48 = vpop.f32.mrf.mxu1 }
 0x3c3   : > { %v3425_v52 = vpop.f32.mrf.mxu0  ;;  %v2519_v54 = vadd.f32 %v3417_v48, %v2437_v58  ;;  %v2436_v39 = vadd.f32 %v2424_v45, %v2354_v53 }
 0x3c4   : > { %v2503_v31 = vpop.f32.mrf.mxu1 }
 0x3c5   : > { %v2585_v57 = vpop.f32.mrf.mxu0  ;;  %v2517_v2 = vadd.f32 %v2503_v31, %v2435_v60  ;;  %v2601_v40 = vadd.f32 %v3425_v52, %v2519_v54 }
 0x3c6   : > { %v3418_v59 = vpop.f32.mrf.mxu1 }
 0x3c7   : > { %v3426_v61 = vpop.f32.mrf.mxu0  ;;  %v2599_v6 = vadd.f32 %v2585_v57, %v2517_v2 }
 0x3c8   : > { %v2506_v62 = vpop.f32.mrf.mxu1 }
 0x3c9   : > { %v2518_v4 = vadd.f32 %v2506_v62, %v2436_v39  ;;  %v2588_v7 = vpop.f32.mrf.mxu0 }
 0x3ca   : > { %v3433_v3 = vpop.f32.mrf.mxu1 }
 0x3cb   : > { %v2683_v55 = vadd.f32 %v3433_v3, %v2601_v40  ;;  %v2600_v8 = vadd.f32 %v2588_v7, %v2518_v4 }
 0x3cc   : > { %v2667_v5 = vpop.f32.mrf.mxu1 }
 0x3cd   : > { %v2681_v9 = vadd.f32 %v2667_v5, %v2599_v6  ;;  %v2686_v12 = vmax.f32 %v2683_v55, 0.0 }
 0x3ce   : > { %v3434_v56 = vpop.f32.mrf.mxu1 }
 0x3cf   : > { %v2684_v13 = vmax.f32 %v2681_v9, 0.0  ;;  %v2688_v0 = vpack.c.bf16 %v2686_v12, %v2686_v12 }
 0x3d0   : > { %v2670_v10 = vpop.f32.mrf.mxu1 }
 0x3d1   : > { %v2682_v11 = vadd.f32 %v2670_v10, %v2600_v8 }
 0x3d3   : > { %v2685_v14 = vmax.f32 %v2682_v11, 0.0 }
 0x3d5   : > { %v2687_v63 = vpack.c.bf16 %v2685_v14, %v2684_v13 }
 0x3d7   : > { %3437 = vmatprep.mubr.msk.bf16.mxu0 %vm1842_vm10, %v2687_v63 }
 0x3d8   : > { %3438 = vmatmul.mubr.msk.bf16.vlgmr.msra.gmra.mxu0 %vm1842_vm10, %v2688_v0 }
 0x498   : > { %v3439_v49 = vpop.f32.mrf.mxu0 }
 0x499   : > { %v2750_v15 = vadd.f32 %v3439_v49, %v3935_v37 }
 0x49a   : > { %v2734_v16 = vpop.f32.mrf.mxu0 }
 0x49b   : > { %2753 = vst.msk [vmem:[#allocation2 + $0x17] sm:$0x3f] %vm1058_vm8, %v2750_v15  ;;  %v2748_v17 = vadd.f32 %v2734_v16, %v3917_v21 }
 0x49c   : > { %v3440_v19 = vpop.f32.mrf.mxu0 }
 0x49d   : > { %2751 = vst.msk [vmem:[#allocation2 + $0x7] sm:$0xff] %vm302_vm0, %v2748_v17 }
 0x49e   : > { %v2737_v20 = vpop.f32.mrf.mxu0 }
 0x49f   : > { %v2749_v1 = vadd.f32 %v2737_v20, %v3919_v22 }
 0x4a1   : > { %2752 = vst.msk [vmem:[#allocation2 + $0xf] sm:$0xff] %vm302_vm0, %v2749_v1 }
 0x4a2   : > { %v2757_v24 = vld [vmem:[#allocation2 + $0x18] sm:$0xff] }
 0x4a3   : > { %v2792_v25 = vmul.f32 %v2782_v23, %v2757_v24 }
 0x4a4   : > { %v2754_v26 = vld [vmem:[#allocation2] sm:$0xff] }
 0x4a5   : > { %2797 = vst.msk [vmem:[#allocation2 + $0x18] sm:$0xff] %vm302_vm0, %v2792_v25  ;;  %v2789_v37 = vmul.f32 %v3882_v38, %v2754_v26 }
 0x4a7   : > { %2794 = vst.msk [vmem:[#allocation2] sm:$0xff] %vm302_vm0, %v2789_v37 }
 0x4a8   : > { %v2755_v21 = vld [vmem:[#allocation2 + $0x8] sm:$0xff]  ;;  %v2756_v27 = vld [vmem:[#allocation2 + $0x10] sm:$0xff] }
 0x4a9   : > { %v2790_v29 = vmul.f32 %v2772_v18, %v2755_v21  ;;  %v2791_v28 = vmul.f32 %v3886_v47, %v2756_v27 }
 0x4ab   : > { %2795 = vst.msk [vmem:[#allocation2 + $0x8] sm:$0xff] %vm302_vm0, %v2790_v29  ;;  %2796 = vst.msk [vmem:[#allocation2 + $0x10] sm:$0xff] %vm302_vm0, %v2791_v28 }
 0x4b2   : > { %v2799_v22 = vld [vmem:[#allocation2 + $0x7] sm:$0xff]  ;;  %v2800_v32 = vld [vmem:[#allocation2 + $0xf] sm:$0xff]  ;;  %v2801_v33 = vld [vmem:[#allocation2 + $0x17] sm:$0x3f] }
 0x4b3   : > { %v2802_v38 = vmax.f32 %v2799_v22, 0.0  ;;  %v2803_v34 = vmax.f32 %v2800_v32, 0.0  ;;  %v2804_v35 = vmax.f32 %v2801_v33, 0.0 }
 0x4b5   : > { %2805 = vst.msk [vmem:[%s251_s26] sm:$0xff] %vm302_vm0, %v2802_v38  ;;  %2806 = vst.msk [vmem:[%s251_s26 + $0x8] sm:$0xff] %vm302_vm0, %v2803_v34 }
 0x4b6   : > { %2807 = vst.msk [vmem:[%s251_s26 + $0x10] sm:$0x3f] %vm1058_vm8, %v2804_v35 }
 0x4b7 PF: > { %s16_s21 = sadd.s32 1, %s3530_s21  }
 0x4b8   : > { %p13_p4 = scmp.ge.s32.totalorder %s16_s21, 4  }
 0x4ba   :  { %15 = sbr.rel (!%p13_p4) target bundleno = 1 (0x1), region = 100 }

</bundles_post_ra>
